<compile_context>
chip_gen: v7x
topology: tpu7x:2x2x1
jax: 0.10.0
libtpu: 0.0.40
codegen_flags: <defaults>
</compile_context>

<pallas_src>
import functools

import jax
import jax.numpy as jnp
from jax.experimental import pallas as pl
from jax.experimental.pallas import tpu as pltpu

F32 = jnp.float32


def _vmem():
    return pl.BlockSpec(memory_space=pltpu.MemorySpace.VMEM)


# ----------------------------------------------------------------------------
# Kernel 1: fused lin_0 + edge net + message-passing loop (NNConv + GRU)
# ----------------------------------------------------------------------------
def _mp_fused_kernel(nf_ref, ef_ref, src_ref, dst_ref,
                     lin0_w_ref, lin0_b_ref,
                     ew1_ref, eb1_ref,
                     w2r_ref, b2m_ref, expand_ref, collapse_ref,
                     conv_b_ref, gru_wx_ref, gru_wh_ref, gru_b_ref,
                     out_ref, *, H, n_steps):
    N = nf_ref.shape[0]
    E = ef_ref.shape[0]

    # ---- loop-invariant work (done once, stays in VMEM/vregs) -------------
    # out = lin_0(n_feat)
    out = (jnp.dot(nf_ref[...], lin0_w_ref[...], preferred_element_type=F32)
           + lin0_b_ref[...])                                            # (N, H)

    # edge network hidden: a1 = relu(e_feat @ W1 + b1)                    (E, EH)
    a1 = jnp.maximum(
        jnp.dot(ef_ref[...], ew1_ref[...], preferred_element_type=F32)
        + eb1_ref[...], 0.0)
    # a1e[e, k*H + j] = a1[e, k]  (lane-expanded once, reused every step)
    a1e = jnp.dot(a1, expand_ref[...], preferred_element_type=F32)       # (E, EH*H)

    # one-hot gather / scatter matrices built in-kernel from edge endpoints
    gmat = (jax.lax.broadcasted_iota(jnp.int32, (E, N), 1)
            == src_ref[...]).astype(F32)                                 # (E, N)
    smat = (jax.lax.broadcasted_iota(jnp.int32, (N, E), 0)
            == dst_ref[...]).astype(F32)                                 # (N, E)

    w2r = w2r_ref[...]
    b2m = b2m_ref[...]
    collapse = collapse_ref[...]
    conv_b = conv_b_ref[...]
    gru_wx = gru_wx_ref[...]
    gru_wh = gru_wh_ref[...]
    gru_b = gru_b_ref[...]

    # ---- message-passing loop (fully fused, no HBM round-trips) -----------
    for _ in range(n_steps):
        x_src = jnp.dot(gmat, out, preferred_element_type=F32)           # (E, H)
        # NNConv message  msg[e] = x_src[e] @ reshape(a1[e] @ W2 + b2, (H, H))
        # computed without ever materializing the (E, H, H) per-edge weights:
        t = jnp.dot(x_src, w2r, preferred_element_type=F32)              # (E, EH*H)
        msg = (jnp.dot(a1e * t, collapse, preferred_element_type=F32)
               + jnp.dot(x_src, b2m, preferred_element_type=F32))        # (E, H)
        # TODO(synk): dropout(p=0.1) on the messages is identity (eval mode).
        m = jnp.dot(smat, msg, preferred_element_type=F32) + conv_b      # (N, H)

        # GRU cell — gates in one lane-dense (N, 4H = 128) tensor,
        # column blocks: [r | z | n_x | n_h]
        g = (jnp.dot(m, gru_wx, preferred_element_type=F32)
             + jnp.dot(out, gru_wh, preferred_element_type=F32) + gru_b)
        r = jax.nn.sigmoid(g[:, 0:H])
        z = jax.nn.sigmoid(g[:, H:2 * H])
        n = jnp.tanh(g[:, 2 * H:3 * H] + r * g[:, 3 * H:4 * H])
        out = (1.0 - z) * n + z * out                                    # (N, H)

    out_ref[...] = out


# ----------------------------------------------------------------------------
# Kernel 2: fused Set2Set readout + lin3 + predict
# ----------------------------------------------------------------------------
def _set2set_head_kernel(feat_ref, gid_ref, *refs, H, B, n_iters, n_layers):
    lstm_refs = refs[:2 * n_layers]
    lin3_w_ref, lin3_b_ref, pred_w_ref, pred_b_ref, pred_ref = refs[2 * n_layers:]

    feat = feat_ref[...]                                                 # (N, H)
    N = feat.shape[0]
    member = (jax.lax.broadcasted_iota(jnp.int32, (B, N), 0)
              == gid_ref[...]).astype(F32)                               # (B, N)

    # hoist all LSTM weight loads out of the unrolled loops
    lstm_w = [lstm_refs[2 * l][...] for l in range(n_layers)]
    lstm_b = [lstm_refs[2 * l + 1][...] for l in range(n_layers)]

    def lstm_cell(x_parts, h, c, w, b):
        # w rows: [w_ih (H rows per input part) ; w_hh (H rows)]; gates i,f,g,o
        g = b
        row = 0
        for xp in x_parts:
            g = g + jnp.dot(xp, w[row:row + H], preferred_element_type=F32)
            row += H
        g = g + jnp.dot(h, w[row:row + H], preferred_element_type=F32)   # (B, 4H)
        i = jax.nn.sigmoid(g[:, 0:H])
        f = jax.nn.sigmoid(g[:, H:2 * H])
        gg = jnp.tanh(g[:, 2 * H:3 * H])
        o = jax.nn.sigmoid(g[:, 3 * H:4 * H])
        c_new = f * c + i * gg
        h_new = o * jnp.tanh(c_new)
        return h_new, c_new

    h = [jnp.zeros((B, H), F32) for _ in range(n_layers)]
    c = [jnp.zeros((B, H), F32) for _ in range(n_layers)]
    # q_star = [q | readout] is kept as two (B, H) halves; its consumers
    # (layer-0 LSTM, lin3) use split weight row-blocks, so no in-kernel concat.
    q_part = jnp.zeros((B, H), F32)
    r_part = jnp.zeros((B, H), F32)

    for _ in range(n_iters):
        x_parts = (q_part, r_part)
        for layer in range(n_layers):
            h[layer], c[layer] = lstm_cell(x_parts, h[layer], c[layer],
                                           lstm_w[layer], lstm_b[layer])
            x_parts = (h[layer],)
        q = h[n_layers - 1]                                              # (B, H)

        # masked softmax attention over the nodes of each graph
        scores = jax.lax.dot_general(q, feat, (((1,), (1,)), ((), ())),
                                     preferred_element_type=F32)         # (B, N)
        masked = jnp.where(member > 0.0, scores, jnp.float32(-1e30))
        mmax = jnp.max(masked, axis=1, keepdims=True)
        e = jnp.exp(masked - mmax) * member
        denom = jnp.maximum(jnp.sum(e, axis=1, keepdims=True),
                            jnp.float32(1e-20))                          # NaN guard
        alpha = e / denom
        readout = jnp.dot(alpha, feat, preferred_element_type=F32)       # (B, H)
        q_part, r_part = q, readout

    # out = relu(lin3(q_star)); predict = predict(out)  (lane-padded output)
    lin3_w = lin3_w_ref[...]
    y = jnp.maximum(
        jnp.dot(q_part, lin3_w[0:H], preferred_element_type=F32)
        + jnp.dot(r_part, lin3_w[H:2 * H], preferred_element_type=F32)
        + lin3_b_ref[...], 0.0)                                          # (B, 2H)
    pred_ref[...] = (jnp.dot(y, pred_w_ref[...], preferred_element_type=F32)
                     + pred_b_ref[...])                                  # (B, PAD)


# ----------------------------------------------------------------------------
# Parameter init (torch-like layout) + one-time kernel-ready restructuring
# ----------------------------------------------------------------------------
def init_params(key, H=32, EH=16, n_classes=3, node_in=23, edge_in=19,
                n_lstm_layers=3):
    ks = iter(jax.random.split(key, 64))

    def u(k, shape, fan_in):
        return (jax.random.uniform(k, shape, F32, -1.0, 1.0)
                / jnp.sqrt(jnp.float32(fan_in)))

    p = {"H": H, "EH": EH, "n_classes": n_classes}
    p["lin0_w"] = u(next(ks), (node_in, H), node_in)
    p["lin0_b"] = u(next(ks), (H,), node_in)
    p["edge_w1"] = u(next(ks), (edge_in, EH), edge_in)
    p["edge_b1"] = u(next(ks), (EH,), edge_in)
    p["edge_w2"] = u(next(ks), (EH, H * H), EH)
    p["edge_b2"] = u(next(ks), (H * H,), EH)
    p["conv_bias"] = jnp.zeros((H,), F32)
    # GRU (1 layer), torch gate order r, z, n.
    p["gru_w_ih"] = u(next(ks), (H, 3 * H), H)
    p["gru_w_hh"] = u(next(ks), (H, 3 * H), H)
    p["gru_b_ih"] = u(next(ks), (3 * H,), H)
    p["gru_b_hh"] = u(next(ks), (3 * H,), H)
    # Set2Set LSTM, torch gate order i, f, g, o; layer 0 input dim is 2H.
    p["lstm"] = []
    for layer in range(n_lstm_layers):
        in_dim = 2 * H if layer == 0 else H
        p["lstm"].append(dict(
            w_ih=u(next(ks), (in_dim, 4 * H), H),
            w_hh=u(next(ks), (H, 4 * H), H),
            b_ih=u(next(ks), (4 * H,), H),
            b_hh=u(next(ks), (4 * H,), H)))
    # lin3, predict  (lin2 exists in __init__ but is unused in forward)
    p["lin3_w"] = u(next(ks), (2 * H, 2 * H), 2 * H)
    p["lin3_b"] = u(next(ks), (2 * H,), 2 * H)
    p["pred_w"] = u(next(ks), (2 * H, n_classes), 2 * H)
    p["pred_b"] = u(next(ks), (n_classes,), 2 * H)
    return p


def prepare_kernel_params(p):
    """One-time restructuring: (1,X) bias rows, NNConv edge-weight
    factorization, lane-dense fused gate layouts, lane-padded predict head."""
    H, EH, n_classes = p["H"], p["EH"], p["n_classes"]
    kp = {"H": H, "EH": EH, "n_classes": n_classes}

    kp["lin0_w"] = p["lin0_w"]
    kp["lin0_b"] = p["lin0_b"].reshape(1, H)
    kp["ew1"] = p["edge_w1"]
    kp["eb1"] = p["edge_b1"].reshape(1, EH)
    # NNConv factorization matrices:
    #   W2r[i, k*H+j] = edge_w2[k, i*H+j] ; B2[i, j] = edge_b2[i*H+j]
    kp["w2r"] = jnp.transpose(p["edge_w2"].reshape(EH, H, H),
                              (1, 0, 2)).reshape(H, EH * H)
    kp["b2m"] = p["edge_b2"].reshape(H, H)
    kp["expand"] = jnp.kron(jnp.eye(EH, dtype=F32), jnp.ones((1, H), F32))    # (EH, EH*H)
    kp["collapse"] = jnp.kron(jnp.ones((EH, 1), F32), jnp.eye(H, dtype=F32))  # (EH*H, H)
    kp["conv_b"] = p["conv_bias"].reshape(1, H)

    # GRU gate layout [r | z | n_x | n_h] (4H = 128 lanes, single gate tensor).
    zeros_hh = jnp.zeros((H, H), F32)
    wih, whh = p["gru_w_ih"], p["gru_w_hh"]
    kp["gru_wx"] = jnp.concatenate([wih[:, :2 * H], wih[:, 2 * H:], zeros_hh], axis=1)
    kp["gru_wh"] = jnp.concatenate([whh[:, :2 * H], zeros_hh, whh[:, 2 * H:]], axis=1)
    bih, bhh = p["gru_b_ih"], p["gru_b_hh"]
    kp["gru_b"] = jnp.concatenate(
        [bih[:2 * H] + bhh[:2 * H], bih[2 * H:], bhh[2 * H:]]).reshape(1, 4 * H)

    # LSTM per layer: stack [w_ih ; w_hh] rows, combine the two biases.
    kp["lstm_w"], kp["lstm_b"] = [], []
    for lp in p["lstm"]:
        kp["lstm_w"].append(jnp.concatenate([lp["w_ih"], lp["w_hh"]], axis=0))
        kp["lstm_b"].append((lp["b_ih"] + lp["b_hh"]).reshape(1, 4 * H))

    kp["lin3_w"] = p["lin3_w"]
    kp["lin3_b"] = p["lin3_b"].reshape(1, 2 * H)
    # Lane-pad the prediction head to 128 output lanes (sliced in wrapper).
    pad = max(128, 128 * ((n_classes + 127) // 128))
    kp["pred_pad"] = pad
    kp["pred_w_pad"] = jnp.zeros((2 * H, pad), F32).at[:, :n_classes].set(p["pred_w"])
    kp["pred_b_pad"] = jnp.zeros((1, pad), F32).at[0, :n_classes].set(p["pred_b"])
    return kp


# ----------------------------------------------------------------------------
# Forward pass: exactly two pallas_call launches
# ----------------------------------------------------------------------------
def mol2num_forward(kp, n_feat, e_feat, src, dst, graph_ids, batch_size,
                    num_step_message_passing=6, num_step_set2set=6,
                    num_layer_set2set=3):
    H, EH = kp["H"], kp["EH"]
    N, node_in = n_feat.shape
    E, edge_in = e_feat.shape
    B = batch_size
    PAD = kp["pred_pad"]

    src_col = src.astype(jnp.int32).reshape(E, 1)
    dst_row = dst.astype(jnp.int32).reshape(1, E)
    gid_row = graph_ids.astype(jnp.int32).reshape(1, N)

    # ---- kernel 1: fused message passing ----------------------------------
    args_a = (n_feat.astype(F32), e_feat.astype(F32), src_col, dst_row,
              kp["lin0_w"], kp["lin0_b"], kp["ew1"], kp["eb1"],
              kp["w2r"], kp["b2m"], kp["expand"], kp["collapse"],
              kp["conv_b"], kp["gru_wx"], kp["gru_wh"], kp["gru_b"])
    S = num_step_message_passing
    flops_a = int(2 * N * node_in * H + 2 * E * edge_in * EH + 2 * E * EH * EH * H
                  + S * (2 * E * N * H + 2 * E * H * EH * H + E * EH * H
                         + 2 * E * EH * H * H + 2 * E * H * H + 2 * N * E * H
                         + 4 * N * H * 4 * H + 12 * N * H))
    bytes_a = int(4 * (sum(int(a.size) for a in args_a) + N * H))
    cost_a = pl.CostEstimate(flops=flops_a, transcendentals=int(S * 3 * N * H),
                             bytes_accessed=bytes_a)

    out = pl.pallas_call(
        functools.partial(_mp_fused_kernel, H=H, n_steps=S),
        out_shape=jax.ShapeDtypeStruct((N, H), F32),
        in_specs=[_vmem()] * len(args_a),
        out_specs=_vmem(),
        compiler_params=pltpu.CompilerParams(vmem_limit_bytes=64 * 1024 * 1024),
        cost_estimate=cost_a,
    )(*args_a)
    # TODO(synk): for large graphs (N, E >> 1k) tile NNConv over an E grid axis
    # ("arbitrary") with a resident (N, H) accumulator and shard the parallel
    # axis across TensorCores to fit v7x's 64 MiB VMEM; whole-array blocks are
    # used here because the example shapes are tiny.

    # ---- kernel 2: fused Set2Set + lin3 + predict --------------------------
    args_b = [out, gid_row]
    for l in range(num_layer_set2set):
        args_b += [kp["lstm_w"][l], kp["lstm_b"][l]]
    args_b += [kp["lin3_w"], kp["lin3_b"], kp["pred_w_pad"], kp["pred_b_pad"]]

    T, L = num_step_set2set, num_layer_set2set
    flops_b = int(T * (2 * B * 3 * H * 4 * H + (L - 1) * 2 * B * 2 * H * 4 * H
                       + 4 * B * N * H + 8 * B * N + 30 * B * H)
                  + 2 * B * 2 * H * 2 * H + 2 * B * 2 * H * PAD)
    bytes_b = int(4 * (sum(int(a.size) for a in args_b) + B * PAD))
    cost_b = pl.CostEstimate(flops=flops_b,
                             transcendentals=int(T * (5 * L * B * H + B * N)),
                             bytes_accessed=bytes_b)

    pred_padded = pl.pallas_call(
        functools.partial(_set2set_head_kernel, H=H, B=B,
                          n_iters=T, n_layers=L),
        out_shape=jax.ShapeDtypeStruct((B, PAD), F32),
        in_specs=[_vmem()] * len(args_b),
        out_specs=_vmem(),
        compiler_params=pltpu.CompilerParams(vmem_limit_bytes=64 * 1024 * 1024),
        cost_estimate=cost_b,
    )(*args_b)

    predict = pred_padded[:, :kp["n_classes"]]
    h_final = out[None, :, :]   # torch returns the final GRU hidden (1, N, H)
    return h_final, predict


# ----------------------------------------------------------------------------
# Example run
# ----------------------------------------------------------------------------
if __name__ == "__main__":
    H = 32            # node_hidden_dim
    EH = 16           # edge_hidden_dim
    NCLS = 3          # n_classes
    NODE_IN = 23
    EDGE_IN = 19
    B = 2             # batch of graphs
    NODES_PER_GRAPH = 4
    N = B * NODES_PER_GRAPH

    # batched graph: each graph is a bidirectional 4-node ring
    src_list, dst_list, gid_list = [], [], []
    for b in range(B):
        base = b * NODES_PER_GRAPH
        for i in range(NODES_PER_GRAPH):
            j = (i + 1) % NODES_PER_GRAPH
            src_list += [base + i, base + j]
            dst_list += [base + j, base + i]
        gid_list += [b] * NODES_PER_GRAPH
    src = jnp.array(src_list, dtype=jnp.int32)
    dst = jnp.array(dst_list, dtype=jnp.int32)
    graph_ids = jnp.array(gid_list, dtype=jnp.int32)
    E = int(src.shape[0])

    key = jax.random.PRNGKey(0)
    k_nf, k_ef = jax.random.split(key)
    n_feat = jax.random.normal(k_nf, (N, NODE_IN), dtype=F32)
    e_feat = jax.random.normal(k_ef, (E, EDGE_IN), dtype=F32)

    raw_params = init_params(jax.random.PRNGKey(42), H=H, EH=EH, n_classes=NCLS,
                             node_in=NODE_IN, edge_in=EDGE_IN)
    kparams = prepare_kernel_params(raw_params)

    h_out, predict = mol2num_forward(kparams, n_feat, e_feat, src, dst,
                                     graph_ids, batch_size=B)
    jax.block_until_ready((h_out, predict))
    assert h_out.shape == (1, N, H)
    assert predict.shape == (B, NCLS)
    assert bool(jnp.all(jnp.isfinite(h_out))) and bool(jnp.all(jnp.isfinite(predict)))
    print("KERNEL_OK")
</pallas_src>

<mosaic_0001>
module attributes {stable_mosaic.version = 11 : i64} {
  func.func @_mp_fused_kernel(%arg0: memref<8x23xf32, #tpu.memory_space<vmem>>, %arg1: memref<16x19xf32, #tpu.memory_space<vmem>>, %arg2: memref<16x1xi32, #tpu.memory_space<vmem>>, %arg3: memref<1x16xi32, #tpu.memory_space<vmem>>, %arg4: memref<23x32xf32, #tpu.memory_space<vmem>>, %arg5: memref<1x32xf32, #tpu.memory_space<vmem>>, %arg6: memref<19x16xf32, #tpu.memory_space<vmem>>, %arg7: memref<1x16xf32, #tpu.memory_space<vmem>>, %arg8: memref<32x512xf32, #tpu.memory_space<vmem>>, %arg9: memref<32x32xf32, #tpu.memory_space<vmem>>, %arg10: memref<16x512xf32, #tpu.memory_space<vmem>>, %arg11: memref<512x32xf32, #tpu.memory_space<vmem>>, %arg12: memref<1x32xf32, #tpu.memory_space<vmem>>, %arg13: memref<32x128xf32, #tpu.memory_space<vmem>>, %arg14: memref<32x128xf32, #tpu.memory_space<vmem>>, %arg15: memref<1x128xf32, #tpu.memory_space<vmem>>, %arg16: memref<8x32xf32, #tpu.memory_space<vmem>>) attributes {dimension_semantics = [], scalar_prefetch = 0 : i64, scratch_operands = 0 : i64, tpu.core_type = #tpu.core_type<tc>} {
    %c0 = arith.constant 0 : index
    %c0_0 = arith.constant 0 : index
    %0 = vector.load %arg0[%c0, %c0_0] : memref<8x23xf32, #tpu.memory_space<vmem>>, vector<8x23xf32>
    %c0_1 = arith.constant 0 : index
    %c0_2 = arith.constant 0 : index
    %1 = vector.load %arg4[%c0_1, %c0_2] : memref<23x32xf32, #tpu.memory_space<vmem>>, vector<23x32xf32>
    %cst = arith.constant dense<0.000000e+00> : vector<8x32xf32>
    %2 = tpu.matmul %0, %1, %cst {dimension_numbers = #tpu.dot_dimension_numbers<[1], [0], [0], [1], [0, 0, 1, 1], [], []>} : vector<8x23xf32>, vector<23x32xf32>, vector<8x32xf32> -> vector<8x32xf32>
    %c0_3 = arith.constant 0 : index
    %c0_4 = arith.constant 0 : index
    %3 = vector.load %arg5[%c0_3, %c0_4] : memref<1x32xf32, #tpu.memory_space<vmem>>, vector<1x32xf32>
    %4 = vector.broadcast %3 : vector<1x32xf32> to vector<8x32xf32>
    %5 = arith.addf %2, %4 : vector<8x32xf32>
    %c0_5 = arith.constant 0 : index
    %c0_6 = arith.constant 0 : index
    %6 = vector.load %arg1[%c0_5, %c0_6] : memref<16x19xf32, #tpu.memory_space<vmem>>, vector<16x19xf32>
    %c0_7 = arith.constant 0 : index
    %c0_8 = arith.constant 0 : index
    %7 = vector.load %arg6[%c0_7, %c0_8] : memref<19x16xf32, #tpu.memory_space<vmem>>, vector<19x16xf32>
    %cst_9 = arith.constant dense<0.000000e+00> : vector<16x16xf32>
    %8 = tpu.matmul %6, %7, %cst_9 {dimension_numbers = #tpu.dot_dimension_numbers<[1], [0], [0], [1], [0, 0, 1, 1], [], []>} : vector<16x19xf32>, vector<19x16xf32>, vector<16x16xf32> -> vector<16x16xf32>
    %c0_10 = arith.constant 0 : index
    %c0_11 = arith.constant 0 : index
    %9 = vector.load %arg7[%c0_10, %c0_11] : memref<1x16xf32, #tpu.memory_space<vmem>>, vector<1x16xf32>
    %10 = vector.broadcast %9 : vector<1x16xf32> to vector<16x16xf32>
    %11 = arith.addf %8, %10 : vector<16x16xf32>
    %cst_12 = arith.constant 0.000000e+00 : f32
    %12 = vector.broadcast %cst_12 : f32 to vector<16x16xf32>
    %13 = arith.maximumf %11, %12 : vector<16x16xf32>
    %c0_13 = arith.constant 0 : index
    %c0_14 = arith.constant 0 : index
    %14 = vector.load %arg10[%c0_13, %c0_14] : memref<16x512xf32, #tpu.memory_space<vmem>>, vector<16x512xf32>
    %cst_15 = arith.constant dense<0.000000e+00> : vector<16x512xf32>
    %15 = tpu.matmul %13, %14, %cst_15 {dimension_numbers = #tpu.dot_dimension_numbers<[1], [0], [0], [1], [0, 0, 1, 1], [], []>} : vector<16x16xf32>, vector<16x512xf32>, vector<16x512xf32> -> vector<16x512xf32>
    %16 = tpu.iota {dimensions = array<i32: 1>} : vector<16x8xi32>
    %c0_16 = arith.constant 0 : index
    %c0_17 = arith.constant 0 : index
    %17 = vector.load %arg2[%c0_16, %c0_17] : memref<16x1xi32, #tpu.memory_space<vmem>>, vector<16x1xi32>
    %18 = vector.broadcast %17 : vector<16x1xi32> to vector<16x8xi32>
    %19 = arith.cmpi eq, %16, %18 : vector<16x8xi32>
    %20 = arith.extui %19 : vector<16x8xi1> to vector<16x8xi32>
    %21 = arith.sitofp %20 : vector<16x8xi32> to vector<16x8xf32>
    %22 = tpu.iota {dimensions = array<i32: 0>} : vector<8x16xi32>
    %c0_18 = arith.constant 0 : index
    %c0_19 = arith.constant 0 : index
    %23 = vector.load %arg3[%c0_18, %c0_19] : memref<1x16xi32, #tpu.memory_space<vmem>>, vector<1x16xi32>
    %24 = vector.broadcast %23 : vector<1x16xi32> to vector<8x16xi32>
    %25 = arith.cmpi eq, %22, %24 : vector<8x16xi32>
    %26 = arith.extui %25 : vector<8x16xi1> to vector<8x16xi32>
    %27 = arith.sitofp %26 : vector<8x16xi32> to vector<8x16xf32>
    %c0_20 = arith.constant 0 : index
    %c0_21 = arith.constant 0 : index
    %28 = vector.load %arg8[%c0_20, %c0_21] : memref<32x512xf32, #tpu.memory_space<vmem>>, vector<32x512xf32>
    %c0_22 = arith.constant 0 : index
    %c0_23 = arith.constant 0 : index
    %29 = vector.load %arg9[%c0_22, %c0_23] : memref<32x32xf32, #tpu.memory_space<vmem>>, vector<32x32xf32>
    %c0_24 = arith.constant 0 : index
    %c0_25 = arith.constant 0 : index
    %30 = vector.load %arg11[%c0_24, %c0_25] : memref<512x32xf32, #tpu.memory_space<vmem>>, vector<512x32xf32>
    %c0_26 = arith.constant 0 : index
    %c0_27 = arith.constant 0 : index
    %31 = vector.load %arg12[%c0_26, %c0_27] : memref<1x32xf32, #tpu.memory_space<vmem>>, vector<1x32xf32>
    %c0_28 = arith.constant 0 : index
    %c0_29 = arith.constant 0 : index
    %32 = vector.load %arg13[%c0_28, %c0_29] : memref<32x128xf32, #tpu.memory_space<vmem>>, vector<32x128xf32>
    %c0_30 = arith.constant 0 : index
    %c0_31 = arith.constant 0 : index
    %33 = vector.load %arg14[%c0_30, %c0_31] : memref<32x128xf32, #tpu.memory_space<vmem>>, vector<32x128xf32>
    %c0_32 = arith.constant 0 : index
    %c0_33 = arith.constant 0 : index
    %34 = vector.load %arg15[%c0_32, %c0_33] : memref<1x128xf32, #tpu.memory_space<vmem>>, vector<1x128xf32>
    %cst_34 = arith.constant dense<0.000000e+00> : vector<16x32xf32>
    %35 = tpu.matmul %21, %5, %cst_34 {dimension_numbers = #tpu.dot_dimension_numbers<[1], [0], [0], [1], [0, 0, 1, 1], [], []>} : vector<16x8xf32>, vector<8x32xf32>, vector<16x32xf32> -> vector<16x32xf32>
    %cst_35 = arith.constant dense<0.000000e+00> : vector<16x512xf32>
    %36 = tpu.matmul %35, %28, %cst_35 {dimension_numbers = #tpu.dot_dimension_numbers<[1], [0], [0], [1], [0, 0, 1, 1], [], []>} : vector<16x32xf32>, vector<32x512xf32>, vector<16x512xf32> -> vector<16x512xf32>
    %37 = arith.mulf %15, %36 : vector<16x512xf32>
    %cst_36 = arith.constant dense<0.000000e+00> : vector<16x32xf32>
    %38 = tpu.matmul %37, %30, %cst_36 {dimension_numbers = #tpu.dot_dimension_numbers<[1], [0], [0], [1], [0, 0, 1, 1], [], []>} : vector<16x512xf32>, vector<512x32xf32>, vector<16x32xf32> -> vector<16x32xf32>
    %cst_37 = arith.constant dense<0.000000e+00> : vector<16x32xf32>
    %39 = tpu.matmul %35, %29, %cst_37 {dimension_numbers = #tpu.dot_dimension_numbers<[1], [0], [0], [1], [0, 0, 1, 1], [], []>} : vector<16x32xf32>, vector<32x32xf32>, vector<16x32xf32> -> vector<16x32xf32>
    %40 = arith.addf %38, %39 : vector<16x32xf32>
    %cst_38 = arith.constant dense<0.000000e+00> : vector<8x32xf32>
    %41 = tpu.matmul %27, %40, %cst_38 {dimension_numbers = #tpu.dot_dimension_numbers<[1], [0], [0], [1], [0, 0, 1, 1], [], []>} : vector<8x16xf32>, vector<16x32xf32>, vector<8x32xf32> -> vector<8x32xf32>
    %42 = vector.broadcast %31 : vector<1x32xf32> to vector<8x32xf32>
    %43 = arith.addf %41, %42 : vector<8x32xf32>
    %cst_39 = arith.constant dense<0.000000e+00> : vector<8x128xf32>
    %44 = tpu.matmul %43, %32, %cst_39 {dimension_numbers = #tpu.dot_dimension_numbers<[1], [0], [0], [1], [0, 0, 1, 1], [], []>} : vector<8x32xf32>, vector<32x128xf32>, vector<8x128xf32> -> vector<8x128xf32>
    %cst_40 = arith.constant dense<0.000000e+00> : vector<8x128xf32>
    %45 = tpu.matmul %5, %33, %cst_40 {dimension_numbers = #tpu.dot_dimension_numbers<[1], [0], [0], [1], [0, 0, 1, 1], [], []>} : vector<8x32xf32>, vector<32x128xf32>, vector<8x128xf32> -> vector<8x128xf32>
    %46 = arith.addf %44, %45 : vector<8x128xf32>
    %47 = vector.broadcast %34 : vector<1x128xf32> to vector<8x128xf32>
    %48 = arith.addf %46, %47 : vector<8x128xf32>
    %49 = vector.extract_strided_slice %48 {offsets = [0, 0], sizes = [8, 32], strides = [1, 1]} : vector<8x128xf32> to vector<8x32xf32>
    %50 = arith.negf %49 : vector<8x32xf32>
    %51 = math.exp %50 : vector<8x32xf32>
    %cst_41 = arith.constant 1.000000e+00 : f32
    %52 = vector.broadcast %cst_41 : f32 to vector<8x32xf32>
    %53 = arith.addf %52, %51 : vector<8x32xf32>
    %54 = arith.divf %52, %53 : vector<8x32xf32>
    %55 = vector.extract_strided_slice %48 {offsets = [0, 32], sizes = [8, 32], strides = [1, 1]} : vector<8x128xf32> to vector<8x32xf32>
    %56 = arith.negf %55 : vector<8x32xf32>
    %57 = math.exp %56 : vector<8x32xf32>
    %cst_42 = arith.constant 1.000000e+00 : f32
    %58 = vector.broadcast %cst_42 : f32 to vector<8x32xf32>
    %59 = arith.addf %58, %57 : vector<8x32xf32>
    %60 = arith.divf %58, %59 : vector<8x32xf32>
    %61 = vector.extract_strided_slice %48 {offsets = [0, 64], sizes = [8, 32], strides = [1, 1]} : vector<8x128xf32> to vector<8x32xf32>
    %62 = vector.extract_strided_slice %48 {offsets = [0, 96], sizes = [8, 32], strides = [1, 1]} : vector<8x128xf32> to vector<8x32xf32>
    %63 = arith.mulf %54, %62 : vector<8x32xf32>
    %64 = arith.addf %61, %63 : vector<8x32xf32>
    %65 = math.tanh %64 : vector<8x32xf32>
    %cst_43 = arith.constant 1.000000e+00 : f32
    %66 = vector.broadcast %cst_43 : f32 to vector<8x32xf32>
    %67 = arith.subf %66, %60 : vector<8x32xf32>
    %68 = arith.mulf %67, %65 : vector<8x32xf32>
    %69 = arith.mulf %60, %5 : vector<8x32xf32>
    %70 = arith.addf %68, %69 : vector<8x32xf32>
    %cst_44 = arith.constant dense<0.000000e+00> : vector<16x32xf32>
    %71 = tpu.matmul %21, %70, %cst_44 {dimension_numbers = #tpu.dot_dimension_numbers<[1], [0], [0], [1], [0, 0, 1, 1], [], []>} : vector<16x8xf32>, vector<8x32xf32>, vector<16x32xf32> -> vector<16x32xf32>
    %cst_45 = arith.constant dense<0.000000e+00> : vector<16x512xf32>
    %72 = tpu.matmul %71, %28, %cst_45 {dimension_numbers = #tpu.dot_dimension_numbers<[1], [0], [0], [1], [0, 0, 1, 1], [], []>} : vector<16x32xf32>, vector<32x512xf32>, vector<16x512xf32> -> vector<16x512xf32>
    %73 = arith.mulf %15, %72 : vector<16x512xf32>
    %cst_46 = arith.constant dense<0.000000e+00> : vector<16x32xf32>
    %74 = tpu.matmul %73, %30, %cst_46 {dimension_numbers = #tpu.dot_dimension_numbers<[1], [0], [0], [1], [0, 0, 1, 1], [], []>} : vector<16x512xf32>, vector<512x32xf32>, vector<16x32xf32> -> vector<16x32xf32>
    %cst_47 = arith.constant dense<0.000000e+00> : vector<16x32xf32>
    %75 = tpu.matmul %71, %29, %cst_47 {dimension_numbers = #tpu.dot_dimension_numbers<[1], [0], [0], [1], [0, 0, 1, 1], [], []>} : vector<16x32xf32>, vector<32x32xf32>, vector<16x32xf32> -> vector<16x32xf32>
    %76 = arith.addf %74, %75 : vector<16x32xf32>
    %cst_48 = arith.constant dense<0.000000e+00> : vector<8x32xf32>
    %77 = tpu.matmul %27, %76, %cst_48 {dimension_numbers = #tpu.dot_dimension_numbers<[1], [0], [0], [1], [0, 0, 1, 1], [], []>} : vector<8x16xf32>, vector<16x32xf32>, vector<8x32xf32> -> vector<8x32xf32>
    %78 = vector.broadcast %31 : vector<1x32xf32> to vector<8x32xf32>
    %79 = arith.addf %77, %78 : vector<8x32xf32>
    %cst_49 = arith.constant dense<0.000000e+00> : vector<8x128xf32>
    %80 = tpu.matmul %79, %32, %cst_49 {dimension_numbers = #tpu.dot_dimension_numbers<[1], [0], [0], [1], [0, 0, 1, 1], [], []>} : vector<8x32xf32>, vector<32x128xf32>, vector<8x128xf32> -> vector<8x128xf32>
    %cst_50 = arith.constant dense<0.000000e+00> : vector<8x128xf32>
    %81 = tpu.matmul %70, %33, %cst_50 {dimension_numbers = #tpu.dot_dimension_numbers<[1], [0], [0], [1], [0, 0, 1, 1], [], []>} : vector<8x32xf32>, vector<32x128xf32>, vector<8x128xf32> -> vector<8x128xf32>
    %82 = arith.addf %80, %81 : vector<8x128xf32>
    %83 = vector.broadcast %34 : vector<1x128xf32> to vector<8x128xf32>
    %84 = arith.addf %82, %83 : vector<8x128xf32>
    %85 = vector.extract_strided_slice %84 {offsets = [0, 0], sizes = [8, 32], strides = [1, 1]} : vector<8x128xf32> to vector<8x32xf32>
    %86 = arith.negf %85 : vector<8x32xf32>
    %87 = math.exp %86 : vector<8x32xf32>
    %cst_51 = arith.constant 1.000000e+00 : f32
    %88 = vector.broadcast %cst_51 : f32 to vector<8x32xf32>
    %89 = arith.addf %88, %87 : vector<8x32xf32>
    %90 = arith.divf %88, %89 : vector<8x32xf32>
    %91 = vector.extract_strided_slice %84 {offsets = [0, 32], sizes = [8, 32], strides = [1, 1]} : vector<8x128xf32> to vector<8x32xf32>
    %92 = arith.negf %91 : vector<8x32xf32>
    %93 = math.exp %92 : vector<8x32xf32>
    %cst_52 = arith.constant 1.000000e+00 : f32
    %94 = vector.broadcast %cst_52 : f32 to vector<8x32xf32>
    %95 = arith.addf %94, %93 : vector<8x32xf32>
    %96 = arith.divf %94, %95 : vector<8x32xf32>
    %97 = vector.extract_strided_slice %84 {offsets = [0, 64], sizes = [8, 32], strides = [1, 1]} : vector<8x128xf32> to vector<8x32xf32>
    %98 = vector.extract_strided_slice %84 {offsets = [0, 96], sizes = [8, 32], strides = [1, 1]} : vector<8x128xf32> to vector<8x32xf32>
    %99 = arith.mulf %90, %98 : vector<8x32xf32>
    %100 = arith.addf %97, %99 : vector<8x32xf32>
    %101 = math.tanh %100 : vector<8x32xf32>
    %cst_53 = arith.constant 1.000000e+00 : f32
    %102 = vector.broadcast %cst_53 : f32 to vector<8x32xf32>
    %103 = arith.subf %102, %96 : vector<8x32xf32>
    %104 = arith.mulf %103, %101 : vector<8x32xf32>
    %105 = arith.mulf %96, %70 : vector<8x32xf32>
    %106 = arith.addf %104, %105 : vector<8x32xf32>
    %cst_54 = arith.constant dense<0.000000e+00> : vector<16x32xf32>
    %107 = tpu.matmul %21, %106, %cst_54 {dimension_numbers = #tpu.dot_dimension_numbers<[1], [0], [0], [1], [0, 0, 1, 1], [], []>} : vector<16x8xf32>, vector<8x32xf32>, vector<16x32xf32> -> vector<16x32xf32>
    %cst_55 = arith.constant dense<0.000000e+00> : vector<16x512xf32>
    %108 = tpu.matmul %107, %28, %cst_55 {dimension_numbers = #tpu.dot_dimension_numbers<[1], [0], [0], [1], [0, 0, 1, 1], [], []>} : vector<16x32xf32>, vector<32x512xf32>, vector<16x512xf32> -> vector<16x512xf32>
    %109 = arith.mulf %15, %108 : vector<16x512xf32>
    %cst_56 = arith.constant dense<0.000000e+00> : vector<16x32xf32>
    %110 = tpu.matmul %109, %30, %cst_56 {dimension_numbers = #tpu.dot_dimension_numbers<[1], [0], [0], [1], [0, 0, 1, 1], [], []>} : vector<16x512xf32>, vector<512x32xf32>, vector<16x32xf32> -> vector<16x32xf32>
    %cst_57 = arith.constant dense<0.000000e+00> : vector<16x32xf32>
    %111 = tpu.matmul %107, %29, %cst_57 {dimension_numbers = #tpu.dot_dimension_numbers<[1], [0], [0], [1], [0, 0, 1, 1], [], []>} : vector<16x32xf32>, vector<32x32xf32>, vector<16x32xf32> -> vector<16x32xf32>
    %112 = arith.addf %110, %111 : vector<16x32xf32>
    %cst_58 = arith.constant dense<0.000000e+00> : vector<8x32xf32>
    %113 = tpu.matmul %27, %112, %cst_58 {dimension_numbers = #tpu.dot_dimension_numbers<[1], [0], [0], [1], [0, 0, 1, 1], [], []>} : vector<8x16xf32>, vector<16x32xf32>, vector<8x32xf32> -> vector<8x32xf32>
    %114 = vector.broadcast %31 : vector<1x32xf32> to vector<8x32xf32>
    %115 = arith.addf %113, %114 : vector<8x32xf32>
    %cst_59 = arith.constant dense<0.000000e+00> : vector<8x128xf32>
    %116 = tpu.matmul %115, %32, %cst_59 {dimension_numbers = #tpu.dot_dimension_numbers<[1], [0], [0], [1], [0, 0, 1, 1], [], []>} : vector<8x32xf32>, vector<32x128xf32>, vector<8x128xf32> -> vector<8x128xf32>
    %cst_60 = arith.constant dense<0.000000e+00> : vector<8x128xf32>
    %117 = tpu.matmul %106, %33, %cst_60 {dimension_numbers = #tpu.dot_dimension_numbers<[1], [0], [0], [1], [0, 0, 1, 1], [], []>} : vector<8x32xf32>, vector<32x128xf32>, vector<8x128xf32> -> vector<8x128xf32>
    %118 = arith.addf %116, %117 : vector<8x128xf32>
    %119 = vector.broadcast %34 : vector<1x128xf32> to vector<8x128xf32>
    %120 = arith.addf %118, %119 : vector<8x128xf32>
    %121 = vector.extract_strided_slice %120 {offsets = [0, 0], sizes = [8, 32], strides = [1, 1]} : vector<8x128xf32> to vector<8x32xf32>
    %122 = arith.negf %121 : vector<8x32xf32>
    %123 = math.exp %122 : vector<8x32xf32>
    %cst_61 = arith.constant 1.000000e+00 : f32
    %124 = vector.broadcast %cst_61 : f32 to vector<8x32xf32>
    %125 = arith.addf %124, %123 : vector<8x32xf32>
    %126 = arith.divf %124, %125 : vector<8x32xf32>
    %127 = vector.extract_strided_slice %120 {offsets = [0, 32], sizes = [8, 32], strides = [1, 1]} : vector<8x128xf32> to vector<8x32xf32>
    %128 = arith.negf %127 : vector<8x32xf32>
    %129 = math.exp %128 : vector<8x32xf32>
    %cst_62 = arith.constant 1.000000e+00 : f32
    %130 = vector.broadcast %cst_62 : f32 to vector<8x32xf32>
    %131 = arith.addf %130, %129 : vector<8x32xf32>
    %132 = arith.divf %130, %131 : vector<8x32xf32>
    %133 = vector.extract_strided_slice %120 {offsets = [0, 64], sizes = [8, 32], strides = [1, 1]} : vector<8x128xf32> to vector<8x32xf32>
    %134 = vector.extract_strided_slice %120 {offsets = [0, 96], sizes = [8, 32], strides = [1, 1]} : vector<8x128xf32> to vector<8x32xf32>
    %135 = arith.mulf %126, %134 : vector<8x32xf32>
    %136 = arith.addf %133, %135 : vector<8x32xf32>
    %137 = math.tanh %136 : vector<8x32xf32>
    %cst_63 = arith.constant 1.000000e+00 : f32
    %138 = vector.broadcast %cst_63 : f32 to vector<8x32xf32>
    %139 = arith.subf %138, %132 : vector<8x32xf32>
    %140 = arith.mulf %139, %137 : vector<8x32xf32>
    %141 = arith.mulf %132, %106 : vector<8x32xf32>
    %142 = arith.addf %140, %141 : vector<8x32xf32>
    %cst_64 = arith.constant dense<0.000000e+00> : vector<16x32xf32>
    %143 = tpu.matmul %21, %142, %cst_64 {dimension_numbers = #tpu.dot_dimension_numbers<[1], [0], [0], [1], [0, 0, 1, 1], [], []>} : vector<16x8xf32>, vector<8x32xf32>, vector<16x32xf32> -> vector<16x32xf32>
    %cst_65 = arith.constant dense<0.000000e+00> : vector<16x512xf32>
    %144 = tpu.matmul %143, %28, %cst_65 {dimension_numbers = #tpu.dot_dimension_numbers<[1], [0], [0], [1], [0, 0, 1, 1], [], []>} : vector<16x32xf32>, vector<32x512xf32>, vector<16x512xf32> -> vector<16x512xf32>
    %145 = arith.mulf %15, %144 : vector<16x512xf32>
    %cst_66 = arith.constant dense<0.000000e+00> : vector<16x32xf32>
    %146 = tpu.matmul %145, %30, %cst_66 {dimension_numbers = #tpu.dot_dimension_numbers<[1], [0], [0], [1], [0, 0, 1, 1], [], []>} : vector<16x512xf32>, vector<512x32xf32>, vector<16x32xf32> -> vector<16x32xf32>
    %cst_67 = arith.constant dense<0.000000e+00> : vector<16x32xf32>
    %147 = tpu.matmul %143, %29, %cst_67 {dimension_numbers = #tpu.dot_dimension_numbers<[1], [0], [0], [1], [0, 0, 1, 1], [], []>} : vector<16x32xf32>, vector<32x32xf32>, vector<16x32xf32> -> vector<16x32xf32>
    %148 = arith.addf %146, %147 : vector<16x32xf32>
    %cst_68 = arith.constant dense<0.000000e+00> : vector<8x32xf32>
    %149 = tpu.matmul %27, %148, %cst_68 {dimension_numbers = #tpu.dot_dimension_numbers<[1], [0], [0], [1], [0, 0, 1, 1], [], []>} : vector<8x16xf32>, vector<16x32xf32>, vector<8x32xf32> -> vector<8x32xf32>
    %150 = vector.broadcast %31 : vector<1x32xf32> to vector<8x32xf32>
    %151 = arith.addf %149, %150 : vector<8x32xf32>
    %cst_69 = arith.constant dense<0.000000e+00> : vector<8x128xf32>
    %152 = tpu.matmul %151, %32, %cst_69 {dimension_numbers = #tpu.dot_dimension_numbers<[1], [0], [0], [1], [0, 0, 1, 1], [], []>} : vector<8x32xf32>, vector<32x128xf32>, vector<8x128xf32> -> vector<8x128xf32>
    %cst_70 = arith.constant dense<0.000000e+00> : vector<8x128xf32>
    %153 = tpu.matmul %142, %33, %cst_70 {dimension_numbers = #tpu.dot_dimension_numbers<[1], [0], [0], [1], [0, 0, 1, 1], [], []>} : vector<8x32xf32>, vector<32x128xf32>, vector<8x128xf32> -> vector<8x128xf32>
    %154 = arith.addf %152, %153 : vector<8x128xf32>
    %155 = vector.broadcast %34 : vector<1x128xf32> to vector<8x128xf32>
    %156 = arith.addf %154, %155 : vector<8x128xf32>
    %157 = vector.extract_strided_slice %156 {offsets = [0, 0], sizes = [8, 32], strides = [1, 1]} : vector<8x128xf32> to vector<8x32xf32>
    %158 = arith.negf %157 : vector<8x32xf32>
    %159 = math.exp %158 : vector<8x32xf32>
    %cst_71 = arith.constant 1.000000e+00 : f32
    %160 = vector.broadcast %cst_71 : f32 to vector<8x32xf32>
    %161 = arith.addf %160, %159 : vector<8x32xf32>
    %162 = arith.divf %160, %161 : vector<8x32xf32>
    %163 = vector.extract_strided_slice %156 {offsets = [0, 32], sizes = [8, 32], strides = [1, 1]} : vector<8x128xf32> to vector<8x32xf32>
    %164 = arith.negf %163 : vector<8x32xf32>
    %165 = math.exp %164 : vector<8x32xf32>
    %cst_72 = arith.constant 1.000000e+00 : f32
    %166 = vector.broadcast %cst_72 : f32 to vector<8x32xf32>
    %167 = arith.addf %166, %165 : vector<8x32xf32>
    %168 = arith.divf %166, %167 : vector<8x32xf32>
    %169 = vector.extract_strided_slice %156 {offsets = [0, 64], sizes = [8, 32], strides = [1, 1]} : vector<8x128xf32> to vector<8x32xf32>
    %170 = vector.extract_strided_slice %156 {offsets = [0, 96], sizes = [8, 32], strides = [1, 1]} : vector<8x128xf32> to vector<8x32xf32>
    %171 = arith.mulf %162, %170 : vector<8x32xf32>
    %172 = arith.addf %169, %171 : vector<8x32xf32>
    %173 = math.tanh %172 : vector<8x32xf32>
    %cst_73 = arith.constant 1.000000e+00 : f32
    %174 = vector.broadcast %cst_73 : f32 to vector<8x32xf32>
    %175 = arith.subf %174, %168 : vector<8x32xf32>
    %176 = arith.mulf %175, %173 : vector<8x32xf32>
    %177 = arith.mulf %168, %142 : vector<8x32xf32>
    %178 = arith.addf %176, %177 : vector<8x32xf32>
    %cst_74 = arith.constant dense<0.000000e+00> : vector<16x32xf32>
    %179 = tpu.matmul %21, %178, %cst_74 {dimension_numbers = #tpu.dot_dimension_numbers<[1], [0], [0], [1], [0, 0, 1, 1], [], []>} : vector<16x8xf32>, vector<8x32xf32>, vector<16x32xf32> -> vector<16x32xf32>
    %cst_75 = arith.constant dense<0.000000e+00> : vector<16x512xf32>
    %180 = tpu.matmul %179, %28, %cst_75 {dimension_numbers = #tpu.dot_dimension_numbers<[1], [0], [0], [1], [0, 0, 1, 1], [], []>} : vector<16x32xf32>, vector<32x512xf32>, vector<16x512xf32> -> vector<16x512xf32>
    %181 = arith.mulf %15, %180 : vector<16x512xf32>
    %cst_76 = arith.constant dense<0.000000e+00> : vector<16x32xf32>
    %182 = tpu.matmul %181, %30, %cst_76 {dimension_numbers = #tpu.dot_dimension_numbers<[1], [0], [0], [1], [0, 0, 1, 1], [], []>} : vector<16x512xf32>, vector<512x32xf32>, vector<16x32xf32> -> vector<16x32xf32>
    %cst_77 = arith.constant dense<0.000000e+00> : vector<16x32xf32>
    %183 = tpu.matmul %179, %29, %cst_77 {dimension_numbers = #tpu.dot_dimension_numbers<[1], [0], [0], [1], [0, 0, 1, 1], [], []>} : vector<16x32xf32>, vector<32x32xf32>, vector<16x32xf32> -> vector<16x32xf32>
    %184 = arith.addf %182, %183 : vector<16x32xf32>
    %cst_78 = arith.constant dense<0.000000e+00> : vector<8x32xf32>
    %185 = tpu.matmul %27, %184, %cst_78 {dimension_numbers = #tpu.dot_dimension_numbers<[1], [0], [0], [1], [0, 0, 1, 1], [], []>} : vector<8x16xf32>, vector<16x32xf32>, vector<8x32xf32> -> vector<8x32xf32>
    %186 = vector.broadcast %31 : vector<1x32xf32> to vector<8x32xf32>
    %187 = arith.addf %185, %186 : vector<8x32xf32>
    %cst_79 = arith.constant dense<0.000000e+00> : vector<8x128xf32>
    %188 = tpu.matmul %187, %32, %cst_79 {dimension_numbers = #tpu.dot_dimension_numbers<[1], [0], [0], [1], [0, 0, 1, 1], [], []>} : vector<8x32xf32>, vector<32x128xf32>, vector<8x128xf32> -> vector<8x128xf32>
    %cst_80 = arith.constant dense<0.000000e+00> : vector<8x128xf32>
    %189 = tpu.matmul %178, %33, %cst_80 {dimension_numbers = #tpu.dot_dimension_numbers<[1], [0], [0], [1], [0, 0, 1, 1], [], []>} : vector<8x32xf32>, vector<32x128xf32>, vector<8x128xf32> -> vector<8x128xf32>
    %190 = arith.addf %188, %189 : vector<8x128xf32>
    %191 = vector.broadcast %34 : vector<1x128xf32> to vector<8x128xf32>
    %192 = arith.addf %190, %191 : vector<8x128xf32>
    %193 = vector.extract_strided_slice %192 {offsets = [0, 0], sizes = [8, 32], strides = [1, 1]} : vector<8x128xf32> to vector<8x32xf32>
    %194 = arith.negf %193 : vector<8x32xf32>
    %195 = math.exp %194 : vector<8x32xf32>
    %cst_81 = arith.constant 1.000000e+00 : f32
    %196 = vector.broadcast %cst_81 : f32 to vector<8x32xf32>
    %197 = arith.addf %196, %195 : vector<8x32xf32>
    %198 = arith.divf %196, %197 : vector<8x32xf32>
    %199 = vector.extract_strided_slice %192 {offsets = [0, 32], sizes = [8, 32], strides = [1, 1]} : vector<8x128xf32> to vector<8x32xf32>
    %200 = arith.negf %199 : vector<8x32xf32>
    %201 = math.exp %200 : vector<8x32xf32>
    %cst_82 = arith.constant 1.000000e+00 : f32
    %202 = vector.broadcast %cst_82 : f32 to vector<8x32xf32>
    %203 = arith.addf %202, %201 : vector<8x32xf32>
    %204 = arith.divf %202, %203 : vector<8x32xf32>
    %205 = vector.extract_strided_slice %192 {offsets = [0, 64], sizes = [8, 32], strides = [1, 1]} : vector<8x128xf32> to vector<8x32xf32>
    %206 = vector.extract_strided_slice %192 {offsets = [0, 96], sizes = [8, 32], strides = [1, 1]} : vector<8x128xf32> to vector<8x32xf32>
    %207 = arith.mulf %198, %206 : vector<8x32xf32>
    %208 = arith.addf %205, %207 : vector<8x32xf32>
    %209 = math.tanh %208 : vector<8x32xf32>
    %cst_83 = arith.constant 1.000000e+00 : f32
    %210 = vector.broadcast %cst_83 : f32 to vector<8x32xf32>
    %211 = arith.subf %210, %204 : vector<8x32xf32>
    %212 = arith.mulf %211, %209 : vector<8x32xf32>
    %213 = arith.mulf %204, %178 : vector<8x32xf32>
    %214 = arith.addf %212, %213 : vector<8x32xf32>
    %cst_84 = arith.constant dense<0.000000e+00> : vector<16x32xf32>
    %215 = tpu.matmul %21, %214, %cst_84 {dimension_numbers = #tpu.dot_dimension_numbers<[1], [0], [0], [1], [0, 0, 1, 1], [], []>} : vector<16x8xf32>, vector<8x32xf32>, vector<16x32xf32> -> vector<16x32xf32>
    %cst_85 = arith.constant dense<0.000000e+00> : vector<16x512xf32>
    %216 = tpu.matmul %215, %28, %cst_85 {dimension_numbers = #tpu.dot_dimension_numbers<[1], [0], [0], [1], [0, 0, 1, 1], [], []>} : vector<16x32xf32>, vector<32x512xf32>, vector<16x512xf32> -> vector<16x512xf32>
    %217 = arith.mulf %15, %216 : vector<16x512xf32>
    %cst_86 = arith.constant dense<0.000000e+00> : vector<16x32xf32>
    %218 = tpu.matmul %217, %30, %cst_86 {dimension_numbers = #tpu.dot_dimension_numbers<[1], [0], [0], [1], [0, 0, 1, 1], [], []>} : vector<16x512xf32>, vector<512x32xf32>, vector<16x32xf32> -> vector<16x32xf32>
    %cst_87 = arith.constant dense<0.000000e+00> : vector<16x32xf32>
    %219 = tpu.matmul %215, %29, %cst_87 {dimension_numbers = #tpu.dot_dimension_numbers<[1], [0], [0], [1], [0, 0, 1, 1], [], []>} : vector<16x32xf32>, vector<32x32xf32>, vector<16x32xf32> -> vector<16x32xf32>
    %220 = arith.addf %218, %219 : vector<16x32xf32>
    %cst_88 = arith.constant dense<0.000000e+00> : vector<8x32xf32>
    %221 = tpu.matmul %27, %220, %cst_88 {dimension_numbers = #tpu.dot_dimension_numbers<[1], [0], [0], [1], [0, 0, 1, 1], [], []>} : vector<8x16xf32>, vector<16x32xf32>, vector<8x32xf32> -> vector<8x32xf32>
    %222 = vector.broadcast %31 : vector<1x32xf32> to vector<8x32xf32>
    %223 = arith.addf %221, %222 : vector<8x32xf32>
    %cst_89 = arith.constant dense<0.000000e+00> : vector<8x128xf32>
    %224 = tpu.matmul %223, %32, %cst_89 {dimension_numbers = #tpu.dot_dimension_numbers<[1], [0], [0], [1], [0, 0, 1, 1], [], []>} : vector<8x32xf32>, vector<32x128xf32>, vector<8x128xf32> -> vector<8x128xf32>
    %cst_90 = arith.constant dense<0.000000e+00> : vector<8x128xf32>
    %225 = tpu.matmul %214, %33, %cst_90 {dimension_numbers = #tpu.dot_dimension_numbers<[1], [0], [0], [1], [0, 0, 1, 1], [], []>} : vector<8x32xf32>, vector<32x128xf32>, vector<8x128xf32> -> vector<8x128xf32>
    %226 = arith.addf %224, %225 : vector<8x128xf32>
    %227 = vector.broadcast %34 : vector<1x128xf32> to vector<8x128xf32>
    %228 = arith.addf %226, %227 : vector<8x128xf32>
    %229 = vector.extract_strided_slice %228 {offsets = [0, 0], sizes = [8, 32], strides = [1, 1]} : vector<8x128xf32> to vector<8x32xf32>
    %230 = arith.negf %229 : vector<8x32xf32>
    %231 = math.exp %230 : vector<8x32xf32>
    %cst_91 = arith.constant 1.000000e+00 : f32
    %232 = vector.broadcast %cst_91 : f32 to vector<8x32xf32>
    %233 = arith.addf %232, %231 : vector<8x32xf32>
    %234 = arith.divf %232, %233 : vector<8x32xf32>
    %235 = vector.extract_strided_slice %228 {offsets = [0, 32], sizes = [8, 32], strides = [1, 1]} : vector<8x128xf32> to vector<8x32xf32>
    %236 = arith.negf %235 : vector<8x32xf32>
    %237 = math.exp %236 : vector<8x32xf32>
    %cst_92 = arith.constant 1.000000e+00 : f32
    %238 = vector.broadcast %cst_92 : f32 to vector<8x32xf32>
    %239 = arith.addf %238, %237 : vector<8x32xf32>
    %240 = arith.divf %238, %239 : vector<8x32xf32>
    %241 = vector.extract_strided_slice %228 {offsets = [0, 64], sizes = [8, 32], strides = [1, 1]} : vector<8x128xf32> to vector<8x32xf32>
    %242 = vector.extract_strided_slice %228 {offsets = [0, 96], sizes = [8, 32], strides = [1, 1]} : vector<8x128xf32> to vector<8x32xf32>
    %243 = arith.mulf %234, %242 : vector<8x32xf32>
    %244 = arith.addf %241, %243 : vector<8x32xf32>
    %245 = math.tanh %244 : vector<8x32xf32>
    %cst_93 = arith.constant 1.000000e+00 : f32
    %246 = vector.broadcast %cst_93 : f32 to vector<8x32xf32>
    %247 = arith.subf %246, %240 : vector<8x32xf32>
    %248 = arith.mulf %247, %245 : vector<8x32xf32>
    %249 = arith.mulf %240, %214 : vector<8x32xf32>
    %250 = arith.addf %248, %249 : vector<8x32xf32>
    %c0_94 = arith.constant 0 : index
    %c0_95 = arith.constant 0 : index
    %251 = vector.load %arg16[%c0_94, %c0_95] : memref<8x32xf32, #tpu.memory_space<vmem>>, vector<8x32xf32>
    tpu.vector_store %arg16[%c0_94, %c0_95], %250 {strides = array<i32>} : memref<8x32xf32, #tpu.memory_space<vmem>>, vector<8x32xf32>,
    return
  }
}

</mosaic_0001>

<bundles_post_ra>
// kernel: tpu_custom_call.1
= control target key start
LH: loop header
LB: loop body
LE: loop exit
PB: predicated region body
PF: predicated region fallthrough
CT: control target
= control target key end

     0   :  { %s8217_s0 = inlined_call_operand.hbm [shape: f32[8,23], index: 0, kind: input, shape index: {}]   ;;  %s8218_s1 = inlined_call_operand.hbm [shape: f32[16,19], index: 1, kind: input, shape index: {}]   ;;  %s8219_s2 = inlined_call_operand.hbm [shape: s32[16,1], index: 2, kind: input, shape index: {}]   ;;  %s8220_s3 = inlined_call_operand.hbm [shape: s32[1,16], index: 3, kind: input, shape index: {}]   ;;  %s8221_s4 = inlined_call_operand.hbm [shape: f32[23,32], index: 4, kind: input, shape index: {}]   ;;  %s8222_s5 = inlined_call_operand.hbm [shape: f32[1,32], index: 5, kind: input, shape index: {}]   ;;  %s8223_s6 = inlined_call_operand.hbm [shape: f32[19,16], index: 6, kind: input, shape index: {}]   ;;  %s8224_s7 = inlined_call_operand.hbm [shape: f32[1,16], index: 7, kind: input, shape index: {}]   ;;  %s8225_s8 = inlined_call_operand.hbm [shape: f32[32,512], index: 8, kind: input, shape index: {}]   ;;  %s8226_s9 = inlined_call_operand.hbm [shape: f32[32,32], index: 9, kind: input, shape index: {}]   ;;  %s8227_s10 = inlined_call_operand.hbm [shape: f32[16,512], index: 10, kind: input, shape index: {}]   ;;  %s8228_s11 = inlined_call_operand.hbm [shape: f32[512,32], index: 11, kind: input, shape index: {}]   ;;  %s8229_s12 = inlined_call_operand.hbm [shape: f32[1,32], index: 12, kind: input, shape index: {}]   ;;  %s8230_s13 = inlined_call_operand.hbm [shape: f32[32,128], index: 13, kind: input, shape index: {}]   ;;  %s8231_s14 = inlined_call_operand.hbm [shape: f32[32,128], index: 14, kind: input, shape index: {}]   ;;  %s8232_s15 = inlined_call_operand.hbm [shape: f32[1,128], index: 15, kind: input, shape index: {}]   ;;  %s8233_s16 = inlined_call_operand.hbm [shape: f32[8,32], index: 16, kind: output, shape index: {}]  }
   0x1   :  { %8283 = sst [smem:[#allocation60_spill]] %s8217_s0 }
   0x2   :  { %8284 = sst [smem:[#allocation61_spill]] %s8233_s16 }
   0x3   :  { %21 = vsyncpa [#allocation3], 0 }
   0x4   :  { %22 = vsyncpa [#allocation6], 0 }
   0x5   :  { %23 = vsyncpa [#allocation9], 0 }
   0x6   :  { %24 = vsyncpa [#allocation12], 0 }
   0x7   :  { %25 = vsyncpa [#allocation15], 0 }
   0x8   :  { %26 = vsyncpa [#allocation18], 0 }
   0x9   :  { %27 = vsyncpa [#allocation21], 0 }
   0xa   :  { %28 = vsyncpa [#allocation24], 0 }
   0xb   :  { %29 = vsyncpa [#allocation27], 0 }
   0xc   :  { %30 = vsyncpa [#allocation4], 0  ;;  %s7133_s21 = smov [#allocation5]   ;;  %s6739_s25 = scalar_lea.hbm %s8218_s1, 256 }
   0xd   :  { %s46_s22 = sshll.u32 %s7133_s21, 4  ;;  %p6740_p0 = scmp.ne.s32.totalorder %s8218_s1, %s6739_s25  ;;  %s47_s22 = int_to_ptr.vmem [resolvable:$true] %s46_s22 }
   0xe   :  { %p6743_p1 = scmp.lt.u32.totalorder %s6739_s25, %s8218_s1 }
  0x10   :  { %p6745_p2 = pnand %p6743_p1, %p6740_p0 }
  0x12   :  { %6748 = shalt.err (!%p6745_p2)
}
  0x13   :  { %s6749_s30 = scalar_lea.vmem %s47_s22, 256  ;;  %p6754_p4 = scmp.lt.s32.totalorder %s47_s22, %s47_s22 }
  0x14   :  { %p6750_p3 = scmp.ne.s32.totalorder %s47_s22, %s6749_s30  ;;  %p6755_p5 = scmp.lt.s32.totalorder %s6749_s30, %s6749_s30 }
  0x16   :  { %p6756_p6 = por %p6755_p5, %p6754_p4 }
  0x18   :  { %p6757_p7 = pnand %p6756_p6, %p6750_p3 }
  0x1a   :  { %6760 = shalt.err (!%p6757_p7)
}
  0x1b   :  { %s7134_s0 = smov 128   ;;  %s7135_s17 = smov 8  }
  0x1c   :  { %52 = dma.hbm_to_vmem [thread:$0]  %s8218_s1, 256, %s47_s22, [#allocation6], %s7134_s0, %s7134_s0, %s7135_s17  }
  0x1d   :  { %s7136_s20 = smov [#allocation8]   ;;  %s7137_s23 = smov [#allocation11]  }
  0x1e   :  { %s71_s21 = sshll.u32 %s7136_s20, 4  ;;  %s93_s24 = sshll.u32 %s7137_s23, 4  ;;  %s72_s21 = int_to_ptr.vmem [resolvable:$true] %s71_s21  ;;  %s94_s24 = int_to_ptr.vmem [resolvable:$true] %s93_s24 }
  0x1f   :  { %s6761_s27 = scalar_lea.hbm %s8220_s3, 16 }
  0x20   :  { %p6762_p8 = scmp.ne.s32.totalorder %s8220_s3, %s6761_s27  ;;  %p6765_p9 = scmp.lt.u32.totalorder %s6761_s27, %s8220_s3 }
  0x22   :  { %p6767_p10 = pnand %p6765_p9, %p6762_p8 }
  0x24   :  { %6770 = shalt.err (!%p6767_p10)
}
  0x25   :  { %s6771_s1 = scalar_lea.vmem %s72_s21, 16  ;;  %s6775_s22 = scalar_lea.vmem %s72_s21, 32 }
  0x26   :  { %p6772_p11 = scmp.ne.s32.totalorder %s72_s21, %s6771_s1  ;;  %p6776_p12 = scmp.lt.s32.totalorder %s72_s21, %s72_s21 }
  0x27   :  { %p6777_p13 = scmp.lt.s32.totalorder %s6775_s22, %s6771_s1 }
  0x29   :  { %p6778_p0 = por %p6777_p13, %p6776_p12 }
  0x2b   :  { %p6779_p1 = pnand %p6778_p0, %p6772_p11 }
  0x2d   :  { %6782 = shalt.err (!%p6779_p1)
}
  0x2e   :  { %74 = dma.hbm_to_vmem [thread:$0]  %s8220_s3, 16, %s72_s21, [#allocation9]  }
  0x2f   :  { %s6783_s16 = scalar_lea.hbm %s8222_s5, 16 }
  0x30   :  { %p6784_p2 = scmp.ne.s32.totalorder %s8222_s5, %s6783_s16  ;;  %p6787_p3 = scmp.lt.u32.totalorder %s6783_s16, %s8222_s5 }
  0x32   :  { %p6789_p4 = pnand %p6787_p3, %p6784_p2 }
  0x34   :  { %6792 = shalt.err (!%p6789_p4)
}
  0x35   :  { %s6793_s29 = scalar_lea.vmem %s94_s24, 16  ;;  %s6797_s30 = scalar_lea.vmem %s94_s24, 32 }
  0x36   :  { %p6794_p5 = scmp.ne.s32.totalorder %s94_s24, %s6793_s29  ;;  %p6798_p6 = scmp.lt.s32.totalorder %s94_s24, %s94_s24 }
  0x37   :  { %p6799_p7 = scmp.lt.s32.totalorder %s6797_s30, %s6793_s29 }
  0x39   :  { %p6800_p8 = por %p6799_p7, %p6798_p6 }
  0x3b   :  { %p6801_p9 = pnand %p6800_p8, %p6794_p5 }
  0x3d   :  { %6804 = shalt.err (!%p6801_p9)
}
  0x3e   :  { %96 = dma.hbm_to_vmem [thread:$0]  %s8222_s5, 16, %s94_s24, [#allocation12]  }
  0x3f   :  { %s7138_s1 = smov [#allocation14]   ;;  %s7139_s18 = smov [#allocation17]  }
  0x40   :  { %s115_s22 = sshll.u32 %s7138_s1, 4  ;;  %s136_s19 = sshll.u32 %s7139_s18, 4  ;;  %s116_s22 = int_to_ptr.vmem [resolvable:$true] %s115_s22  ;;  %s137_s19 = int_to_ptr.vmem [resolvable:$true] %s136_s19 }
  0x41   :  { %s6805_s16 = scalar_lea.hbm %s8224_s7, 16 }
  0x42   :  { %p6806_p10 = scmp.ne.s32.totalorder %s8224_s7, %s6805_s16  ;;  %p6809_p11 = scmp.lt.u32.totalorder %s6805_s16, %s8224_s7 }
  0x44   :  { %p6811_p12 = pnand %p6809_p11, %p6806_p10 }
  0x46   :  { %6814 = shalt.err (!%p6811_p12)
}
  0x47   :  { %s6815_s5 = scalar_lea.vmem %s116_s22, 16  ;;  %s6819_s24 = scalar_lea.vmem %s116_s22, 32 }
  0x48   :  { %p6816_p13 = scmp.ne.s32.totalorder %s116_s22, %s6815_s5  ;;  %p6820_p0 = scmp.lt.s32.totalorder %s116_s22, %s116_s22 }
  0x49   :  { %p6821_p1 = scmp.lt.s32.totalorder %s6819_s24, %s6815_s5 }
  0x4b   :  { %p6822_p2 = por %p6821_p1, %p6820_p0 }
  0x4d   :  { %p6823_p3 = pnand %p6822_p2, %p6816_p13 }
  0x4f   :  { %6826 = shalt.err (!%p6823_p3)
}
  0x50   :  { %118 = dma.hbm_to_vmem [thread:$0]  %s8224_s7, 16, %s116_s22, [#allocation15]  }
  0x51   :  { %s6827_s1 = scalar_lea.hbm %s8226_s9, 512 }
  0x52   :  { %p6828_p4 = scmp.ne.s32.totalorder %s8226_s9, %s6827_s1  ;;  %p6831_p5 = scmp.lt.u32.totalorder %s6827_s1, %s8226_s9 }
  0x54   :  { %p6833_p6 = pnand %p6831_p5, %p6828_p4 }
  0x56   :  { %6836 = shalt.err (!%p6833_p6)
}
  0x57   :  { %s6837_s25 = scalar_lea.vmem %s137_s19, 512  ;;  %p6842_p8 = scmp.lt.s32.totalorder %s137_s19, %s137_s19 }
  0x58   :  { %p6838_p7 = scmp.ne.s32.totalorder %s137_s19, %s6837_s25  ;;  %p6843_p9 = scmp.lt.s32.totalorder %s6837_s25, %s6837_s25 }
  0x5a   :  { %p6844_p10 = por %p6843_p9, %p6842_p8 }
  0x5c   :  { %p6845_p11 = pnand %p6844_p10, %p6838_p7 }
  0x5e   :  { %6848 = shalt.err (!%p6845_p11)
}
  0x5f   :  { %142 = dma.hbm_to_vmem [thread:$0]  %s8226_s9, 512, %s137_s19, [#allocation18], %s7134_s0, %s7134_s0, %s7135_s17  }
  0x60   :  { %s7140_s26 = smov [#allocation20]   ;;  %s7141_s28 = smov [#allocation23]  }
  0x61   :  { %s160_s27 = sshll.u32 %s7140_s26, 4  ;;  %s182_s5 = sshll.u32 %s7141_s28, 4  ;;  %s161_s27 = int_to_ptr.vmem [resolvable:$true] %s160_s27  ;;  %s183_s5 = int_to_ptr.vmem [resolvable:$true] %s182_s5 }
  0x62   :  { %s6849_s30 = scalar_lea.hbm %s8228_s11, 8192 }
  0x63   :  { %p6850_p12 = scmp.ne.s32.totalorder %s8228_s11, %s6849_s30  ;;  %p6853_p13 = scmp.lt.u32.totalorder %s6849_s30, %s8228_s11 }
  0x65   :  { %p6855_p0 = pnand %p6853_p13, %p6850_p12 }
  0x67   :  { %6858 = shalt.err (!%p6855_p0)
}
  0x68   :  { %s6859_s9 = scalar_lea.vmem %s161_s27, 8192  ;;  %p6864_p2 = scmp.lt.s32.totalorder %s161_s27, %s161_s27 }
  0x69   :  { %p6860_p1 = scmp.ne.s32.totalorder %s161_s27, %s6859_s9  ;;  %p6865_p3 = scmp.lt.s32.totalorder %s6859_s9, %s6859_s9 }
  0x6b   :  { %p6866_p4 = por %p6865_p3, %p6864_p2 }
  0x6d   :  { %p6867_p5 = pnand %p6866_p4, %p6860_p1 }
  0x6f   :  { %6870 = shalt.err (!%p6867_p5)
}
  0x70   :  { %166 = dma.hbm_to_vmem [thread:$0]  %s8228_s11, 8192, %s161_s27, [#allocation21], %s7134_s0, %s7134_s0, %s7135_s17  }
  0x71   :  { %s6871_s25 = scalar_lea.hbm %s8230_s13, 512 }
  0x72   :  { %p6872_p6 = scmp.ne.s32.totalorder %s8230_s13, %s6871_s25  ;;  %p6875_p7 = scmp.lt.u32.totalorder %s6871_s25, %s8230_s13 }
  0x74   :  { %p6877_p8 = pnand %p6875_p7, %p6872_p6 }
  0x76   :  { %6880 = shalt.err (!%p6877_p8)
}
  0x77   :  { %s6881_s24 = scalar_lea.vmem %s183_s5, 512  ;;  %p6886_p10 = scmp.lt.s32.totalorder %s183_s5, %s183_s5 }
  0x78   :  { %p6882_p9 = scmp.ne.s32.totalorder %s183_s5, %s6881_s24  ;;  %p6887_p11 = scmp.lt.s32.totalorder %s6881_s24, %s6881_s24 }
  0x7a   :  { %p6888_p12 = por %p6887_p11, %p6886_p10 }
  0x7c   :  { %p6889_p13 = pnand %p6888_p12, %p6882_p9 }
  0x7e   :  { %6892 = shalt.err (!%p6889_p13)
}
  0x7f   :  { %188 = dma.hbm_to_vmem [thread:$0]  %s8230_s13, 512, %s183_s5, [#allocation24], %s7134_s0, %s7134_s0, %s7135_s17  }
  0x80   :  { %s7142_s29 = smov [#allocation2]   ;;  %s7143_s3 = smov [#allocation7]  }
  0x81   :  { %s37_s30 = sshll.u32 %s7142_s29, 4  ;;  %s58_s21 = sshll.u32 %s7143_s3, 4  ;;  %s38_s30 = int_to_ptr.vmem [resolvable:$true] %s37_s30  ;;  %s59_s21 = int_to_ptr.vmem [resolvable:$true] %s58_s21 }
  0x82   :  { %s8285_s9 = sld [smem:[#allocation60_spill]] }
  0x88   :  { %s6893_s19 = scalar_lea.hbm %s8285_s9, 128 }
  0x89   :  { %p6894_p0 = scmp.ne.s32.totalorder %s8285_s9, %s6893_s19  ;;  %p6897_p1 = scmp.lt.u32.totalorder %s6893_s19, %s8285_s9 }
  0x8b   :  { %p6899_p2 = pnand %p6897_p1, %p6894_p0 }
  0x8d   :  { %6902 = shalt.err (!%p6899_p2)
}
  0x8e   :  { %s6903_s13 = scalar_lea.vmem %s38_s30, 128  ;;  %p6908_p4 = scmp.lt.s32.totalorder %s38_s30, %s38_s30 }
  0x8f   :  { %p6904_p3 = scmp.ne.s32.totalorder %s38_s30, %s6903_s13  ;;  %p6909_p5 = scmp.lt.s32.totalorder %s6903_s13, %s6903_s13 }
  0x91   :  { %p6910_p6 = por %p6909_p5, %p6908_p4 }
  0x93   :  { %p6911_p7 = pnand %p6910_p6, %p6904_p3 }
  0x95   :  { %6914 = shalt.err (!%p6911_p7)
}
  0x96   :  { %40 = dma.hbm_to_vmem [thread:$0]  %s8285_s9, 128, %s38_s30, [#allocation3]  }
  0x97   :  { %s6915_s28 = scalar_lea.hbm %s8219_s2, 256 }
  0x98   :  { %p6916_p8 = scmp.ne.s32.totalorder %s8219_s2, %s6915_s28  ;;  %p6919_p9 = scmp.lt.u32.totalorder %s6915_s28, %s8219_s2 }
  0x9a   :  { %p6921_p10 = pnand %p6919_p9, %p6916_p8 }
  0x9c   :  { %6924 = shalt.err (!%p6921_p10)
}
  0x9d   :  { %s6925_s3 = scalar_lea.vmem %s59_s21, 256  ;;  %p6930_p12 = scmp.lt.s32.totalorder %s59_s21, %s59_s21 }
  0x9e   :  { %p6926_p11 = scmp.ne.s32.totalorder %s59_s21, %s6925_s3  ;;  %p6931_p13 = scmp.lt.s32.totalorder %s6925_s3, %s6925_s3 }
  0xa0   :  { %p6932_p0 = por %p6931_p13, %p6930_p12 }
  0xa2   :  { %p6933_p1 = pnand %p6932_p0, %p6926_p11 }
  0xa4   :  { %6936 = shalt.err (!%p6933_p1)
}
  0xa5   :  { %64 = dma.hbm_to_vmem [thread:$0]  %s8219_s2, 256, %s59_s21, [#allocation6], %s7134_s0, %s7134_s0, %s7135_s17  }
  0xa6   :  { %s7144_s18 = smov [#allocation10]   ;;  %s7145_s19 = smov [#allocation13]  }
  0xa7   :  { %s80_s9 = sshll.u32 %s7144_s18, 4  ;;  %s102_s20 = sshll.u32 %s7145_s19, 4  ;;  %s81_s9 = int_to_ptr.vmem [resolvable:$true] %s80_s9  ;;  %s103_s20 = int_to_ptr.vmem [resolvable:$true] %s102_s20 }
  0xa8   :  { %s6937_s25 = scalar_lea.hbm %s8221_s4, 384 }
  0xa9   :  { %p6938_p2 = scmp.ne.s32.totalorder %s8221_s4, %s6937_s25  ;;  %p6941_p3 = scmp.lt.u32.totalorder %s6937_s25, %s8221_s4 }
  0xab   :  { %p6943_p4 = pnand %p6941_p3, %p6938_p2 }
  0xad   :  { %6946 = shalt.err (!%p6943_p4)
}
  0xae   :  { %s6947_s2 = scalar_lea.vmem %s81_s9, 384  ;;  %p6952_p6 = scmp.lt.s32.totalorder %s81_s9, %s81_s9 }
  0xaf   :  { %p6948_p5 = scmp.ne.s32.totalorder %s81_s9, %s6947_s2  ;;  %p6953_p7 = scmp.lt.s32.totalorder %s6947_s2, %s6947_s2 }
  0xb1   :  { %p6954_p8 = por %p6953_p7, %p6952_p6 }
  0xb3   :  { %p6955_p9 = pnand %p6954_p8, %p6948_p5 }
  0xb5   :  { %6958 = shalt.err (!%p6955_p9)
}
  0xb6   :  { %86 = dma.hbm_to_vmem [thread:$0]  %s8221_s4, 384, %s81_s9, [#allocation9], %s7134_s0, %s7134_s0, %s7135_s17  }
  0xb7   :  { %s6959_s11 = scalar_lea.hbm %s8223_s6, 384 }
  0xb8   :  { %p6960_p10 = scmp.ne.s32.totalorder %s8223_s6, %s6959_s11  ;;  %p6963_p11 = scmp.lt.u32.totalorder %s6959_s11, %s8223_s6 }
  0xba   :  { %p6965_p12 = pnand %p6963_p11, %p6960_p10 }
  0xbc   :  { %6968 = shalt.err (!%p6965_p12)
}
  0xbd   :  { %s6969_s1 = scalar_lea.vmem %s103_s20, 384  ;;  %p6974_p0 = scmp.lt.s32.totalorder %s103_s20, %s103_s20 }
  0xbe   :  { %p6970_p13 = scmp.ne.s32.totalorder %s103_s20, %s6969_s1  ;;  %p6975_p1 = scmp.lt.s32.totalorder %s6969_s1, %s6969_s1 }
  0xc0   :  { %p6976_p2 = por %p6975_p1, %p6974_p0 }
  0xc2   :  { %p6977_p3 = pnand %p6976_p2, %p6970_p13 }
  0xc4   :  { %6980 = shalt.err (!%p6977_p3)
}
  0xc5   :  { %108 = dma.hbm_to_vmem [thread:$0]  %s8223_s6, 384, %s103_s20, [#allocation12], %s7134_s0, %s7134_s0, %s7135_s17  }
  0xc6   :  { %s7146_s9 = smov [#allocation16]   ;;  %s6981_s25 = scalar_lea.hbm %s8225_s8, 2048 }
  0xc7   :  { %s124_s19 = sshll.u32 %s7146_s9, 4  ;;  %p6982_p4 = scmp.ne.s32.totalorder %s8225_s8, %s6981_s25  ;;  %s125_s19 = int_to_ptr.vmem [resolvable:$true] %s124_s19 }
  0xc8   :  { %p6985_p5 = scmp.lt.u32.totalorder %s6981_s25, %s8225_s8 }
  0xca   :  { %p6987_p6 = pnand %p6985_p5, %p6982_p4 }
  0xcc   :  { %6990 = shalt.err (!%p6987_p6)
}
  0xcd   :  { %s6991_s2 = scalar_lea.vmem %s125_s19, 2048  ;;  %p6996_p8 = scmp.lt.s32.totalorder %s125_s19, %s125_s19 }
  0xce   :  { %p6992_p7 = scmp.ne.s32.totalorder %s125_s19, %s6991_s2  ;;  %p6997_p9 = scmp.lt.s32.totalorder %s6991_s2, %s6991_s2 }
  0xd0   :  { %p6998_p10 = por %p6997_p9, %p6996_p8 }
  0xd2   :  { %p6999_p11 = pnand %p6998_p10, %p6992_p7 }
  0xd4   :  { %7002 = shalt.err (!%p6999_p11)
}
  0xd5   :  { %s7147_s6 = smov 512   ;;  %s7148_s20 = smov 32  }
  0xd6   :  { %130 = dma.hbm_to_vmem [thread:$0]  %s8225_s8, 2048, %s125_s19, [#allocation15], %s7147_s6, %s7147_s6, %s7148_s20  }
  0xd7   :  { %s7149_s28 = smov [#allocation19]   ;;  %s7150_s11 = smov [#allocation22]  }
  0xd8   :  { %s148_s24 = sshll.u32 %s7149_s28, 4  ;;  %s173_s27 = sshll.u32 %s7150_s11, 4  ;;  %s149_s24 = int_to_ptr.vmem [resolvable:$true] %s148_s24  ;;  %s174_s27 = int_to_ptr.vmem [resolvable:$true] %s173_s27 }
  0xd9   :  { %s7003_s30 = scalar_lea.hbm %s8227_s10, 1024 }
  0xda   :  { %p7004_p12 = scmp.ne.s32.totalorder %s8227_s10, %s7003_s30  ;;  %p7007_p13 = scmp.lt.u32.totalorder %s7003_s30, %s8227_s10 }
  0xdc   :  { %p7009_p0 = pnand %p7007_p13, %p7004_p12 }
  0xde   :  { %7012 = shalt.err (!%p7009_p0)
}
  0xdf   :  { %s7013_s8 = scalar_lea.vmem %s149_s24, 1024  ;;  %p7018_p2 = scmp.lt.s32.totalorder %s149_s24, %s149_s24 }
  0xe0   :  { %p7014_p1 = scmp.ne.s32.totalorder %s149_s24, %s7013_s8  ;;  %p7019_p3 = scmp.lt.s32.totalorder %s7013_s8, %s7013_s8 }
  0xe2   :  { %p7020_p4 = por %p7019_p3, %p7018_p2 }
  0xe4   :  { %p7021_p5 = pnand %p7020_p4, %p7014_p1 }
  0xe6   :  { %7024 = shalt.err (!%p7021_p5)
}
  0xe7   :  { %154 = dma.hbm_to_vmem [thread:$0]  %s8227_s10, 1024, %s149_s24, [#allocation18], %s7147_s6, %s7147_s6, %s7148_s20  }
  0xe8   :  { %s7025_s13 = scalar_lea.hbm %s8229_s12, 16 }
  0xe9   :  { %p7026_p6 = scmp.ne.s32.totalorder %s8229_s12, %s7025_s13  ;;  %p7029_p7 = scmp.lt.u32.totalorder %s7025_s13, %s8229_s12 }
  0xeb   :  { %p7031_p8 = pnand %p7029_p7, %p7026_p6 }
  0xed   :  { %7034 = shalt.err (!%p7031_p8)
}
  0xee   :  { %s7035_s21 = scalar_lea.vmem %s174_s27, 16  ;;  %s7039_s26 = scalar_lea.vmem %s174_s27, 32 }
  0xef   :  { %p7036_p9 = scmp.ne.s32.totalorder %s174_s27, %s7035_s21  ;;  %p7040_p10 = scmp.lt.s32.totalorder %s174_s27, %s174_s27 }
  0xf0   :  { %p7041_p11 = scmp.lt.s32.totalorder %s7039_s26, %s7035_s21 }
  0xf2   :  { %p7042_p12 = por %p7041_p11, %p7040_p10 }
  0xf4   :  { %p7043_p13 = pnand %p7042_p12, %p7036_p9 }
  0xf6   :  { %7046 = shalt.err (!%p7043_p13)
}
  0xf7   :  { %176 = dma.hbm_to_vmem [thread:$0]  %s8229_s12, 16, %s174_s27, [#allocation21]  }
  0xf8   :  { %s7151_s28 = smov [#allocation25]   ;;  %s7152_s11 = smov [#allocation26]  }
  0xf9   :  { %s194_s24 = sshll.u32 %s7151_s28, 4  ;;  %s207_s29 = sshll.u32 %s7152_s11, 4  ;;  %s195_s24 = int_to_ptr.vmem [resolvable:$true] %s194_s24  ;;  %s208_s29 = int_to_ptr.vmem [resolvable:$true] %s207_s29 }
  0xfa   :  { %s7047_s1 = scalar_lea.hbm %s8231_s14, 512 }
  0xfb   :  { %p7048_p0 = scmp.ne.s32.totalorder %s8231_s14, %s7047_s1  ;;  %p7051_p1 = scmp.lt.u32.totalorder %s7047_s1, %s8231_s14 }
  0xfd   :  { %p7053_p2 = pnand %p7051_p1, %p7048_p0 }
  0xff   :  { %7056 = shalt.err (!%p7053_p2)
}
 0x100   :  { %s7057_s12 = scalar_lea.vmem %s195_s24, 512  ;;  %p7062_p4 = scmp.lt.s32.totalorder %s195_s24, %s195_s24 }
 0x101   :  { %p7058_p3 = scmp.ne.s32.totalorder %s195_s24, %s7057_s12  ;;  %p7063_p5 = scmp.lt.s32.totalorder %s7057_s12, %s7057_s12 }
 0x103   :  { %p7064_p6 = por %p7063_p5, %p7062_p4 }
 0x105   :  { %p7065_p7 = pnand %p7064_p6, %p7058_p3 }
 0x107   :  { %7068 = shalt.err (!%p7065_p7)
}
 0x108   :  { %200 = dma.hbm_to_vmem [thread:$0]  %s8231_s14, 512, %s195_s24, [#allocation24], %s7134_s0, %s7134_s0, %s7135_s17  }
 0x109   :  { %s7069_s25 = scalar_lea.hbm %s8232_s15, 16 }
 0x10a   :  { %p7070_p8 = scmp.ne.s32.totalorder %s8232_s15, %s7069_s25  ;;  %p7073_p9 = scmp.lt.u32.totalorder %s7069_s25, %s8232_s15 }
 0x10c   :  { %p7075_p10 = pnand %p7073_p9, %p7070_p8 }
 0x10e   :  { %7078 = shalt.err (!%p7075_p10)
}
 0x10f   :  { %s7079_s2 = scalar_lea.vmem %s208_s29, 16  ;;  %s7083_s21 = scalar_lea.vmem %s208_s29, 32 }
 0x110   :  { %p7080_p11 = scmp.ne.s32.totalorder %s208_s29, %s7079_s2  ;;  %p7084_p12 = scmp.lt.s32.totalorder %s208_s29, %s208_s29 }
 0x111   :  { %p7085_p13 = scmp.lt.s32.totalorder %s7083_s21, %s7079_s2 }
 0x113   :  { %p7086_p0 = por %p7085_p13, %p7084_p12 }
 0x115   :  { %p7087_p1 = pnand %p7086_p0, %p7080_p11 }
 0x117   :  { %7090 = shalt.err (!%p7087_p1)
}
 0x118   :  { %210 = dma.hbm_to_vmem [thread:$0]  %s8232_s15, 16, %s208_s29, [#allocation27]  }
 0x119   :  { %7113 = dma.done.wait [#allocation3], 128  }
 0x11a   :  { %7114 = vsyncadd [#allocation3], 4294967168 }
 0x11b   :  { %7115 = dma.done.wait [#allocation6], 512  }
 0x11c   :  { %7116 = vsyncadd [#allocation6], 4294966784 }
 0x11d   :  { %7117 = dma.done.wait [#allocation9], 400  }
 0x11e   :  { %7118 = vsyncadd [#allocation9], 4294966896 }
 0x11f   :  { %7119 = dma.done.wait [#allocation12], 400  }
 0x120   :  { %7120 = vsyncadd [#allocation12], 4294966896 }
 0x121   :  { %7121 = dma.done.wait [#allocation15], 2064  }
 0x122   :  { %7122 = vsyncadd [#allocation15], 4294965232 }
 0x123   :  { %7123 = dma.done.wait [#allocation18], 1536  }
 0x124   :  { %7124 = vsyncadd [#allocation18], 4294965760 }
 0x125   :  { %7125 = dma.done.wait [#allocation21], 8208  }
 0x126   :  { %7126 = vsyncadd [#allocation21], 4294959088 }
 0x127   :  { %7127 = dma.done.wait [#allocation24], 1024  }
 0x128   :  { %7128 = vsyncadd [#allocation24], 4294966272 }
 0x129   :  { %7129 = dma.done.wait [#allocation27], 16  }
 0x12a   :  { %7130 = vsyncadd [#allocation27], 4294967280  ;;  %v8247_v0 = vmov 0.0|0.0   ;;  %vm7154_vm0 = vmmov 0   ;;  %v8237_v1 = vmov 0.0   ;;  %v7156_v2 = vmov 0  }
 0x12b   :  { %6040 = vmatprep.subr.bf16.mxu0 %v8247_v0  ;;  %5758 = vmatprep.mubr.msk.f32.mxu0 %vm7154_vm0, %v8237_v1  ;;  %vm360_vm1 = vcmask 154624   ;;  %v350_v3 = vld [vmem:[#allocation13] sm:$0xff]  ;;  %v351_v4 = vld [vmem:[#allocation13 + $0x8] sm:$0xff]  ;;  %v352_v8 = vld [vmem:[#allocation13 + $0x10] sm:$0x7]  ;;  %vm367_vm2 = vcmask 1042432   ;;  %v8236_v28 = vlaneseq }
 0x12c   :  { %6700 = vset.pattern.permute.xlu0 %v7156_v2  ;;  %v6043_v5 = vpack.c.bf16 %v351_v4, %v350_v3  ;;  %v348_v6 = vld [vmem:[#allocation5] sm:$0xff]  ;;  %v261_v9 = vld [vmem:[#allocation10 + $0x8] sm:$0xff]  ;;  %v620_v12 = vld [vmem:[#allocation7 + $0x8] sm:$0xff]  ;;  %vm274_vm3 = vcmask 1046528   ;;  %vm270_vm4 = vcmask 187392   ;;  %vm456_vm5 = vcmask 130048  }
 0x12d   :  { %v260_v7 = vld [vmem:[#allocation10] sm:$0xff]  ;;  %5767 = vmatprep.mubr.msk.f32.mxu1 %vm360_vm1, %v348_v6  ;;  %v619_v11 = vld [vmem:[#allocation7] sm:$0xff]  ;;  %v259_v15 = vld [vmem:[#allocation2] sm:$0xff]  ;;  %v618_v34 = vand.u32 127, %v8236_v28  ;;  %vm737_vm7 = vcmask 64512   ;;  %vm819_vm9 = vcmask 261120  }
 0x12e   :  { %6044 = vmatprep.subr.bf16.mxu1 %v6043_v5  ;;  %v6041_v10 = vpack.c.bf16 %v261_v9, %v260_v7  ;;  %622 = vperm.xlu0 %6700, %v619_v11   ;;  %v349_v13 = vld [vmem:[#allocation5 + $0x8] sm:$0xff]  ;;  %v262_v14 = vld [vmem:[#allocation10 + $0x10] sm:$0x7f]  ;;  %v449_v16 = vld [vmem:[#allocation19 + $0x8] sm:$0xff]  ;;  %s7157_s15 = smov 64   ;;  %s7158_s17 = smov 96  }
 0x12f   :  { %6046 = vmatpush3.bf16.msra.mxu1 %v6043_v5  ;;  %v453_v17 = vld [vmem:[#allocation19 + $0x28] sm:$0xff]  ;;  %v451_v18 = vld [vmem:[#allocation19 + $0x18] sm:$0xff]  ;;  %v448_v21 = vld [vmem:[#allocation19] sm:$0xff] }
 0x130   :  { %5765 = vmatprep.subr.msk.mxu1 %vm367_vm2, %v352_v8  ;;  %6042 = vmatpush3.bf16.msra.mxu0 %v6041_v10  ;;  %v6047_v19 = vpack.c.bf16 %v453_v17, %v449_v16  ;;  %v455_v20 = vld [vmem:[#allocation19 + $0x38] sm:$0xff]  ;;  %v452_v23 = vld [vmem:[#allocation19 + $0x20] sm:$0xff]  ;;  %v450_v24 = vld [vmem:[#allocation19 + $0x10] sm:$0xff] }
 0x131   :  { %5756 = vmatprep.subr.mxu0 %v8237_v1  ;;  %v6051_v22 = vpack.c.bf16 %v455_v20, %v451_v18  ;;  %v454_v25 = vld [vmem:[#allocation19 + $0x30] sm:$0xff]  ;;  %v6049_v26 = vpack.c.bf16 %v452_v23, %v448_v21  ;;  %v5069_v29 = vld [vmem:[#allocation14] ss:$0 sm:$0xff]  ;;  %v5066_v30 = vld [vmem:[#allocation11] ss:$0 sm:$0xff] }
 0x132   :  { %625 = vperm.xlu0 %6700, %v620_v12   ;;  %v6053_v27 = vpack.c.bf16 %v454_v25, %v450_v24  ;;  %v644_v45 = vld [vmem:[#allocation16 + $0x8] sm:$0xff]  ;;  %v646_v47 = vld [vmem:[#allocation16 + $0x18] sm:$0xff]  ;;  %v643_v50 = vld [vmem:[#allocation16] sm:$0xff] }
 0x133   :  { %5766 = vmatpush3.msk.msra.mxu1 %vm367_vm2, %v352_v8  ;;  %v648_v46 = vld [vmem:[#allocation16 + $0x28] sm:$0xff]  ;;  %v650_v49 = vld [vmem:[#allocation16 + $0x38] sm:$0xff]  ;;  %v647_v51 = vld [vmem:[#allocation16 + $0x20] sm:$0xff] }
 0x134   :  { %5768 = vmatmul.mubr.msk.f32.vlgmr.msra.gmra.mrb[0].mxu1 %vm360_vm1, %v349_v13  ;;  %5757 = vmatpush3.msk.msra.mxu0 %vm274_vm3, %v262_v14  ;;  %v7496_v48 = vpack.c.bf16 %v648_v46, %v644_v45  ;;  %v7498_v52 = vpack.c.bf16 %v650_v49, %v646_v47  ;;  %v7500_v53 = vpack.c.bf16 %v647_v51, %v643_v50  ;;  %v645_v54 = vld [vmem:[#allocation16 + $0x10] sm:$0xff]  ;;  %v652_v57 = vld [vmem:[#allocation16 + $0x48] sm:$0xff]  ;;  %v654_v59 = vld [vmem:[#allocation16 + $0x58] sm:$0xff] }
 0x135   :  { %5759 = vmatmul.mubr.msk.f32.vlgmr.msra.gmra.mrb[0].mxu0 %vm270_vm4, %v259_v15  ;;  %604 = vmatprep.mubr.f32.mxu1 %v8237_v1  ;;  %v649_v55 = vld [vmem:[#allocation16 + $0x30] sm:$0xff]  ;;  %v656_v58 = vld [vmem:[#allocation16 + $0x68] sm:$0xff]  ;;  %v658_v61 = vld [vmem:[#allocation16 + $0x78] sm:$0xff] }
 0x136   :  { %527 = vmatprep.mubr.f32.mxu0 %v8237_v1  ;;  %6048 = vmatprep.subr.bf16.mxu0 %v6047_v19  ;;  %v7503_v56 = vpack.c.bf16 %v649_v55, %v645_v54  ;;  %v7508_v60 = vpack.c.bf16 %v656_v58, %v652_v57  ;;  %v651_v62 = vld [vmem:[#allocation16 + $0x40] sm:$0xff]  ;;  %v7510_v2 = vpack.c.bf16 %v658_v61, %v654_v59  ;;  %v653_v4 = vld [vmem:[#allocation16 + $0x50] sm:$0xff]  ;;  %v660_v8 = vld [vmem:[#allocation17 + $0x8] sm:$0xff] }
 0x137   :  { %6052 = vmatprep.subr.bf16.mxu1 %v6051_v22  ;;  %6050 = vmatpush1.bf16.msra.mxu0 %v6049_v26  ;;  %v655_v63 = vld [vmem:[#allocation16 + $0x60] sm:$0xff]  ;;  %v657_v5 = vld [vmem:[#allocation16 + $0x70] sm:$0xff]  ;;  %v680_v11 = vld [vmem:[#allocation20 + $0x88] sm:$0xff] }
 0x138   :  { %6054 = vmatpush1.bf16.msra.mxu1 %v6053_v27  ;;  %v7512_v3 = vpack.c.bf16 %v655_v63, %v651_v62  ;;  %v7515_v6 = vpack.c.bf16 %v657_v5, %v653_v4  ;;  %v659_v7 = vld [vmem:[#allocation17] sm:$0xff]  ;;  %v661_v21 = vld [vmem:[#allocation17 + $0x10] sm:$0xff]  ;;  %v662_v22 = vld [vmem:[#allocation17 + $0x18] sm:$0xff] }
 0x139   :  { %6056 = vmatprep.subr.bf16.mxu1 %v7496_v48  ;;  %v7520_v9 = vpack.c.bf16 %v660_v8, %v659_v7  ;;  %v679_v10 = vld [vmem:[#allocation20 + $0x80] sm:$0xff]  ;;  %v664_v24 = vld [vmem:[#allocation20 + $0x8] sm:$0xff]  ;;  %v7542_v26 = vpack.c.bf16 %v662_v22, %v661_v21  ;;  %v713_v45 = vld [vmem:[#allocation20 + $0x190] sm:$0xff] }
 0x13a   :  { %v7523_v12 = vpack.c.bf16 %v680_v11, %v679_v10  ;;  %v663_v23 = vld [vmem:[#allocation20] sm:$0xff]  ;;  %v714_v46 = vld [vmem:[#allocation20 + $0x198] sm:$0xff]  ;;  %v668_v51 = vld [vmem:[#allocation20 + $0x28] sm:$0xff] }
 0x13b   :  { %v711_v27 = vld [vmem:[#allocation20 + $0x180] sm:$0xff]  ;;  %v685_v55 = vld [vmem:[#allocation20 + $0xb0] sm:$0xff]  ;;  %v686_v57 = vld [vmem:[#allocation20 + $0xb8] sm:$0xff]  ;;  %v7569_v58 = vpack.c.bf16 %v714_v46, %v713_v45 }
 0x13c   :  { %v667_v50 = vld [vmem:[#allocation20 + $0x20] sm:$0xff]  ;;  %v697_v59 = vld [vmem:[#allocation20 + $0x110] sm:$0xff]  ;;  %v698_v61 = vld [vmem:[#allocation20 + $0x118] sm:$0xff]  ;;  %v7576_v5 = vpack.c.bf16 %v686_v57, %v685_v55 }
 0x13d   :  { %v715_v62 = vld [vmem:[#allocation20 + $0x1a0] sm:$0xff]  ;;  %v716_v63 = vld [vmem:[#allocation20 + $0x1a8] sm:$0xff]  ;;  %v7572_v4 = vpack.c.bf16 %v668_v51, %v667_v50  ;;  %v669_v7 = vld [vmem:[#allocation20 + $0x30] sm:$0xff]  ;;  %v7579_v10 = vpack.c.bf16 %v698_v61, %v697_v59 }
 0x13e   :  { %v670_v8 = vld [vmem:[#allocation20 + $0x38] sm:$0xff]  ;;  %v687_v11 = vld [vmem:[#allocation20 + $0xc0] sm:$0xff]  ;;  %v688_v21 = vld [vmem:[#allocation20 + $0xc8] sm:$0xff]  ;;  %v7582_v22 = vpack.c.bf16 %v716_v63, %v715_v62 }
 0x13f   :  { %v719_v45 = vld [vmem:[#allocation20 + $0x1c0] sm:$0xff]  ;;  %v720_v46 = vld [vmem:[#allocation20 + $0x1c8] sm:$0xff]  ;;  %v673_v55 = vld [vmem:[#allocation20 + $0x50] sm:$0xff] }
 0x140   :  { %v674_v57 = vld [vmem:[#allocation20 + $0x58] sm:$0xff]  ;;  %v691_v61 = vld [vmem:[#allocation20 + $0xe0] sm:$0xff]  ;;  %v692_v62 = vld [vmem:[#allocation20 + $0xe8] sm:$0xff]  ;;  %v7606_v63 = vpack.c.bf16 %v720_v46, %v719_v45 }
 0x141   :  { %v710_v28 = vld [vmem:[#allocation20 + $0x178] sm:$0xff] }
 0x1ad   :  { %v623_v32 = vpop.permute.xlu0 %622 }
 0x1ae   :  { %vm627_vm6 = vcmp.eq.s32.totalorder %v618_v34, %v623_v32  ;;  %v681_v32 = vld [vmem:[#allocation20 + $0x90] sm:$0xff] }
 0x1af   :  { %v7482_v43 = vsel %vm627_vm6, 1.0, %v8237_v1 }
 0x1b0   :  { %8286 = vst [vmem:[#allocation39_spill] sm:$0xff] %v7482_v43 }
 0x1b1   :  { %v626_v41 = vpop.permute.xlu0 %625 }
 0x1b2   :  { %vm628_vm8 = vcmp.eq.s32.totalorder %v618_v34, %v626_v41  ;;  %v665_v34 = vld [vmem:[#allocation20 + $0x10] sm:$0xff]  ;;  %v696_v41 = vld [vmem:[#allocation20 + $0x108] sm:$0xff] }
 0x1b3   :  { %v7491_v44 = vsel %vm628_vm8, 1.0, %v8237_v1 }
 0x207   :  { %v5769_v31 = vpop.f32.mrb[0].mxu1 }
 0x208   :  { %v437_v33 = vpop.f32.mrb[1].mxu1  ;;  %v344_v35 = vpop.f32.mrb[0].mxu0  ;;  %v443_v39 = vadd.f32 %v5769_v31, %v5069_v29  ;;  %v7544_v31 = vpack.c.bf16 %v664_v24, %v663_v23  ;;  %v699_v23 = vld [vmem:[#allocation20 + $0x120] sm:$0xff]  ;;  %v700_v24 = vld [vmem:[#allocation20 + $0x128] sm:$0xff] }
 0x209   :  { %v438_v36 = vadd.f32 %v5069_v29, %v437_v33  ;;  %v7474_v37 = vadd.f32 %v5066_v30, %v344_v35  ;;  %v5760_v38 = vpop.f32.mrb[1].mxu0  ;;  %v712_v30 = vld [vmem:[#allocation20 + $0x188] sm:$0xff]  ;;  %v682_v33 = vld [vmem:[#allocation20 + $0x98] sm:$0xff] }
 0x20a   :  { %v447_v42 = vmax.f32 %v443_v39, 0.0  ;;  %v666_v35 = vld [vmem:[#allocation20 + $0x18] sm:$0xff]  ;;  %v684_v38 = vld [vmem:[#allocation20 + $0xa8] sm:$0xff]  ;;  %v7552_v39 = vpack.c.bf16 %v712_v30, %v711_v27  ;;  %v7588_v30 = vpack.c.bf16 %v688_v21, %v687_v11  ;;  %v721_v11 = vld [vmem:[#allocation20 + $0x1d0] sm:$0xff] }
 0x20b   :  { %v446_v40 = vmax.f32 %v438_v36, 0.0  ;;  %5770 = vmatprep.subr.mxu0 %v7474_v37  ;;  %v683_v36 = vld [vmem:[#allocation20 + $0xa0] sm:$0xff]  ;;  %v7557_v47 = vpack.c.bf16 %v666_v35, %v665_v34  ;;  %v718_v27 = vld [vmem:[#allocation20 + $0x1b8] sm:$0xff]  ;;  %v7591_v34 = vpack.c.bf16 %v700_v24, %v699_v23  ;;  %v689_v35 = vld [vmem:[#allocation20 + $0xd0] sm:$0xff]  ;;  %v7609_v23 = vpack.c.bf16 %v674_v57, %v673_v55 }
 0x20c   :  { %v7561_v49 = vpack.c.bf16 %v684_v38, %v683_v36  ;;  %v690_v36 = vld [vmem:[#allocation20 + $0xd8] sm:$0xff]  ;;  %v7612_v24 = vpack.c.bf16 %v692_v62, %v691_v61  ;;  %v707_v57 = vld [vmem:[#allocation20 + $0x160] sm:$0xff]  ;;  %v708_v61 = vld [vmem:[#allocation20 + $0x168] sm:$0xff] }
 0x20d   :  { %5073 = vmatmul.mubr.msk.f32.vlgmr.msra.gmra.mrb[2].mxu0 %vm456_vm5, %v446_v40  ;;  %5075 = vmatmul.mubr.msk.f32.vlgmr.msra.gmra.mrb[2].mxu1 %vm456_vm5, %v446_v40  ;;  %v695_v40 = vld [vmem:[#allocation20 + $0x100] sm:$0xff]  ;;  %v7600_v51 = vpack.c.bf16 %v690_v36, %v689_v35  ;;  %v722_v21 = vld [vmem:[#allocation20 + $0x1d8] sm:$0xff]  ;;  %v705_v35 = vld [vmem:[#allocation20 + $0x150] sm:$0xff]  ;;  %v7632_v62 = vpack.c.bf16 %v708_v61, %v707_v57 }
 0x20e   :  { %533 = vmatprep.mubr.f32.mxu0 %v8237_v1  ;;  %610 = vmatprep.mubr.f32.mxu1 %v8237_v1  ;;  %v7565_v54 = vpack.c.bf16 %v696_v41, %v695_v40  ;;  %v701_v40 = vld [vmem:[#allocation20 + $0x130] sm:$0xff]  ;;  %v702_v41 = vld [vmem:[#allocation20 + $0x138] sm:$0xff]  ;;  %v732_v61 = vld [vmem:[#allocation25] sm:$0xff] }
 0x20f   :  { %5771 = vmatpush3.msra.mxu0 %v7474_v37  ;;  %6058 = vmatpush1.bf16.msra.mxu1 %v7500_v53  ;;  %v7603_v59 = vpack.c.bf16 %v702_v41, %v701_v40  ;;  %v706_v36 = vld [vmem:[#allocation20 + $0x158] sm:$0xff]  ;;  %v723_v40 = vld [vmem:[#allocation20 + $0x1e0] sm:$0xff]  ;;  %v724_v41 = vld [vmem:[#allocation20 + $0x1e8] sm:$0xff]  ;;  %8300 = vst [vmem:[#allocation53_spill] sm:$0xff] %v7632_v62 }
 0x210   :  { %6064 = vmatprep.subr.bf16.mxu0 %v7498_v52  ;;  %6060 = vmatprep.subr.bf16.mxu1 %v7508_v60  ;;  %v7625_v46 = vpack.c.bf16 %v706_v36, %v705_v35  ;;  %v7628_v55 = vpack.c.bf16 %v724_v41, %v723_v40  ;;  %v678_v35 = vld [vmem:[#allocation20 + $0x78] sm:$0xff]  ;;  %v709_v41 = vld [vmem:[#allocation20 + $0x170] sm:$0xff] }
 0x211   :  { %5074 = vmatmul.mubr.msk.f32.gmra.mrb[4].mxu0 %vm456_vm5, %v447_v42  ;;  %5076 = vmatmul.mubr.msk.f32.gmra.mrb[4].mxu1 %vm456_vm5, %v447_v42  ;;  %v7554_v42 = vpack.c.bf16 %v682_v33, %v681_v32  ;;  %v671_v32 = vld [vmem:[#allocation20 + $0x40] sm:$0xff]  ;;  %v672_v33 = vld [vmem:[#allocation20 + $0x48] sm:$0xff]  ;;  %v7643_v57 = vpack.c.bf16 %v710_v28, %v709_v41 }
 0x212   :  { %5772 = vmatprep.mubr.msk.f32.mxu0 %vm737_vm7, %v7482_v43  ;;  %890 = vmatprep.mubr.f32.mxu1 %v8237_v1  ;;  %v7597_v50 = vpack.c.bf16 %v672_v33, %v671_v32  ;;  %v7618_v33 = vpack.c.bf16 %v722_v21, %v721_v11  ;;  %8298 = vst [vmem:[#allocation51_spill] sm:$0xff] %v7625_v46  ;;  %8299 = vst [vmem:[#allocation52_spill] sm:$0xff] %v7628_v55  ;;  %v725_v11 = vld [vmem:[#allocation20 + $0x1f0] sm:$0xff] }
 0x213   :  { %6062 = vmatpush1.bf16.msra.mxu1 %v7512_v3  ;;  %8304 = vst [vmem:[#allocation57_spill] sm:$0xff] %v7643_v57 }
 0x214   :  { %6072 = vmatprep.subr.bf16.mxu1 %v7520_v9  ;;  %8296 = vst [vmem:[#allocation49_spill] sm:$0xff] %v7618_v33 }
 0x215   :  { %5773 = vmatmul.mubr.msk.f32.vlgmr.msra.gmra.mrb[6].mxu0 %vm737_vm7, %v7491_v44 }
 0x216   :  { %967 = vmatprep.mubr.f32.mxu0 %v8237_v1  ;;  %6066 = vmatpush1.bf16.msra.mxu0 %v7503_v56 }
 0x217   :  { %6068 = vmatprep.subr.bf16.mxu0 %v7510_v2 }
 0x21a   :  { %6070 = vmatpush1.bf16.msra.mxu0 %v7515_v6 }
 0x21b   :  { %6080 = vmatprep.subr.bf16.mxu0 %v7523_v12 }
 0x2e0   :  { %v7526_v13 = vpop.f32.mrb[2].mxu0  ;;  %v7528_v14 = vpop.f32.mrb[2].mxu1 }
 0x2e1   :  { %8287 = vst [vmem:[#allocation40_spill] sm:$0xff] %v7526_v13  ;;  %8288 = vst [vmem:[#allocation41_spill] sm:$0xff] %v7528_v14  ;;  %v7530_v15 = vpop.f32.mrb[3].mxu0  ;;  %v7532_v16 = vpop.f32.mrb[3].mxu1 }
 0x2e2   :  { %8289 = vst [vmem:[#allocation42_spill] sm:$0xff] %v7530_v15  ;;  %8290 = vst [vmem:[#allocation43_spill] sm:$0xff] %v7532_v16 }
 0x2e4   :  { %v7534_v17 = vpop.f32.mrb[4].mxu0  ;;  %v7536_v18 = vpop.f32.mrb[4].mxu1 }
 0x2e5   :  { %8291 = vst [vmem:[#allocation44_spill] sm:$0xff] %v7534_v17  ;;  %8292 = vst [vmem:[#allocation45_spill] sm:$0xff] %v7536_v18  ;;  %v7538_v19 = vpop.f32.mrb[5].mxu0  ;;  %v7540_v20 = vpop.f32.mrb[5].mxu1 }
 0x2e6   :  { %8293 = vst [vmem:[#allocation46_spill] sm:$0xff] %v7538_v19  ;;  %8294 = vst [vmem:[#allocation47_spill] sm:$0xff] %v7540_v20 }
 0x2e8   :  { %v5774_v25 = vpop.f32.mrb[6].mxu0 }
 0x2e9   :  { %v810_v29 = vpop.f32.mrb[7].mxu0 }
 0x2ea   :  { %5083 = vmatmul.mubr.msk.f32.vlgmr.msra.gmra.mrb[6].mxu1 %vm819_vm9, %v810_v29  ;;  %5085 = vmatmul.mubr.msk.f32.vlgmr.msra.gmra.mrb[8].mxu0 %vm819_vm9, %v810_v29 }
 0x2eb   :  { %6074 = vmatpush3.bf16.msra.mxu1 %v7520_v9  ;;  %896 = vmatprep.mubr.f32.mxu1 %v8237_v1 }
 0x2ec   :  { %973 = vmatprep.mubr.f32.mxu0 %v8237_v1  ;;  %6076 = vmatprep.subr.bf16.mxu1 %v7542_v26 }
 0x2ed   :  { %6082 = vmatpush3.bf16.msra.mxu0 %v7544_v31 }
 0x2ee   :  { %5084 = vmatmul.mubr.msk.f32.gmra.mrb[8].mxu1 %vm819_vm9, %v5774_v25  ;;  %5086 = vmatmul.mubr.msk.f32.gmra.mrb[10].mxu0 %vm819_vm9, %v5774_v25 }
 0x2ef   :  { %6078 = vmatpush3.bf16.msra.mxu1 %v7542_v26  ;;  %5783 = vmatprep.mubr.msk.f32.mxu1 %vm819_vm9, %v810_v29  ;;  %v7585_v29 = vpack.c.bf16 %v670_v8, %v669_v7  ;;  %v703_v7 = vld [vmem:[#allocation20 + $0x140] sm:$0xff]  ;;  %v704_v8 = vld [vmem:[#allocation20 + $0x148] sm:$0xff] }
 0x2f0   :  { %6112 = vmatprep.subr.bf16.mxu1 %v7552_v39  ;;  %6084 = vmatprep.subr.bf16.mxu0 %v7554_v42  ;;  %v7615_v32 = vpack.c.bf16 %v704_v8, %v703_v7  ;;  %v693_v7 = vld [vmem:[#allocation20 + $0xf0] sm:$0xff]  ;;  %v694_v8 = vld [vmem:[#allocation20 + $0xf8] sm:$0xff] }
 0x2f1   :  { %6086 = vmatpush3.bf16.msra.mxu0 %v7557_v47  ;;  %v7636_v21 = vpack.c.bf16 %v694_v8, %v693_v7  ;;  %v733_v7 = vld [vmem:[#allocation25 + $0x8] sm:$0xff] }
 0x2f2   :  { %5784 = vmatmul.mubr.msk.f32.vlgmr.msra.gmra.mrb[10].mxu1 %vm819_vm9, %v5774_v25  ;;  %6088 = vmatprep.subr.bf16.mxu0 %v7561_v49  ;;  %v717_v25 = vld [vmem:[#allocation20 + $0x1b0] sm:$0xff]  ;;  %8295 = vst [vmem:[#allocation48_spill] sm:$0xff] %v7615_v32 }
 0x2f3   :  { %6114 = vmatpush3.bf16.msra.mxu1 %v7565_v54  ;;  %v7594_v38 = vpack.c.bf16 %v718_v27, %v717_v25  ;;  %v675_v25 = vld [vmem:[#allocation20 + $0x60] sm:$0xff]  ;;  %v676_v27 = vld [vmem:[#allocation20 + $0x68] sm:$0xff]  ;;  %8301 = vst [vmem:[#allocation54_spill] sm:$0xff] %v7636_v21 }
 0x2f4   :  { %6116 = vmatprep.subr.bf16.mxu1 %v7569_v58  ;;  %v7621_v45 = vpack.c.bf16 %v676_v27, %v675_v25  ;;  %v726_v25 = vld [vmem:[#allocation20 + $0x1f8] sm:$0xff]  ;;  %v677_v27 = vld [vmem:[#allocation20 + $0x70] sm:$0xff] }
 0x2f5   :  { %6090 = vmatpush3.bf16.msra.mxu0 %v7572_v4  ;;  %v7638_v36 = vpack.c.bf16 %v726_v25, %v725_v11  ;;  %v7640_v40 = vpack.c.bf16 %v678_v35, %v677_v27 }
 0x2f6   :  { %6092 = vmatprep.subr.bf16.mxu0 %v7576_v5  ;;  %8297 = vst [vmem:[#allocation50_spill] sm:$0xff] %v7621_v45 }
 0x2f7   :  { %6118 = vmatpush3.bf16.msra.mxu1 %v7579_v10  ;;  %8302 = vst [vmem:[#allocation55_spill] sm:$0xff] %v7638_v36  ;;  %8303 = vst [vmem:[#allocation56_spill] sm:$0xff] %v7640_v40 }
 0x2f8   :  { %6120 = vmatprep.subr.bf16.mxu1 %v7582_v22 }
 0x2f9   :  { %6094 = vmatpush3.bf16.msra.mxu0 %v7585_v29 }
 0x2fa   :  { %6096 = vmatprep.subr.bf16.mxu0 %v7588_v30 }
 0x2fb   :  { %6122 = vmatpush3.bf16.msra.mxu1 %v7591_v34 }
 0x2fc   :  { %6124 = vmatprep.subr.bf16.mxu1 %v7594_v38 }
 0x2fd   :  { %6098 = vmatpush3.bf16.msra.mxu0 %v7597_v50 }
 0x2fe   :  { %6100 = vmatprep.subr.bf16.mxu0 %v7600_v51 }
 0x2ff   :  { %6126 = vmatpush3.bf16.msra.mxu1 %v7603_v59 }
 0x300   :  { %6128 = vmatprep.subr.bf16.mxu1 %v7606_v63 }
 0x301   :  { %6102 = vmatpush3.bf16.msra.mxu0 %v7609_v23 }
 0x302   :  { %6104 = vmatprep.subr.bf16.mxu0 %v7612_v24 }
 0x303   :  { %6130 = vmatpush3.bf16.msra.mxu1 %v7615_v32 }
 0x304   :  { %6132 = vmatprep.subr.bf16.mxu1 %v7618_v33 }
 0x305   :  { %6106 = vmatpush3.bf16.msra.mxu0 %v7621_v45 }
 0x306   :  { %6108 = vmatprep.subr.bf16.mxu0 %v7636_v21  ;;  %v729_v21 = vld [vmem:[#allocation23 + $0x8] sm:$0xff] }
 0x307   :  { %6134 = vmatpush3.bf16.msra.mxu1 %v7625_v46  ;;  %v728_v46 = vld [vmem:[#allocation23] sm:$0xff] }
 0x308   :  { %6136 = vmatprep.subr.bf16.mxu1 %v7628_v55 }
 0x309   :  { %6110 = vmatpush3.bf16.msra.mxu0 %v7640_v40 }
 0x30a   :  { %6143 = vmatprep.subr.bf16.mxu0 %v8247_v0 }
 0x30b   :  { %6138 = vmatpush3.bf16.msra.mxu1 %v7632_v62  ;;  %v735_v62 = vld [vmem:[#allocation25 + $0x18] sm:$0xff] }
 0x30c   :  { %6140 = vmatprep.subr.bf16.mxu1 %v7638_v36  ;;  %v7654_v36 = vpack.c.bf16 %v733_v7, %v732_v61  ;;  %v8307_v7 = vmov 0.0|0.0  }
 0x30e   :  { %8305 = vst [vmem:[#allocation58_spill] sm:$0xff] %v7654_v36 }
 0x30f   :  { %6142 = vmatpush3.bf16.msra.mxu1 %v7643_v57  ;;  %v734_v57 = vld [vmem:[#allocation25 + $0x10] sm:$0xff] }
 0x310   :  { %6146 = vmatprep.subr.bf16.mxu1 %v8247_v0  ;;  %v7661_v61 = vpack.c.bf16 %v735_v62, %v734_v57 }
 0x312   :  { %8306 = vst [vmem:[#allocation59_spill] sm:$0xff] %v7661_v61 }
 0x3bd   :  { %v892_v8 = vpop.f32.mrb[6].mxu1  ;;  %v969_v11 = vpop.f32.mrb[8].mxu0 }
 0x3be   :  { %v980_v25 = vmul.f32 %v892_v8, %v7526_v13  ;;  %v982_v27 = vmul.f32 %v969_v11, %v7528_v14  ;;  %v894_v28 = vpop.f32.mrb[7].mxu1  ;;  %v971_v35 = vpop.f32.mrb[9].mxu0 }
 0x3bf   :  { %v981_v41 = vmul.f32 %v894_v28, %v7530_v15  ;;  %v983_v1 = vmul.f32 %v971_v35, %v7532_v16 }
 0x3c1   :  { %v898_v40 = vpop.f32.mrb[8].mxu1  ;;  %v975_v0 = vpop.f32.mrb[10].mxu0  ;;  %1127 = vmatprep.mubr.f32.mxu0 %v981_v41  ;;  %1202 = vmatprep.mubr.f32.mxu1 %v983_v1 }
 0x3c2   :  { %v984_v55 = vmul.f32 %v898_v40, %v7534_v17  ;;  %v986_v8 = vmul.f32 %v975_v0, %v7536_v18  ;;  %v900_v13 = vpop.f32.mrb[9].mxu1  ;;  %v977_v11 = vpop.f32.mrb[11].mxu0  ;;  %1128 = vmatmul.mubr.f32.vlgmr.msra.gmra.mrb[12].mxu0 %v980_v25  ;;  %1203 = vmatmul.mubr.f32.vlgmr.msra.gmra.mrb[12].mxu1 %v982_v27  ;;  %v8308_v0 = vmov 0.0   ;;  %v5079_v17 = vld [vmem:[#allocation8] ss:$0 sm:$0xff] }
 0x3c3   :  { %v985_v28 = vmul.f32 %v900_v13, %v7538_v19  ;;  %v987_v35 = vmul.f32 %v977_v11, %v7540_v20  ;;  %6148 = vmatpush3.bf16.msra.mxu1 %v7654_v36  ;;  %v8309_v19 = vlaneseq }
 0x3c4   :  { %6149 = vmatprep.subr.bf16.mxu1 %v8307_v7 }
 0x3c5   :  { %v5785_v41 = vpop.f32.mrb[10].mxu1  ;;  %1132 = vmatprep.mubr.f32.mxu0 %v985_v28  ;;  %1207 = vmatprep.mubr.f32.mxu1 %v987_v35  ;;  %v634_v18 = vshrl.u32 %v8309_v19, 7 }
 0x3c6   :  { %v1054_v1 = vpop.f32.mrb[11].mxu1  ;;  %1133 = vmatmul.mubr.f32.gmra.mrb[14].mxu0 %v984_v55  ;;  %1208 = vmatmul.mubr.f32.gmra.mrb[14].mxu1 %v986_v8 }
 0x3c7   :  { %6151 = vmatpush3.bf16.msra.mxu1 %v7661_v61  ;;  %5801 = vmatprep.mubr.msk.f32.mxu1 %vm7154_vm0, %v8308_v0  ;;  %vm640_vm10 = vcmp.eq.s32.totalorder %v634_v18, %v5079_v17  ;;  %v7690_v17 = vld [vmem:[#allocation22] ss:$0 sm:$0xff] }
 0x3c8   :  { %5790 = vmatprep.mubr.msk.f32.mxu0 %vm7154_vm0, %v8308_v0 }
 0x3ca   :  { %5802 = vmatmul.mubr.msk.f32.vlgmr.msra.gmra.mrb[16].mxu1 %vm819_vm9, %v7474_v37 }
 0x3cb   :  { %5817 = vmatprep.mubr.msk.f32.mxu1 %vm737_vm7, %v7482_v43 }
 0x495   :  { %v5205_v13 = vpop.f32.mrb[12].mxu0  ;;  %v5243_v62 = vpop.f32.mrb[12].mxu1 }
 0x496   :  { %v5206_v40 = vpop.f32.mrb[13].mxu0  ;;  %v5244_v57 = vpop.f32.mrb[13].mxu1 }
 0x497   :  { %v5207_v55 = vadd.f32 %v5206_v40, %v5205_v13  ;;  %v5245_v25 = vadd.f32 %v5244_v57, %v5243_v62  ;;  %v7677_v62 = vpack.c.bf16 %v729_v21, %v728_v46  ;;  %v7699_v46 = vld [vmem:[#allocation26] ss:$0 sm:$0xff] }
 0x499   :  { %v1130_v27 = vadd.f32 %v5207_v55, %v1054_v1  ;;  %v5208_v8 = vpop.f32.mrb[14].mxu0  ;;  %v5246_v11 = vpop.f32.mrb[14].mxu1  ;;  %v7675_v1 = vsel %vm640_vm10, 1.0, %v8308_v0 }
 0x49a   :  { %v5209_v28 = vpop.f32.mrb[15].mxu0  ;;  %v5247_v35 = vpop.f32.mrb[15].mxu1 }
 0x49b   :  { %v1205_v61 = vadd.f32 %v5245_v25, %v1130_v27  ;;  %v5210_v36 = vadd.f32 %v5209_v28, %v5208_v8  ;;  %v5248_v20 = vadd.f32 %v5247_v35, %v5246_v11 }
 0x49d   :  { %v1135_v16 = vadd.f32 %v5785_v41, %v5210_v36  ;;  %v1361_v15 = vpop.f32.mrb[16].mxu1 }
 0x49e   :  { %v5803_v43 = vpop.f32.mrb[17].mxu1 }
 0x49f   :  { %v1210_v14 = vadd.f32 %v5248_v20, %v1135_v16  ;;  %v730_v43 = vld [vmem:[#allocation23 + $0x10] sm:$0xff] }
 0x4a1   :  { %v6144_v13 = vpack.c.bf16 %v1210_v14, %v1205_v61  ;;  %v731_v14 = vld [vmem:[#allocation23 + $0x18] sm:$0xff] }
 0x4a2   :  { %v7686_v16 = vpack.c.bf16 %v731_v14, %v730_v43 }
 0x4a3   :  { %6145 = vmatpush3.bf16.msra.mxu0 %v6144_v13 }
 0x4a4   :  { %6152 = vmatprep.subr.bf16.mxu0 %v8307_v7 }
 0x4a6   :  { %5791 = vmatmul.mubr.msk.f32.vlgmr.msra.gmra.mrb[16].mxu0 %vm456_vm5, %v7675_v1 }
 0x4a7   :  { %6154 = vmatpush3.bf16.msra.mxu0 %v7677_v62  ;;  %5812 = vmatprep.mubr.msk.f32.mxu0 %vm7154_vm0, %v8308_v0 }
 0x4a8   :  { %6155 = vmatprep.subr.bf16.mxu0 %v8307_v7 }
 0x4ab   :  { %6157 = vmatpush3.bf16.msra.mxu0 %v7686_v16 }
 0x4ac   :  { %6167 = vmatprep.subr.bf16.mxu0 %v7498_v52 }
 0x579   :  { %v1288_v18 = vpop.f32.mrb[16].mxu0 }
 0x57a   :  { %v1289_v19 = vadd.f32 %v7690_v17, %v1288_v18  ;;  %v5792_v20 = vpop.f32.mrb[17].mxu0 }
 0x57c   :  { %5813 = vmatmul.mubr.msk.f32.vlgmr.msra.gmra.mrb[18].mxu0 %vm819_vm9, %v1289_v19 }
 0x57d   :  { %6169 = vmatpush1.bf16.msra.mxu0 %v7503_v56  ;;  %1699 = vmatprep.mubr.f32.mxu0 %v8308_v0 }
 0x57e   :  { %6171 = vmatprep.subr.bf16.mxu0 %v7510_v2 }
 0x581   :  { %6173 = vmatpush1.bf16.msra.mxu0 %v7515_v6 }
 0x582   :  { %6183 = vmatprep.subr.bf16.mxu0 %v7523_v12 }
 0x64f   :  { %v1434_v21 = vpop.f32.mrb[18].mxu0 }
 0x650   :  { %v1435_v36 = vadd.f32 %v1434_v21, %v1361_v15  ;;  %v5814_v61 = vpop.f32.mrb[19].mxu0 }
 0x651   :  { %v8311_v61 = vld [vmem:[#allocation51_spill] sm:$0xff] }
 0x652   :  { %v1444_v41 = vadd.f32 %v7699_v46, %v1435_v36  ;;  %v8310_v36 = vld [vmem:[#allocation54_spill] sm:$0xff] }
 0x654   :  { %1452 = vrot.lane.b32.xlu1 %v1444_v41, %s7148_s20  ;;  %v5094_v40 = vmul.f32 -1.442695, %v1444_v41 }
 0x656   :  { %6701 = vpow2.f32 %v5094_v40  ;;  %v8313_v40 = vld [vmem:[#allocation56_spill] sm:$0xff] }
 0x660   :  { %v6702_v57 = vpop.eup %6701 }
 0x661   :  { %v1448_v55 = vadd.f32 1.0, %v6702_v57  ;;  %v8314_v57 = vld [vmem:[#allocation53_spill] sm:$0xff] }
 0x663   :  { %6703 = vrcp.f32 %v1448_v55  ;;  %v8315_v55 = vld [vmem:[#allocation55_spill] sm:$0xff] }
 0x66d   :  { %v6704_v25 = vpop.eup %6703 }
 0x66e   :  { %v1462_v13 = vsub.f32 1.0, %v6704_v25 }
 0x6c6   :  { %v1453_v27 = vpop.permute.xlu1 %1452 }
 0x6c7   :  { %v1455_v8 = vmul.f32 %v6704_v25, %v1453_v27 }
 0x6c9   :  { %1457 = vrot.lane.b32.xlu1 %v1455_v8, %s7157_s15 }
 0x6cd   :  { %1468 = vrot.lane.b32.xlu1 %v7474_v37, %s7148_s20 }
 0x73b   :  { %v1458_v15 = vpop.permute.xlu1 %1457 }
 0x73c   :  { %v1460_v11 = vadd.f32 %v1458_v15, %v1444_v41  ;;  %v8312_v41 = vld [vmem:[#allocation52_spill] sm:$0xff] }
 0x73d   :  { %v8317_v15 = vld [vmem:[#allocation40_spill] sm:$0xff] }
 0x73e   :  { %6705 = vtanh.f32 %v1460_v11 }
 0x73f   :  { %v1469_v35 = vpop.permute.xlu1 %1468 }
 0x740   :  { %v1471_v14 = vmul.f32 %v6704_v25, %v1469_v35  ;;  %v8316_v25 = vld [vmem:[#allocation57_spill] sm:$0xff] }
 0x748   :  { %v6706_v28 = vpop.eup %6705 }
 0x749   :  { %1464 = vrot.lane.b32.xlu0 %v6706_v28, %s7158_s17  ;;  %v8318_v28 = vld [vmem:[#allocation41_spill] sm:$0xff] }
 0x7bb   :  { %v1465_v43 = vpop.permute.xlu0 %1464 }
 0x7bc   :  { %v1467_v18 = vmul.f32 %v1465_v43, %v1462_v13 }
 0x7be   :  { %v7707_v19 = vadd.f32 %v1471_v14, %v1467_v18  ;;  %v8319_v14 = vld [vmem:[#allocation42_spill] sm:$0xff] }
 0x7c0   :  { %1474 = vrot.lane.b32.xlu0 %v7707_v19, %s7158_s17 }
 0x832   :  { %v7711_v20 = vpop.permute.xlu0 %1474 }
 0x833   :  { %5815 = vmatprep.subr.mxu1 %v7711_v20 }
 0x834   :  { %5816 = vmatpush3.msra.mxu1 %v7711_v20 }
 0x835   :  { %5818 = vmatmul.mubr.msk.f32.vlgmr.msra.gmra.mrb[18].mxu1 %vm737_vm7, %v7491_v44  ;;  %6159 = vmatprep.subr.bf16.mxu1 %v7496_v48 }
 0x836   :  { %6161 = vmatpush1.bf16.msra.mxu1 %v7500_v53  ;;  %1622 = vmatprep.mubr.f32.mxu1 %v8308_v0 }
 0x837   :  { %6163 = vmatprep.subr.bf16.mxu1 %v7508_v60 }
 0x83a   :  { %6165 = vmatpush1.bf16.msra.mxu1 %v7512_v3 }
 0x83b   :  { %6175 = vmatprep.subr.bf16.mxu1 %v7520_v9 }
 0x908   :  { %v5819_v37 = vpop.f32.mrb[18].mxu1 }
 0x909   :  { %v1543_v21 = vpop.f32.mrb[19].mxu1 }
 0x90a   :  { %5097 = vmatmul.mubr.msk.f32.vlgmr.msra.gmra.mrb[20].mxu1 %vm819_vm9, %v1543_v21  ;;  %5099 = vmatmul.mubr.msk.f32.vlgmr.msra.gmra.mrb[20].mxu0 %vm819_vm9, %v1543_v21 }
 0x90b   :  { %6177 = vmatpush3.bf16.msra.mxu1 %v7520_v9  ;;  %1628 = vmatprep.mubr.f32.mxu1 %v8308_v0 }
 0x90c   :  { %1705 = vmatprep.mubr.f32.mxu0 %v8308_v0  ;;  %6179 = vmatprep.subr.bf16.mxu1 %v7542_v26 }
 0x90d   :  { %6185 = vmatpush3.bf16.msra.mxu0 %v7544_v31 }
 0x90e   :  { %5098 = vmatmul.mubr.msk.f32.gmra.mrb[22].mxu1 %vm819_vm9, %v5819_v37  ;;  %5100 = vmatmul.mubr.msk.f32.gmra.mrb[22].mxu0 %vm819_vm9, %v5819_v37 }
 0x90f   :  { %6181 = vmatpush3.bf16.msra.mxu1 %v7542_v26  ;;  %5828 = vmatprep.mubr.msk.f32.mxu1 %vm819_vm9, %v1543_v21 }
 0x910   :  { %6215 = vmatprep.subr.bf16.mxu1 %v7552_v39  ;;  %6187 = vmatprep.subr.bf16.mxu0 %v7554_v42 }
 0x911   :  { %6189 = vmatpush3.bf16.msra.mxu0 %v7557_v47 }
 0x912   :  { %5829 = vmatmul.mubr.msk.f32.vlgmr.msra.gmra.mrb[24].mxu1 %vm819_vm9, %v5819_v37  ;;  %6191 = vmatprep.subr.bf16.mxu0 %v7561_v49  ;;  %v8320_v37 = vld [vmem:[#allocation43_spill] sm:$0xff] }
 0x913   :  { %6217 = vmatpush3.bf16.msra.mxu1 %v7565_v54 }
 0x914   :  { %6219 = vmatprep.subr.bf16.mxu1 %v7569_v58 }
 0x915   :  { %6193 = vmatpush3.bf16.msra.mxu0 %v7572_v4 }
 0x916   :  { %6195 = vmatprep.subr.bf16.mxu0 %v7576_v5 }
 0x917   :  { %6221 = vmatpush3.bf16.msra.mxu1 %v7579_v10 }
 0x918   :  { %6223 = vmatprep.subr.bf16.mxu1 %v7582_v22 }
 0x919   :  { %6197 = vmatpush3.bf16.msra.mxu0 %v7585_v29 }
 0x91a   :  { %6199 = vmatprep.subr.bf16.mxu0 %v7588_v30 }
 0x91b   :  { %6225 = vmatpush3.bf16.msra.mxu1 %v7591_v34 }
 0x91c   :  { %6227 = vmatprep.subr.bf16.mxu1 %v7594_v38 }
 0x91d   :  { %6201 = vmatpush3.bf16.msra.mxu0 %v7597_v50 }
 0x91e   :  { %6203 = vmatprep.subr.bf16.mxu0 %v7600_v51 }
 0x91f   :  { %6229 = vmatpush3.bf16.msra.mxu1 %v7603_v59 }
 0x920   :  { %6231 = vmatprep.subr.bf16.mxu1 %v7606_v63 }
 0x921   :  { %6205 = vmatpush3.bf16.msra.mxu0 %v7609_v23 }
 0x922   :  { %6207 = vmatprep.subr.bf16.mxu0 %v7612_v24 }
 0x923   :  { %6233 = vmatpush3.bf16.msra.mxu1 %v7615_v32 }
 0x924   :  { %6235 = vmatprep.subr.bf16.mxu1 %v7618_v33  ;;  %v8325_v33 = vld [vmem:[#allocation58_spill] sm:$0xff] }
 0x925   :  { %6209 = vmatpush3.bf16.msra.mxu0 %v7621_v45 }
 0x926   :  { %6211 = vmatprep.subr.bf16.mxu0 %v8310_v36 }
 0x927   :  { %6237 = vmatpush3.bf16.msra.mxu1 %v8311_v61 }
 0x928   :  { %6239 = vmatprep.subr.bf16.mxu1 %v8312_v41  ;;  %v8322_v41 = vld [vmem:[#allocation45_spill] sm:$0xff] }
 0x929   :  { %6213 = vmatpush3.bf16.msra.mxu0 %v8313_v40 }
 0x92a   :  { %6246 = vmatprep.subr.bf16.mxu0 %v8307_v7 }
 0x92b   :  { %6241 = vmatpush3.bf16.msra.mxu1 %v8314_v57 }
 0x92c   :  { %6243 = vmatprep.subr.bf16.mxu1 %v8315_v55  ;;  %v8321_v55 = vld [vmem:[#allocation44_spill] sm:$0xff] }
 0x92f   :  { %6245 = vmatpush3.bf16.msra.mxu1 %v8316_v25 }
 0x930   :  { %6249 = vmatprep.subr.bf16.mxu1 %v8307_v7 }
 0x9dd   :  { %v1624_v27 = vpop.f32.mrb[20].mxu1  ;;  %v1701_v8 = vpop.f32.mrb[20].mxu0 }
 0x9de   :  { %v1712_v11 = vmul.f32 %v1624_v27, %v8317_v15  ;;  %v1714_v35 = vmul.f32 %v1701_v8, %v8318_v28  ;;  %v1626_v13 = vpop.f32.mrb[21].mxu1  ;;  %v1703_v43 = vpop.f32.mrb[21].mxu0  ;;  %v8323_v27 = vld [vmem:[#allocation46_spill] sm:$0xff]  ;;  %v8324_v28 = vld [vmem:[#allocation47_spill] sm:$0xff] }
 0x9df   :  { %v1713_v18 = vmul.f32 %v1626_v13, %v8319_v14  ;;  %v1715_v21 = vmul.f32 %v1703_v43, %v8320_v37 }
 0x9e1   :  { %v1630_v40 = vpop.f32.mrb[22].mxu1  ;;  %v1707_v57 = vpop.f32.mrb[22].mxu0  ;;  %1859 = vmatprep.mubr.f32.mxu0 %v1713_v18  ;;  %1934 = vmatprep.mubr.f32.mxu1 %v1715_v21 }
 0x9e2   :  { %v1716_v25 = vmul.f32 %v1630_v40, %v8321_v55  ;;  %v1718_v61 = vmul.f32 %v1707_v57, %v8322_v41  ;;  %v1632_v36 = vpop.f32.mrb[23].mxu1  ;;  %v1709_v45 = vpop.f32.mrb[23].mxu0  ;;  %1860 = vmatmul.mubr.f32.vlgmr.msra.gmra.mrb[24].mxu0 %v1712_v11  ;;  %1935 = vmatmul.mubr.f32.vlgmr.msra.gmra.mrb[26].mxu1 %v1714_v35  ;;  %v8326_v40 = vld [vmem:[#allocation59_spill] sm:$0xff] }
 0x9e3   :  { %v1717_v8 = vmul.f32 %v1632_v36, %v8323_v27  ;;  %v1719_v15 = vmul.f32 %v1709_v45, %v8324_v28  ;;  %6251 = vmatpush3.bf16.msra.mxu1 %v8325_v33  ;;  %v8327_v45 = vld [vmem:[#allocation39_spill] sm:$0xff] }
 0x9e4   :  { %6252 = vmatprep.subr.bf16.mxu1 %v8307_v7 }
 0x9e5   :  { %v5830_v13 = vpop.f32.mrb[24].mxu1  ;;  %1864 = vmatprep.mubr.f32.mxu0 %v1717_v8  ;;  %1939 = vmatprep.mubr.f32.mxu1 %v1719_v15 }
 0x9e6   :  { %v1786_v43 = vpop.f32.mrb[25].mxu1  ;;  %1865 = vmatmul.mubr.f32.gmra.mrb[26].mxu0 %v1716_v25  ;;  %1940 = vmatmul.mubr.f32.gmra.mrb[28].mxu1 %v1718_v61 }
 0x9e7   :  { %6254 = vmatpush3.bf16.msra.mxu1 %v8326_v40  ;;  %5846 = vmatprep.mubr.msk.f32.mxu1 %vm7154_vm0, %v8308_v0 }
 0x9e8   :  { %5835 = vmatprep.mubr.msk.f32.mxu0 %vm7154_vm0, %v8308_v0 }
 0x9ea   :  { %5847 = vmatmul.mubr.msk.f32.vlgmr.msra.gmra.mrb[30].mxu1 %vm819_vm9, %v7711_v20 }
 0x9eb   :  { %5862 = vmatprep.mubr.msk.f32.mxu1 %vm737_vm7, %v8327_v45 }
 0xab5   :  { %v5303_v36 = vpop.f32.mrb[24].mxu0  ;;  %v5341_v57 = vpop.f32.mrb[26].mxu1 }
 0xab6   :  { %v5304_v15 = vpop.f32.mrb[25].mxu0  ;;  %v5342_v11 = vpop.f32.mrb[27].mxu1 }
 0xab7   :  { %v5305_v25 = vadd.f32 %v5304_v15, %v5303_v36  ;;  %v5343_v61 = vadd.f32 %v5342_v11, %v5341_v57 }
 0xab9   :  { %v1862_v35 = vadd.f32 %v5305_v25, %v1786_v43  ;;  %v5306_v18 = vpop.f32.mrb[26].mxu0  ;;  %v5344_v21 = vpop.f32.mrb[28].mxu1 }
 0xaba   :  { %v5307_v8 = vpop.f32.mrb[27].mxu0  ;;  %v5345_v40 = vpop.f32.mrb[29].mxu1 }
 0xabb   :  { %v1937_v33 = vadd.f32 %v5343_v61, %v1862_v35  ;;  %v5308_v28 = vadd.f32 %v5307_v8, %v5306_v18  ;;  %v5346_v27 = vadd.f32 %v5345_v40, %v5344_v21 }
 0xabd   :  { %v1867_v41 = vadd.f32 %v5830_v13, %v5308_v28  ;;  %v2083_v55 = vpop.f32.mrb[30].mxu1 }
 0xabe   :  { %v5848_v20 = vpop.f32.mrb[31].mxu1 }
 0xabf   :  { %v1942_v37 = vadd.f32 %v5346_v27, %v1867_v41 }
 0xac1   :  { %v6247_v14 = vpack.c.bf16 %v1942_v37, %v1937_v33 }
 0xac3   :  { %6248 = vmatpush3.bf16.msra.mxu0 %v6247_v14 }
 0xac4   :  { %6255 = vmatprep.subr.bf16.mxu0 %v8307_v7 }
 0xac6   :  { %5836 = vmatmul.mubr.msk.f32.vlgmr.msra.gmra.mrb[28].mxu0 %vm456_vm5, %v7675_v1 }
 0xac7   :  { %6257 = vmatpush3.bf16.msra.mxu0 %v7677_v62  ;;  %5857 = vmatprep.mubr.msk.f32.mxu0 %vm7154_vm0, %v8308_v0 }
 0xac8   :  { %6258 = vmatprep.subr.bf16.mxu0 %v8307_v7 }
 0xacb   :  { %6260 = vmatpush3.bf16.msra.mxu0 %v7686_v16 }
 0xacc   :  { %6262 = vmatprep.subr.bf16.mxu0 %v7496_v48 }
 0xb99   :  { %v2011_v28 = vpop.f32.mrb[28].mxu0 }
 0xb9a   :  { %v2012_v33 = vadd.f32 %v7690_v17, %v2011_v28  ;;  %v5837_v41 = vpop.f32.mrb[29].mxu0 }
 0xb9b   :  { %v8328_v41 = vld [vmem:[#allocation49_spill] sm:$0xff] }
 0xb9c   :  { %5858 = vmatmul.mubr.msk.f32.vlgmr.msra.gmra.mrb[30].mxu0 %vm819_vm9, %v2012_v33 }
 0xb9d   :  { %6264 = vmatpush1.bf16.msra.mxu0 %v7500_v53  ;;  %2335 = vmatprep.mubr.f32.mxu0 %v8308_v0 }
 0xb9e   :  { %6266 = vmatprep.subr.bf16.mxu0 %v7508_v60 }
 0xba1   :  { %6268 = vmatpush1.bf16.msra.mxu0 %v7512_v3 }
 0xba2   :  { %6278 = vmatprep.subr.bf16.mxu0 %v7520_v9 }
 0xc6f   :  { %v2156_v14 = vpop.f32.mrb[30].mxu0 }
 0xc70   :  { %v2157_v37 = vadd.f32 %v2156_v14, %v2083_v55  ;;  %v5859_v27 = vpop.f32.mrb[31].mxu0  ;;  %v8329_v14 = vld [vmem:[#allocation50_spill] sm:$0xff] }
 0xc71   :  { %v8331_v27 = vld [vmem:[#allocation51_spill] sm:$0xff] }
 0xc72   :  { %v2160_v13 = vadd.f32 %v7699_v46, %v2157_v37  ;;  %v8330_v37 = vld [vmem:[#allocation54_spill] sm:$0xff] }
 0xc74   :  { %2168 = vrot.lane.b32.xlu1 %v2160_v13, %s7148_s20  ;;  %v5106_v43 = vmul.f32 -1.442695, %v2160_v13 }
 0xc76   :  { %6707 = vpow2.f32 %v5106_v43  ;;  %v8333_v43 = vld [vmem:[#allocation56_spill] sm:$0xff] }
 0xc80   :  { %v6708_v40 = vpop.eup %6707 }
 0xc81   :  { %v2164_v36 = vadd.f32 1.0, %v6708_v40  ;;  %v8334_v40 = vld [vmem:[#allocation53_spill] sm:$0xff] }
 0xc83   :  { %6709 = vrcp.f32 %v2164_v36  ;;  %v8335_v36 = vld [vmem:[#allocation55_spill] sm:$0xff] }
 0xc8d   :  { %v6710_v57 = vpop.eup %6709 }
 0xc8e   :  { %v2178_v55 = vsub.f32 1.0, %v6710_v57  ;;  %v2184_v21 = vmul.f32 %v6710_v57, %v7707_v19 }
 0xce6   :  { %v2169_v15 = vpop.permute.xlu1 %2168 }
 0xce7   :  { %v2171_v11 = vmul.f32 %v6710_v57, %v2169_v15  ;;  %v8336_v57 = vld [vmem:[#allocation57_spill] sm:$0xff] }
 0xce9   :  { %2173 = vrot.lane.b32.xlu0 %v2171_v11, %s7157_s15 }
 0xd5b   :  { %v2174_v25 = vpop.permute.xlu0 %2173 }
 0xd5c   :  { %v2176_v61 = vadd.f32 %v2174_v25, %v2160_v13  ;;  %v8332_v13 = vld [vmem:[#allocation52_spill] sm:$0xff] }
 0xd5d   :  { %v8337_v25 = vld [vmem:[#allocation40_spill] sm:$0xff] }
 0xd5e   :  { %6711 = vtanh.f32 %v2176_v61 }
 0xd68   :  { %v6712_v35 = vpop.eup %6711 }
 0xd69   :  { %2180 = vrot.lane.b32.xlu1 %v6712_v35, %s7158_s17  ;;  %v8338_v35 = vld [vmem:[#allocation41_spill] sm:$0xff] }
 0xddb   :  { %v2181_v18 = vpop.permute.xlu1 %2180 }
 0xddc   :  { %v2183_v8 = vmul.f32 %v2181_v18, %v2178_v55 }
 0xdde   :  { %v7807_v20 = vadd.f32 %v2184_v21, %v2183_v8  ;;  %v8339_v8 = vld [vmem:[#allocation42_spill] sm:$0xff] }
 0xde0   :  { %2187 = vrot.lane.b32.xlu0 %v7807_v20, %s7158_s17 }
 0xe52   :  { %v7811_v28 = vpop.permute.xlu0 %2187 }
 0xe53   :  { %5860 = vmatprep.subr.mxu1 %v7811_v28 }
 0xe54   :  { %5861 = vmatpush3.msra.mxu1 %v7811_v28 }
 0xe55   :  { %5863 = vmatmul.mubr.msk.f32.vlgmr.msra.gmra.mrb[32].mxu1 %vm737_vm7, %v7491_v44  ;;  %6270 = vmatprep.subr.bf16.mxu1 %v7498_v52 }
 0xe56   :  { %6272 = vmatpush1.bf16.msra.mxu1 %v7503_v56  ;;  %2412 = vmatprep.mubr.f32.mxu1 %v8308_v0 }
 0xe57   :  { %6274 = vmatprep.subr.bf16.mxu1 %v7510_v2 }
 0xe5a   :  { %6276 = vmatpush1.bf16.msra.mxu1 %v7515_v6 }
 0xe5b   :  { %6286 = vmatprep.subr.bf16.mxu1 %v7523_v12 }
 0xf28   :  { %v5864_v19 = vpop.f32.mrb[32].mxu1 }
 0xf29   :  { %v2256_v33 = vpop.f32.mrb[33].mxu1 }
 0xf2a   :  { %5109 = vmatmul.mubr.msk.f32.vlgmr.msra.gmra.mrb[32].mxu0 %vm819_vm9, %v2256_v33  ;;  %5111 = vmatmul.mubr.msk.f32.vlgmr.msra.gmra.mrb[34].mxu1 %vm819_vm9, %v2256_v33 }
 0xf2b   :  { %6280 = vmatpush3.bf16.msra.mxu0 %v7520_v9  ;;  %2341 = vmatprep.mubr.f32.mxu0 %v8308_v0 }
 0xf2c   :  { %2418 = vmatprep.mubr.f32.mxu1 %v8308_v0  ;;  %6282 = vmatprep.subr.bf16.mxu0 %v7542_v26 }
 0xf2d   :  { %6288 = vmatpush3.bf16.msra.mxu1 %v7544_v31 }
 0xf2e   :  { %5110 = vmatmul.mubr.msk.f32.gmra.mrb[34].mxu0 %vm819_vm9, %v5864_v19  ;;  %5112 = vmatmul.mubr.msk.f32.gmra.mrb[36].mxu1 %vm819_vm9, %v5864_v19 }
 0xf2f   :  { %6284 = vmatpush3.bf16.msra.mxu0 %v7542_v26  ;;  %5873 = vmatprep.mubr.msk.f32.mxu0 %vm819_vm9, %v2256_v33  ;;  %v8340_v33 = vld [vmem:[#allocation43_spill] sm:$0xff] }
 0xf30   :  { %6318 = vmatprep.subr.bf16.mxu0 %v7552_v39  ;;  %6290 = vmatprep.subr.bf16.mxu1 %v7554_v42 }
 0xf31   :  { %6292 = vmatpush3.bf16.msra.mxu1 %v7557_v47 }
 0xf32   :  { %5874 = vmatmul.mubr.msk.f32.vlgmr.msra.gmra.mrb[36].mxu0 %vm819_vm9, %v5864_v19  ;;  %6294 = vmatprep.subr.bf16.mxu1 %v7561_v49 }
 0xf33   :  { %6320 = vmatpush3.bf16.msra.mxu0 %v7565_v54 }
 0xf34   :  { %6322 = vmatprep.subr.bf16.mxu0 %v7569_v58 }
 0xf35   :  { %6296 = vmatpush3.bf16.msra.mxu1 %v7572_v4 }
 0xf36   :  { %6298 = vmatprep.subr.bf16.mxu1 %v7576_v5 }
 0xf37   :  { %6324 = vmatpush3.bf16.msra.mxu0 %v7579_v10 }
 0xf38   :  { %6326 = vmatprep.subr.bf16.mxu0 %v7582_v22 }
 0xf39   :  { %6300 = vmatpush3.bf16.msra.mxu1 %v7585_v29 }
 0xf3a   :  { %6302 = vmatprep.subr.bf16.mxu1 %v7588_v30 }
 0xf3b   :  { %6328 = vmatpush3.bf16.msra.mxu0 %v7591_v34 }
 0xf3c   :  { %6330 = vmatprep.subr.bf16.mxu0 %v7594_v38 }
 0xf3d   :  { %6304 = vmatpush3.bf16.msra.mxu1 %v7597_v50 }
 0xf3e   :  { %6306 = vmatprep.subr.bf16.mxu1 %v7600_v51 }
 0xf3f   :  { %6332 = vmatpush3.bf16.msra.mxu0 %v7603_v59 }
 0xf40   :  { %6334 = vmatprep.subr.bf16.mxu0 %v7606_v63 }
 0xf41   :  { %6308 = vmatpush3.bf16.msra.mxu1 %v7609_v23 }
 0xf42   :  { %6310 = vmatprep.subr.bf16.mxu1 %v7612_v24 }
 0xf43   :  { %6336 = vmatpush3.bf16.msra.mxu0 %v7615_v32  ;;  %v8345_v32 = vld [vmem:[#allocation58_spill] sm:$0xff] }
 0xf44   :  { %6338 = vmatprep.subr.bf16.mxu0 %v8328_v41 }
 0xf45   :  { %6312 = vmatpush3.bf16.msra.mxu1 %v8329_v14 }
 0xf46   :  { %6314 = vmatprep.subr.bf16.mxu1 %v8330_v37 }
 0xf47   :  { %6340 = vmatpush3.bf16.msra.mxu0 %v8331_v27  ;;  %v8342_v27 = vld [vmem:[#allocation45_spill] sm:$0xff] }
 0xf48   :  { %6342 = vmatprep.subr.bf16.mxu0 %v8332_v13 }
 0xf49   :  { %6316 = vmatpush3.bf16.msra.mxu1 %v8333_v43 }
 0xf4a   :  { %6349 = vmatprep.subr.bf16.mxu1 %v8307_v7 }
 0xf4b   :  { %6344 = vmatpush3.bf16.msra.mxu0 %v8334_v40 }
 0xf4c   :  { %6346 = vmatprep.subr.bf16.mxu0 %v8335_v36  ;;  %v8341_v36 = vld [vmem:[#allocation44_spill] sm:$0xff] }
 0xf4f   :  { %6348 = vmatpush3.bf16.msra.mxu0 %v8336_v57 }
 0xf50   :  { %6352 = vmatprep.subr.bf16.mxu0 %v8307_v7 }
 0xffd   :  { %v2337_v15 = vpop.f32.mrb[32].mxu0  ;;  %v2414_v11 = vpop.f32.mrb[34].mxu1 }
 0xffe   :  { %v2425_v61 = vmul.f32 %v2337_v15, %v8337_v25  ;;  %v2427_v55 = vmul.f32 %v2414_v11, %v8338_v35  ;;  %v2339_v18 = vpop.f32.mrb[33].mxu0  ;;  %v2416_v21 = vpop.f32.mrb[35].mxu1  ;;  %v8343_v15 = vld [vmem:[#allocation46_spill] sm:$0xff]  ;;  %v8344_v35 = vld [vmem:[#allocation47_spill] sm:$0xff] }
 0xfff   :  { %v2426_v19 = vmul.f32 %v2339_v18, %v8339_v8  ;;  %v2428_v43 = vmul.f32 %v2416_v21, %v8340_v33 }
0x1001   :  { %v2343_v13 = vpop.f32.mrb[34].mxu0  ;;  %v2420_v40 = vpop.f32.mrb[36].mxu1  ;;  %2572 = vmatprep.mubr.f32.mxu1 %v2426_v19  ;;  %2647 = vmatprep.mubr.f32.mxu0 %v2428_v43 }
0x1002   :  { %v2429_v57 = vmul.f32 %v2343_v13, %v8341_v36  ;;  %v2431_v37 = vmul.f32 %v2420_v40, %v8342_v27  ;;  %v2345_v14 = vpop.f32.mrb[35].mxu0  ;;  %v2422_v41 = vpop.f32.mrb[37].mxu1  ;;  %2573 = vmatmul.mubr.f32.vlgmr.msra.gmra.mrb[38].mxu1 %v2425_v61  ;;  %2648 = vmatmul.mubr.f32.vlgmr.msra.gmra.mrb[38].mxu0 %v2427_v55  ;;  %v8346_v13 = vld [vmem:[#allocation59_spill] sm:$0xff] }
0x1003   :  { %v2430_v11 = vmul.f32 %v2345_v14, %v8343_v15  ;;  %v2432_v25 = vmul.f32 %v2422_v41, %v8344_v35  ;;  %6354 = vmatpush3.bf16.msra.mxu0 %v8345_v32 }
0x1004   :  { %6355 = vmatprep.subr.bf16.mxu0 %v8307_v7 }
0x1005   :  { %v5875_v18 = vpop.f32.mrb[36].mxu0  ;;  %2577 = vmatprep.mubr.f32.mxu1 %v2430_v11  ;;  %2652 = vmatprep.mubr.f32.mxu0 %v2432_v25 }
0x1006   :  { %v2499_v43 = vpop.f32.mrb[37].mxu0  ;;  %2578 = vmatmul.mubr.f32.gmra.mrb[40].mxu1 %v2429_v57  ;;  %2653 = vmatmul.mubr.f32.gmra.mrb[40].mxu0 %v2431_v37 }
0x1007   :  { %6357 = vmatpush3.bf16.msra.mxu0 %v8346_v13  ;;  %5891 = vmatprep.mubr.msk.f32.mxu0 %vm7154_vm0, %v8308_v0 }
0x1008   :  { %5880 = vmatprep.mubr.msk.f32.mxu1 %vm7154_vm0, %v8308_v0 }
0x100a   :  { %5892 = vmatmul.mubr.msk.f32.vlgmr.msra.gmra.mrb[42].mxu0 %vm819_vm9, %v7811_v28 }
0x100b   :  { %5907 = vmatprep.mubr.msk.f32.mxu0 %vm737_vm7, %v8327_v45 }
0x10d5   :  { %v5401_v41 = vpop.f32.mrb[38].mxu1  ;;  %v5439_v14 = vpop.f32.mrb[38].mxu0 }
0x10d6   :  { %v5402_v40 = vpop.f32.mrb[39].mxu1  ;;  %v5440_v25 = vpop.f32.mrb[39].mxu0 }
0x10d7   :  { %v5403_v57 = vadd.f32 %v5402_v40, %v5401_v41  ;;  %v5441_v37 = vadd.f32 %v5440_v25, %v5439_v14 }
0x10d9   :  { %v2575_v61 = vadd.f32 %v5403_v57, %v2499_v43  ;;  %v5404_v55 = vpop.f32.mrb[40].mxu1  ;;  %v5442_v21 = vpop.f32.mrb[40].mxu0 }
0x10da   :  { %v5405_v19 = vpop.f32.mrb[41].mxu1  ;;  %v5443_v11 = vpop.f32.mrb[41].mxu0 }
0x10db   :  { %v2650_v13 = vadd.f32 %v5441_v37, %v2575_v61  ;;  %v5406_v32 = vadd.f32 %v5405_v19, %v5404_v55  ;;  %v5444_v35 = vadd.f32 %v5443_v11, %v5442_v21 }
0x10dd   :  { %v2580_v15 = vadd.f32 %v5875_v18, %v5406_v32  ;;  %v2796_v27 = vpop.f32.mrb[42].mxu0 }
0x10de   :  { %v5893_v28 = vpop.f32.mrb[43].mxu0 }
0x10df   :  { %v2655_v36 = vadd.f32 %v5444_v35, %v2580_v15 }
0x10e1   :  { %v6350_v33 = vpack.c.bf16 %v2655_v36, %v2650_v13 }
0x10e3   :  { %6351 = vmatpush3.bf16.msra.mxu1 %v6350_v33 }
0x10e4   :  { %6358 = vmatprep.subr.bf16.mxu1 %v8307_v7 }
0x10e6   :  { %5881 = vmatmul.mubr.msk.f32.vlgmr.msra.gmra.mrb[42].mxu1 %vm456_vm5, %v7675_v1 }
0x10e7   :  { %6360 = vmatpush3.bf16.msra.mxu1 %v7677_v62  ;;  %5902 = vmatprep.mubr.msk.f32.mxu1 %vm7154_vm0, %v8308_v0 }
0x10e8   :  { %6361 = vmatprep.subr.bf16.mxu1 %v8307_v7 }
0x10eb   :  { %6363 = vmatpush3.bf16.msra.mxu1 %v7686_v16 }
0x10ec   :  { %6365 = vmatprep.subr.bf16.mxu1 %v7496_v48 }
0x11b9   :  { %v2724_v32 = vpop.f32.mrb[42].mxu1 }
0x11ba   :  { %v2725_v36 = vadd.f32 %v7690_v17, %v2724_v32  ;;  %v5882_v35 = vpop.f32.mrb[43].mxu1 }
0x11bb   :  { %v8347_v35 = vld [vmem:[#allocation48_spill] sm:$0xff] }
0x11bc   :  { %5903 = vmatmul.mubr.msk.f32.vlgmr.msra.gmra.mrb[44].mxu1 %vm819_vm9, %v2725_v36 }
0x11bd   :  { %6367 = vmatpush1.bf16.msra.mxu1 %v7500_v53  ;;  %3048 = vmatprep.mubr.f32.mxu1 %v8308_v0 }
0x11be   :  { %6369 = vmatprep.subr.bf16.mxu1 %v7508_v60 }
0x11c1   :  { %6371 = vmatpush1.bf16.msra.mxu1 %v7512_v3 }
0x11c2   :  { %6381 = vmatprep.subr.bf16.mxu1 %v7520_v9 }
0x128f   :  { %v2869_v33 = vpop.f32.mrb[44].mxu1 }
0x1290   :  { %v2870_v15 = vadd.f32 %v2869_v33, %v2796_v27  ;;  %v5904_v18 = vpop.f32.mrb[45].mxu1  ;;  %v8348_v33 = vld [vmem:[#allocation49_spill] sm:$0xff] }
0x1291   :  { %v8350_v18 = vld [vmem:[#allocation54_spill] sm:$0xff] }
0x1292   :  { %v2873_v43 = vadd.f32 %v7699_v46, %v2870_v15  ;;  %v8349_v15 = vld [vmem:[#allocation50_spill] sm:$0xff] }
0x1294   :  { %2881 = vrot.lane.b32.xlu1 %v2873_v43, %s7148_s20  ;;  %v5118_v13 = vmul.f32 -1.442695, %v2873_v43 }
0x1296   :  { %6713 = vpow2.f32 %v5118_v13  ;;  %v8352_v13 = vld [vmem:[#allocation52_spill] sm:$0xff] }
0x12a0   :  { %v6714_v41 = vpop.eup %6713 }
0x12a1   :  { %v2877_v14 = vadd.f32 1.0, %v6714_v41  ;;  %v8353_v41 = vld [vmem:[#allocation56_spill] sm:$0xff] }
0x12a3   :  { %6715 = vrcp.f32 %v2877_v14  ;;  %v8354_v14 = vld [vmem:[#allocation53_spill] sm:$0xff] }
0x12ad   :  { %v6716_v40 = vpop.eup %6715 }
0x12ae   :  { %v2891_v27 = vsub.f32 1.0, %v6716_v40  ;;  %v2897_v19 = vmul.f32 %v6716_v40, %v7807_v20 }
0x1306   :  { %v2882_v25 = vpop.permute.xlu1 %2881 }
0x1307   :  { %v2884_v57 = vmul.f32 %v6716_v40, %v2882_v25  ;;  %v8355_v40 = vld [vmem:[#allocation55_spill] sm:$0xff]  ;;  %v8356_v25 = vld [vmem:[#allocation57_spill] sm:$0xff] }
0x1309   :  { %2886 = vrot.lane.b32.xlu0 %v2884_v57, %s7157_s15 }
0x137b   :  { %v2887_v37 = vpop.permute.xlu0 %2886 }
0x137c   :  { %v2889_v61 = vadd.f32 %v2887_v37, %v2873_v43  ;;  %v8351_v43 = vld [vmem:[#allocation51_spill] sm:$0xff] }
0x137e   :  { %6717 = vtanh.f32 %v2889_v61  ;;  %v8357_v61 = vld [vmem:[#allocation40_spill] sm:$0xff] }
0x1388   :  { %v6718_v55 = vpop.eup %6717 }
0x1389   :  { %2893 = vrot.lane.b32.xlu1 %v6718_v55, %s7158_s17 }
0x13fb   :  { %v2894_v21 = vpop.permute.xlu1 %2893 }
0x13fc   :  { %v2896_v11 = vmul.f32 %v2894_v21, %v2891_v27  ;;  %v8358_v27 = vld [vmem:[#allocation41_spill] sm:$0xff] }
0x13fe   :  { %v7907_v28 = vadd.f32 %v2897_v19, %v2896_v11 }
0x1400   :  { %2900 = vrot.lane.b32.xlu0 %v7907_v28, %s7158_s17 }
0x1472   :  { %v7911_v32 = vpop.permute.xlu0 %2900 }
0x1473   :  { %5905 = vmatprep.subr.mxu0 %v7911_v32 }
0x1474   :  { %5906 = vmatpush3.msra.mxu0 %v7911_v32 }
0x1475   :  { %5908 = vmatmul.mubr.msk.f32.vlgmr.msra.gmra.mrb[44].mxu0 %vm737_vm7, %v7491_v44  ;;  %6373 = vmatprep.subr.bf16.mxu0 %v7498_v52 }
0x1476   :  { %6375 = vmatpush1.bf16.msra.mxu0 %v7503_v56  ;;  %3125 = vmatprep.mubr.f32.mxu0 %v8308_v0 }
0x1477   :  { %6377 = vmatprep.subr.bf16.mxu0 %v7510_v2 }
0x147a   :  { %6379 = vmatpush1.bf16.msra.mxu0 %v7515_v6 }
0x147b   :  { %6389 = vmatprep.subr.bf16.mxu0 %v7523_v12 }
0x1548   :  { %v5909_v20 = vpop.f32.mrb[44].mxu0 }
0x1549   :  { %v2969_v36 = vpop.f32.mrb[45].mxu0 }
0x154a   :  { %5121 = vmatmul.mubr.msk.f32.vlgmr.msra.gmra.mrb[46].mxu1 %vm819_vm9, %v2969_v36  ;;  %5123 = vmatmul.mubr.msk.f32.vlgmr.msra.gmra.mrb[46].mxu0 %vm819_vm9, %v2969_v36 }
0x154b   :  { %6383 = vmatpush3.bf16.msra.mxu1 %v7520_v9  ;;  %3054 = vmatprep.mubr.f32.mxu1 %v8308_v0 }
0x154c   :  { %3131 = vmatprep.mubr.f32.mxu0 %v8308_v0  ;;  %6385 = vmatprep.subr.bf16.mxu1 %v7542_v26 }
0x154d   :  { %6391 = vmatpush3.bf16.msra.mxu0 %v7544_v31 }
0x154e   :  { %5122 = vmatmul.mubr.msk.f32.gmra.mrb[48].mxu1 %vm819_vm9, %v5909_v20  ;;  %5124 = vmatmul.mubr.msk.f32.gmra.mrb[48].mxu0 %vm819_vm9, %v5909_v20 }
0x154f   :  { %6387 = vmatpush3.bf16.msra.mxu1 %v7542_v26  ;;  %5918 = vmatprep.mubr.msk.f32.mxu1 %vm819_vm9, %v2969_v36  ;;  %v8359_v36 = vld [vmem:[#allocation43_spill] sm:$0xff] }
0x1550   :  { %6421 = vmatprep.subr.bf16.mxu1 %v7552_v39  ;;  %6393 = vmatprep.subr.bf16.mxu0 %v7554_v42 }
0x1551   :  { %6395 = vmatpush3.bf16.msra.mxu0 %v7557_v47 }
0x1552   :  { %5919 = vmatmul.mubr.msk.f32.vlgmr.msra.gmra.mrb[50].mxu1 %vm819_vm9, %v5909_v20  ;;  %6397 = vmatprep.subr.bf16.mxu0 %v7561_v49 }
0x1553   :  { %6423 = vmatpush3.bf16.msra.mxu1 %v7565_v54 }
0x1554   :  { %6425 = vmatprep.subr.bf16.mxu1 %v7569_v58 }
0x1555   :  { %6399 = vmatpush3.bf16.msra.mxu0 %v7572_v4 }
0x1556   :  { %6401 = vmatprep.subr.bf16.mxu0 %v7576_v5 }
0x1557   :  { %6427 = vmatpush3.bf16.msra.mxu1 %v7579_v10 }
0x1558   :  { %6429 = vmatprep.subr.bf16.mxu1 %v7582_v22 }
0x1559   :  { %6403 = vmatpush3.bf16.msra.mxu0 %v7585_v29 }
0x155a   :  { %6405 = vmatprep.subr.bf16.mxu0 %v7588_v30 }
0x155b   :  { %6431 = vmatpush3.bf16.msra.mxu1 %v7591_v34 }
0x155c   :  { %6433 = vmatprep.subr.bf16.mxu1 %v7594_v38 }
0x155d   :  { %6407 = vmatpush3.bf16.msra.mxu0 %v7597_v50 }
0x155e   :  { %6409 = vmatprep.subr.bf16.mxu0 %v7600_v51 }
0x155f   :  { %6435 = vmatpush3.bf16.msra.mxu1 %v7603_v59 }
0x1560   :  { %6437 = vmatprep.subr.bf16.mxu1 %v7606_v63 }
0x1561   :  { %6411 = vmatpush3.bf16.msra.mxu0 %v7609_v23 }
0x1562   :  { %6413 = vmatprep.subr.bf16.mxu0 %v7612_v24 }
0x1563   :  { %6439 = vmatpush3.bf16.msra.mxu1 %v8347_v35  ;;  %v8364_v35 = vld [vmem:[#allocation58_spill] sm:$0xff] }
0x1564   :  { %6441 = vmatprep.subr.bf16.mxu1 %v8348_v33 }
0x1565   :  { %6415 = vmatpush3.bf16.msra.mxu0 %v8349_v15 }
0x1566   :  { %6417 = vmatprep.subr.bf16.mxu0 %v8350_v18 }
0x1567   :  { %6443 = vmatpush3.bf16.msra.mxu1 %v8351_v43  ;;  %v8361_v43 = vld [vmem:[#allocation45_spill] sm:$0xff] }
0x1568   :  { %6445 = vmatprep.subr.bf16.mxu1 %v8352_v13 }
0x1569   :  { %6419 = vmatpush3.bf16.msra.mxu0 %v8353_v41 }
0x156a   :  { %6452 = vmatprep.subr.bf16.mxu0 %v8307_v7 }
0x156b   :  { %6447 = vmatpush3.bf16.msra.mxu1 %v8354_v14 }
0x156c   :  { %6449 = vmatprep.subr.bf16.mxu1 %v8355_v40  ;;  %v8360_v40 = vld [vmem:[#allocation44_spill] sm:$0xff] }
0x156f   :  { %6451 = vmatpush3.bf16.msra.mxu1 %v8356_v25 }
0x1570   :  { %6455 = vmatprep.subr.bf16.mxu1 %v8307_v7 }
0x161d   :  { %v3050_v57 = vpop.f32.mrb[46].mxu1  ;;  %v3127_v37 = vpop.f32.mrb[46].mxu0 }
0x161e   :  { %v3138_v55 = vmul.f32 %v3050_v57, %v8357_v61  ;;  %v3140_v21 = vmul.f32 %v3127_v37, %v8358_v27  ;;  %v3052_v19 = vpop.f32.mrb[47].mxu1  ;;  %v3129_v11 = vpop.f32.mrb[47].mxu0  ;;  %v8362_v57 = vld [vmem:[#allocation46_spill] sm:$0xff]  ;;  %v8363_v27 = vld [vmem:[#allocation47_spill] sm:$0xff] }
0x161f   :  { %v3139_v20 = vmul.f32 %v3052_v19, %v8339_v8  ;;  %v3141_v41 = vmul.f32 %v3129_v11, %v8359_v36 }
0x1621   :  { %v3056_v13 = vpop.f32.mrb[48].mxu1  ;;  %v3133_v14 = vpop.f32.mrb[48].mxu0  ;;  %3285 = vmatprep.mubr.f32.mxu0 %v3139_v20  ;;  %3360 = vmatprep.mubr.f32.mxu1 %v3141_v41 }
0x1622   :  { %v3142_v25 = vmul.f32 %v3056_v13, %v8360_v40  ;;  %v3144_v18 = vmul.f32 %v3133_v14, %v8361_v43  ;;  %v3058_v15 = vpop.f32.mrb[49].mxu1  ;;  %v3135_v33 = vpop.f32.mrb[49].mxu0  ;;  %3286 = vmatmul.mubr.f32.vlgmr.msra.gmra.mrb[50].mxu0 %v3138_v55  ;;  %3361 = vmatmul.mubr.f32.vlgmr.msra.gmra.mrb[52].mxu1 %v3140_v21  ;;  %v8365_v13 = vld [vmem:[#allocation59_spill] sm:$0xff] }
0x1623   :  { %v3143_v37 = vmul.f32 %v3058_v15, %v8362_v57  ;;  %v3145_v61 = vmul.f32 %v3135_v33, %v8363_v27  ;;  %6457 = vmatpush3.bf16.msra.mxu1 %v8364_v35 }
0x1624   :  { %6458 = vmatprep.subr.bf16.mxu1 %v8307_v7 }
0x1625   :  { %v5920_v19 = vpop.f32.mrb[50].mxu1  ;;  %3290 = vmatprep.mubr.f32.mxu0 %v3143_v37  ;;  %3365 = vmatprep.mubr.f32.mxu1 %v3145_v61 }
0x1626   :  { %v3212_v41 = vpop.f32.mrb[51].mxu1  ;;  %3291 = vmatmul.mubr.f32.gmra.mrb[52].mxu0 %v3142_v25  ;;  %3366 = vmatmul.mubr.f32.gmra.mrb[54].mxu1 %v3144_v18 }
0x1627   :  { %6460 = vmatpush3.bf16.msra.mxu1 %v8365_v13  ;;  %5936 = vmatprep.mubr.msk.f32.mxu1 %vm7154_vm0, %v8308_v0 }
0x1628   :  { %5925 = vmatprep.mubr.msk.f32.mxu0 %vm7154_vm0, %v8308_v0 }
0x162a   :  { %5937 = vmatmul.mubr.msk.f32.vlgmr.msra.gmra.mrb[56].mxu1 %vm819_vm9, %v7911_v32 }
0x162b   :  { %5952 = vmatprep.mubr.msk.f32.mxu1 %vm737_vm7, %v8327_v45 }
0x16f5   :  { %v5499_v33 = vpop.f32.mrb[50].mxu0  ;;  %v5537_v15 = vpop.f32.mrb[52].mxu1 }
0x16f6   :  { %v5500_v14 = vpop.f32.mrb[51].mxu0  ;;  %v5538_v61 = vpop.f32.mrb[53].mxu1 }
0x16f7   :  { %v5501_v25 = vadd.f32 %v5500_v14, %v5499_v33  ;;  %v5539_v18 = vadd.f32 %v5538_v61, %v5537_v15 }
0x16f9   :  { %v3288_v55 = vadd.f32 %v5501_v25, %v3212_v41  ;;  %v5502_v21 = vpop.f32.mrb[52].mxu0  ;;  %v5540_v11 = vpop.f32.mrb[54].mxu1 }
0x16fa   :  { %v5503_v20 = vpop.f32.mrb[53].mxu0  ;;  %v5541_v37 = vpop.f32.mrb[55].mxu1 }
0x16fb   :  { %v3363_v13 = vadd.f32 %v5539_v18, %v3288_v55  ;;  %v5504_v35 = vadd.f32 %v5503_v20, %v5502_v21  ;;  %v5542_v27 = vadd.f32 %v5541_v37, %v5540_v11 }
0x16fd   :  { %v3293_v57 = vadd.f32 %v5920_v19, %v5504_v35  ;;  %v3509_v43 = vpop.f32.mrb[56].mxu1 }
0x16fe   :  { %v5938_v32 = vpop.f32.mrb[57].mxu1 }
0x16ff   :  { %v3368_v40 = vadd.f32 %v5542_v27, %v3293_v57 }
0x1701   :  { %v6453_v36 = vpack.c.bf16 %v3368_v40, %v3363_v13 }
0x1703   :  { %6454 = vmatpush3.bf16.msra.mxu0 %v6453_v36 }
0x1704   :  { %6461 = vmatprep.subr.bf16.mxu0 %v8307_v7 }
0x1706   :  { %5926 = vmatmul.mubr.msk.f32.vlgmr.msra.gmra.mrb[54].mxu0 %vm456_vm5, %v7675_v1 }
0x1707   :  { %6463 = vmatpush3.bf16.msra.mxu0 %v7677_v62  ;;  %5947 = vmatprep.mubr.msk.f32.mxu0 %vm7154_vm0, %v8308_v0 }
0x1708   :  { %6464 = vmatprep.subr.bf16.mxu0 %v8307_v7 }
0x170b   :  { %6466 = vmatpush3.bf16.msra.mxu0 %v7686_v16 }
0x170c   :  { %6468 = vmatprep.subr.bf16.mxu0 %v7496_v48 }
0x17d9   :  { %v3437_v35 = vpop.f32.mrb[54].mxu0 }
0x17da   :  { %v3438_v40 = vadd.f32 %v7690_v17, %v3437_v35  ;;  %v5927_v27 = vpop.f32.mrb[55].mxu0  ;;  %v8366_v35 = vld [vmem:[#allocation48_spill] sm:$0xff] }
0x17db   :  { %v8368_v27 = vld [vmem:[#allocation50_spill] sm:$0xff] }
0x17dc   :  { %5948 = vmatmul.mubr.msk.f32.vlgmr.msra.gmra.mrb[56].mxu0 %vm819_vm9, %v3438_v40  ;;  %v8367_v40 = vld [vmem:[#allocation49_spill] sm:$0xff] }
0x17dd   :  { %6470 = vmatpush1.bf16.msra.mxu0 %v7500_v53  ;;  %3761 = vmatprep.mubr.f32.mxu0 %v8308_v0 }
0x17de   :  { %6472 = vmatprep.subr.bf16.mxu0 %v7508_v60 }
0x17e1   :  { %6474 = vmatpush1.bf16.msra.mxu0 %v7512_v3 }
0x17e2   :  { %6484 = vmatprep.subr.bf16.mxu0 %v7520_v9 }
0x18af   :  { %v3582_v36 = vpop.f32.mrb[56].mxu0 }
0x18b0   :  { %v3583_v57 = vadd.f32 %v3582_v36, %v3509_v43  ;;  %v5949_v19 = vpop.f32.mrb[57].mxu0  ;;  %v8369_v36 = vld [vmem:[#allocation54_spill] sm:$0xff] }
0x18b1   :  { %v8371_v19 = vld [vmem:[#allocation52_spill] sm:$0xff] }
0x18b2   :  { %v3586_v41 = vadd.f32 %v7699_v46, %v3583_v57  ;;  %v8370_v57 = vld [vmem:[#allocation51_spill] sm:$0xff] }
0x18b4   :  { %3594 = vrot.lane.b32.xlu1 %v3586_v41, %s7148_s20  ;;  %v5130_v17 = vmul.f32 -1.442695, %v3586_v41 }
0x18b6   :  { %6719 = vpow2.f32 %v5130_v17  ;;  %v8373_v17 = vld [vmem:[#allocation53_spill] sm:$0xff] }
0x18c0   :  { %v6720_v13 = vpop.eup %6719 }
0x18c1   :  { %v3590_v33 = vadd.f32 1.0, %v6720_v13  ;;  %v8374_v13 = vld [vmem:[#allocation55_spill] sm:$0xff] }
0x18c3   :  { %6721 = vrcp.f32 %v3590_v33  ;;  %v8375_v33 = vld [vmem:[#allocation57_spill] sm:$0xff] }
0x18cd   :  { %v6722_v15 = vpop.eup %6721 }
0x18ce   :  { %v3604_v43 = vsub.f32 1.0, %v6722_v15  ;;  %v3610_v21 = vmul.f32 %v6722_v15, %v7907_v28 }
0x1926   :  { %v3595_v14 = vpop.permute.xlu1 %3594 }
0x1927   :  { %v3597_v61 = vmul.f32 %v6722_v15, %v3595_v14 }
0x1929   :  { %3599 = vrot.lane.b32.xlu0 %v3597_v61, %s7157_s15  ;;  %v8376_v61 = vld [vmem:[#allocation40_spill] sm:$0xff] }
0x199b   :  { %v3600_v25 = vpop.permute.xlu0 %3599 }
0x199c   :  { %v3602_v18 = vadd.f32 %v3600_v25, %v3586_v41  ;;  %v8372_v41 = vld [vmem:[#allocation56_spill] sm:$0xff] }
0x199e   :  { %6723 = vtanh.f32 %v3602_v18  ;;  %v8377_v18 = vld [vmem:[#allocation41_spill] sm:$0xff] }
0x19a8   :  { %v6724_v55 = vpop.eup %6723 }
0x19a9   :  { %3606 = vrot.lane.b32.xlu1 %v6724_v55, %s7158_s17 }
0x1a1b   :  { %v3607_v46 = vpop.permute.xlu1 %3606 }
0x1a1c   :  { %v3609_v11 = vmul.f32 %v3607_v46, %v3604_v43 }
0x1a1e   :  { %v8007_v20 = vadd.f32 %v3610_v21, %v3609_v11  ;;  %v8378_v11 = vld [vmem:[#allocation43_spill] sm:$0xff] }
0x1a20   :  { %3613 = vrot.lane.b32.xlu0 %v8007_v20, %s7158_s17 }
0x1a92   :  { %v8011_v37 = vpop.permute.xlu0 %3613 }
0x1a93   :  { %5950 = vmatprep.subr.mxu1 %v8011_v37 }
0x1a94   :  { %5951 = vmatpush3.msra.mxu1 %v8011_v37 }
0x1a95   :  { %5953 = vmatmul.mubr.msk.f32.vlgmr.msra.gmra.mrb[58].mxu1 %vm737_vm7, %v7491_v44  ;;  %6476 = vmatprep.subr.bf16.mxu1 %v7498_v52 }
0x1a96   :  { %6478 = vmatpush1.bf16.msra.mxu1 %v7503_v56  ;;  %3838 = vmatprep.mubr.f32.mxu1 %v8308_v0 }
0x1a97   :  { %6480 = vmatprep.subr.bf16.mxu1 %v7510_v2 }
0x1a9a   :  { %6482 = vmatpush1.bf16.msra.mxu1 %v7515_v6 }
0x1a9b   :  { %6492 = vmatprep.subr.bf16.mxu1 %v7523_v12 }
0x1b68   :  { %v5954_v28 = vpop.f32.mrb[58].mxu1 }
0x1b69   :  { %v3682_v32 = vpop.f32.mrb[59].mxu1 }
0x1b6a   :  { %5133 = vmatmul.mubr.msk.f32.vlgmr.msra.gmra.mrb[58].mxu0 %vm819_vm9, %v3682_v32  ;;  %5135 = vmatmul.mubr.msk.f32.vlgmr.msra.gmra.mrb[60].mxu1 %vm819_vm9, %v3682_v32 }
0x1b6b   :  { %6486 = vmatpush3.bf16.msra.mxu0 %v7520_v9  ;;  %3767 = vmatprep.mubr.f32.mxu0 %v8308_v0 }
0x1b6c   :  { %3844 = vmatprep.mubr.f32.mxu1 %v8308_v0  ;;  %6488 = vmatprep.subr.bf16.mxu0 %v7542_v26 }
0x1b6d   :  { %6494 = vmatpush3.bf16.msra.mxu1 %v7544_v31 }
0x1b6e   :  { %5134 = vmatmul.mubr.msk.f32.gmra.mrb[60].mxu0 %vm819_vm9, %v5954_v28  ;;  %5136 = vmatmul.mubr.msk.f32.gmra.mrb[62].mxu1 %vm819_vm9, %v5954_v28 }
0x1b6f   :  { %6490 = vmatpush3.bf16.msra.mxu0 %v7542_v26  ;;  %5963 = vmatprep.mubr.msk.f32.mxu0 %vm819_vm9, %v3682_v32 }
0x1b70   :  { %6524 = vmatprep.subr.bf16.mxu0 %v7552_v39  ;;  %6496 = vmatprep.subr.bf16.mxu1 %v7554_v42 }
0x1b71   :  { %6498 = vmatpush3.bf16.msra.mxu1 %v7557_v47 }
0x1b72   :  { %5964 = vmatmul.mubr.msk.f32.vlgmr.msra.gmra.mrb[62].mxu0 %vm819_vm9, %v5954_v28  ;;  %6500 = vmatprep.subr.bf16.mxu1 %v7561_v49 }
0x1b73   :  { %6526 = vmatpush3.bf16.msra.mxu0 %v7565_v54 }
0x1b74   :  { %6528 = vmatprep.subr.bf16.mxu0 %v7569_v58 }
0x1b75   :  { %6502 = vmatpush3.bf16.msra.mxu1 %v7572_v4 }
0x1b76   :  { %6504 = vmatprep.subr.bf16.mxu1 %v7576_v5 }
0x1b77   :  { %6530 = vmatpush3.bf16.msra.mxu0 %v7579_v10 }
0x1b78   :  { %6532 = vmatprep.subr.bf16.mxu0 %v7582_v22 }
0x1b79   :  { %6506 = vmatpush3.bf16.msra.mxu1 %v7585_v29 }
0x1b7a   :  { %6508 = vmatprep.subr.bf16.mxu1 %v7588_v30 }
0x1b7b   :  { %6534 = vmatpush3.bf16.msra.mxu0 %v7591_v34 }
0x1b7c   :  { %6536 = vmatprep.subr.bf16.mxu0 %v7594_v38 }
0x1b7d   :  { %6510 = vmatpush3.bf16.msra.mxu1 %v7597_v50 }
0x1b7e   :  { %6512 = vmatprep.subr.bf16.mxu1 %v7600_v51 }
0x1b7f   :  { %6538 = vmatpush3.bf16.msra.mxu0 %v7603_v59 }
0x1b80   :  { %6540 = vmatprep.subr.bf16.mxu0 %v7606_v63 }
0x1b81   :  { %6514 = vmatpush3.bf16.msra.mxu1 %v7609_v23 }
0x1b82   :  { %6516 = vmatprep.subr.bf16.mxu1 %v7612_v24 }
0x1b83   :  { %6542 = vmatpush3.bf16.msra.mxu0 %v8366_v35 }
0x1b84   :  { %6544 = vmatprep.subr.bf16.mxu0 %v8367_v40 }
0x1b85   :  { %6518 = vmatpush3.bf16.msra.mxu1 %v8368_v27  ;;  %v8383_v27 = vld [vmem:[#allocation58_spill] sm:$0xff] }
0x1b86   :  { %6520 = vmatprep.subr.bf16.mxu1 %v8369_v36 }
0x1b87   :  { %6546 = vmatpush3.bf16.msra.mxu0 %v8370_v57 }
0x1b88   :  { %6548 = vmatprep.subr.bf16.mxu0 %v8371_v19 }
0x1b89   :  { %6522 = vmatpush3.bf16.msra.mxu1 %v8372_v41  ;;  %v8380_v41 = vld [vmem:[#allocation45_spill] sm:$0xff] }
0x1b8a   :  { %6555 = vmatprep.subr.bf16.mxu1 %v8307_v7 }
0x1b8b   :  { %6550 = vmatpush3.bf16.msra.mxu0 %v8373_v17 }
0x1b8c   :  { %6552 = vmatprep.subr.bf16.mxu0 %v8374_v13  ;;  %v8379_v13 = vld [vmem:[#allocation44_spill] sm:$0xff] }
0x1b8f   :  { %6554 = vmatpush3.bf16.msra.mxu0 %v8375_v33 }
0x1b90   :  { %6558 = vmatprep.subr.bf16.mxu0 %v8307_v7 }
0x1c3d   :  { %v3763_v15 = vpop.f32.mrb[58].mxu0  ;;  %v3840_v14 = vpop.f32.mrb[60].mxu1 }
0x1c3e   :  { %v3851_v25 = vmul.f32 %v3763_v15, %v8376_v61  ;;  %v3853_v55 = vmul.f32 %v3840_v14, %v8377_v18  ;;  %v3765_v43 = vpop.f32.mrb[59].mxu0  ;;  %v3842_v46 = vpop.f32.mrb[61].mxu1  ;;  %v8381_v15 = vld [vmem:[#allocation46_spill] sm:$0xff]  ;;  %v8382_v18 = vld [vmem:[#allocation47_spill] sm:$0xff] }
0x1c3f   :  { %v3852_v21 = vmul.f32 %v3765_v43, %v8339_v8  ;;  %v3854_v28 = vmul.f32 %v3842_v46, %v8378_v11 }
0x1c41   :  { %v3769_v32 = vpop.f32.mrb[60].mxu0  ;;  %v3846_v17 = vpop.f32.mrb[62].mxu1  ;;  %3998 = vmatprep.mubr.f32.mxu1 %v3852_v21  ;;  %4073 = vmatprep.mubr.f32.mxu0 %v3854_v28  ;;  %v8384_v21 = vld [vmem:[#allocation59_spill] sm:$0xff] }
0x1c42   :  { %v3855_v33 = vmul.f32 %v3769_v32, %v8379_v13  ;;  %v3857_v19 = vmul.f32 %v3846_v17, %v8380_v41  ;;  %v3771_v57 = vpop.f32.mrb[61].mxu0  ;;  %v3848_v36 = vpop.f32.mrb[63].mxu1  ;;  %3999 = vmatmul.mubr.f32.vlgmr.msra.gmra.mrb[64].mxu1 %v3851_v25  ;;  %4074 = vmatmul.mubr.f32.vlgmr.msra.gmra.mrb[64].mxu0 %v3853_v55 }
0x1c43   :  { %v3856_v14 = vmul.f32 %v3771_v57, %v8381_v15  ;;  %v3858_v61 = vmul.f32 %v3848_v36, %v8382_v18  ;;  %6560 = vmatpush3.bf16.msra.mxu0 %v8383_v27 }
0x1c44   :  { %6561 = vmatprep.subr.bf16.mxu0 %v8307_v7 }
0x1c45   :  { %v5965_v43 = vpop.f32.mrb[62].mxu0  ;;  %4003 = vmatprep.mubr.f32.mxu1 %v3856_v14  ;;  %4078 = vmatprep.mubr.f32.mxu0 %v3858_v61 }
0x1c46   :  { %v3925_v46 = vpop.f32.mrb[63].mxu0  ;;  %4004 = vmatmul.mubr.f32.gmra.mrb[66].mxu1 %v3855_v33  ;;  %4079 = vmatmul.mubr.f32.gmra.mrb[66].mxu0 %v3857_v19 }
0x1c47   :  { %6563 = vmatpush3.bf16.msra.mxu0 %v8384_v21  ;;  %5981 = vmatprep.mubr.msk.f32.mxu0 %vm7154_vm0, %v8308_v0 }
0x1c48   :  { %5970 = vmatprep.mubr.msk.f32.mxu1 %vm7154_vm0, %v8308_v0 }
0x1c4a   :  { %5982 = vmatmul.mubr.msk.f32.vlgmr.msra.gmra.mrb[68].mxu0 %vm819_vm9, %v8011_v37 }
0x1c4b   :  { %5997 = vmatprep.mubr.msk.f32.mxu0 %vm737_vm7, %v8327_v45 }
0x1d15   :  { %v5597_v36 = vpop.f32.mrb[64].mxu1  ;;  %v5635_v57 = vpop.f32.mrb[64].mxu0 }
0x1d16   :  { %v5598_v17 = vpop.f32.mrb[65].mxu1  ;;  %v5636_v61 = vpop.f32.mrb[65].mxu0 }
0x1d17   :  { %v5599_v33 = vadd.f32 %v5598_v17, %v5597_v36  ;;  %v5637_v19 = vadd.f32 %v5636_v61, %v5635_v57 }
0x1d19   :  { %v4001_v25 = vadd.f32 %v5599_v33, %v3925_v46  ;;  %v5600_v55 = vpop.f32.mrb[66].mxu1  ;;  %v5638_v28 = vpop.f32.mrb[66].mxu0 }
0x1d1a   :  { %v5601_v32 = vpop.f32.mrb[67].mxu1  ;;  %v5639_v14 = vpop.f32.mrb[67].mxu0 }
0x1d1b   :  { %v4076_v21 = vadd.f32 %v5637_v19, %v4001_v25  ;;  %v5602_v27 = vadd.f32 %v5601_v32, %v5600_v55  ;;  %v5640_v18 = vadd.f32 %v5639_v14, %v5638_v28 }
0x1d1d   :  { %v4006_v15 = vadd.f32 %v5965_v43, %v5602_v27  ;;  %v4222_v41 = vpop.f32.mrb[68].mxu0  ;;  %v8095_v27 = vld [vmem:[#allocation22] ss:$0 sm:$0xff]  ;;  %v8104_v43 = vld [vmem:[#allocation26] ss:$0 sm:$0xff] }
0x1d1e   :  { %v5983_v37 = vpop.f32.mrb[69].mxu0 }
0x1d1f   :  { %v4081_v13 = vadd.f32 %v5640_v18, %v4006_v15  ;;  %v8400_v37 = vld [vmem:[#allocation58_spill] sm:$0xff] }
0x1d21   :  { %v6556_v11 = vpack.c.bf16 %v4081_v13, %v4076_v21 }
0x1d23   :  { %6557 = vmatpush3.bf16.msra.mxu1 %v6556_v11 }
0x1d24   :  { %6564 = vmatprep.subr.bf16.mxu1 %v8307_v7 }
0x1d26   :  { %5971 = vmatmul.mubr.msk.f32.vlgmr.msra.gmra.mrb[68].mxu1 %vm456_vm5, %v7675_v1 }
0x1d27   :  { %6566 = vmatpush3.bf16.msra.mxu1 %v7677_v62  ;;  %5992 = vmatprep.mubr.msk.f32.mxu1 %vm7154_vm0, %v8308_v0 }
0x1d28   :  { %6567 = vmatprep.subr.bf16.mxu1 %v8307_v7 }
0x1d2b   :  { %6569 = vmatpush3.bf16.msra.mxu1 %v7686_v16 }
0x1d2c   :  { %6571 = vmatprep.subr.bf16.mxu1 %v7496_v48 }
0x1df9   :  { %v4150_v45 = vpop.f32.mrb[68].mxu1 }
0x1dfa   :  { %v4151_v13 = vadd.f32 %v8095_v27, %v4150_v45  ;;  %v5972_v18 = vpop.f32.mrb[69].mxu1 }
0x1dfc   :  { %5993 = vmatmul.mubr.msk.f32.vlgmr.msra.gmra.mrb[70].mxu1 %vm819_vm9, %v4151_v13  ;;  %v8401_v13 = vld [vmem:[#allocation59_spill] sm:$0xff] }
0x1dfd   :  { %6573 = vmatpush1.bf16.msra.mxu1 %v7500_v53  ;;  %4474 = vmatprep.mubr.f32.mxu1 %v8308_v0 }
0x1dfe   :  { %6575 = vmatprep.subr.bf16.mxu1 %v7508_v60 }
0x1e01   :  { %6577 = vmatpush1.bf16.msra.mxu1 %v7512_v3 }
0x1e02   :  { %6587 = vmatprep.subr.bf16.mxu1 %v7520_v9 }
0x1ecf   :  { %v4295_v11 = vpop.f32.mrb[70].mxu1 }
0x1ed0   :  { %v4296_v48 = vadd.f32 %v4295_v11, %v4222_v41  ;;  %v5994_v15 = vpop.f32.mrb[71].mxu1 }
0x1ed2   :  { %v4299_v46 = vadd.f32 %v8104_v43, %v4296_v48 }
0x1ed4   :  { %4307 = vrot.lane.b32.xlu1 %v4299_v46, %s7148_s20  ;;  %v5142_v21 = vmul.f32 -1.442695, %v4299_v46 }
0x1ed6   :  { %6725 = vpow2.f32 %v5142_v21 }
0x1ee0   :  { %v6726_v53 = vpop.eup %6725 }
0x1ee1   :  { %v4303_v36 = vadd.f32 1.0, %v6726_v53 }
0x1ee3   :  { %6727 = vrcp.f32 %v4303_v36 }
0x1eed   :  { %v6728_v57 = vpop.eup %6727 }
0x1eee   :  { %v4317_v33 = vsub.f32 1.0, %v6728_v57  ;;  %v4323_v25 = vmul.f32 %v6728_v57, %v8007_v20 }
0x1f46   :  { %v4308_v60 = vpop.permute.xlu1 %4307 }
0x1f47   :  { %v4310_v17 = vmul.f32 %v6728_v57, %v4308_v60 }
0x1f49   :  { %4312 = vrot.lane.b32.xlu0 %v4310_v17, %s7157_s15 }
0x1fbb   :  { %v4313_v3 = vpop.permute.xlu0 %4312 }
0x1fbc   :  { %v4315_v61 = vadd.f32 %v4313_v3, %v4299_v46 }
0x1fbe   :  { %6729 = vtanh.f32 %v4315_v61 }
0x1fc8   :  { %v6730_v41 = vpop.eup %6729 }
0x1fc9   :  { %4319 = vrot.lane.b32.xlu1 %v6730_v41, %s7158_s17 }
0x203b   :  { %v4320_v19 = vpop.permute.xlu1 %4319 }
0x203c   :  { %v4322_v55 = vmul.f32 %v4320_v19, %v4317_v33 }
0x203e   :  { %v8111_v28 = vadd.f32 %v4323_v25, %v4322_v55 }
0x2040   :  { %4326 = vrot.lane.b32.xlu0 %v8111_v28, %s7158_s17 }
0x20b2   :  { %v8115_v32 = vpop.permute.xlu0 %4326 }
0x20b3   :  { %5995 = vmatprep.subr.mxu0 %v8115_v32 }
0x20b4   :  { %5996 = vmatpush3.msra.mxu0 %v8115_v32 }
0x20b5   :  { %5998 = vmatmul.mubr.msk.f32.vlgmr.msra.gmra.mrb[70].mxu0 %vm737_vm7, %v7491_v44  ;;  %6579 = vmatprep.subr.bf16.mxu0 %v7498_v52  ;;  %v8385_v44 = vld [vmem:[#allocation50_spill] sm:$0xff] }
0x20b6   :  { %6581 = vmatpush1.bf16.msra.mxu0 %v7503_v56  ;;  %4551 = vmatprep.mubr.f32.mxu0 %v8308_v0  ;;  %v8386_v52 = vld [vmem:[#allocation54_spill] sm:$0xff]  ;;  %v8387_v56 = vld [vmem:[#allocation51_spill] sm:$0xff] }
0x20b7   :  { %6583 = vmatprep.subr.bf16.mxu0 %v7510_v2  ;;  %v8388_v2 = vld [vmem:[#allocation52_spill] sm:$0xff] }
0x20ba   :  { %6585 = vmatpush1.bf16.msra.mxu0 %v7515_v6  ;;  %v8389_v6 = vld [vmem:[#allocation56_spill] sm:$0xff] }
0x20bb   :  { %6595 = vmatprep.subr.bf16.mxu0 %v7523_v12  ;;  %v8391_v12 = vld [vmem:[#allocation55_spill] sm:$0xff] }
0x2188   :  { %v5999_v20 = vpop.f32.mrb[70].mxu0 }
0x2189   :  { %v4395_v14 = vpop.f32.mrb[71].mxu0 }
0x218a   :  { %5145 = vmatmul.mubr.msk.f32.vlgmr.msra.gmra.mrb[72].mxu1 %vm819_vm9, %v4395_v14  ;;  %5147 = vmatmul.mubr.msk.f32.vlgmr.msra.gmra.mrb[72].mxu0 %vm819_vm9, %v4395_v14 }
0x218b   :  { %6589 = vmatpush3.bf16.msra.mxu1 %v7520_v9  ;;  %4480 = vmatprep.mubr.f32.mxu1 %v8308_v0  ;;  %v8390_v9 = vld [vmem:[#allocation53_spill] sm:$0xff] }
0x218c   :  { %4557 = vmatprep.mubr.f32.mxu0 %v8308_v0  ;;  %6591 = vmatprep.subr.bf16.mxu1 %v7542_v26 }
0x218d   :  { %6597 = vmatpush3.bf16.msra.mxu0 %v7544_v31 }
0x218e   :  { %5146 = vmatmul.mubr.msk.f32.gmra.mrb[74].mxu1 %vm819_vm9, %v5999_v20  ;;  %5148 = vmatmul.mubr.msk.f32.gmra.mrb[74].mxu0 %vm819_vm9, %v5999_v20 }
0x218f   :  { %6593 = vmatpush3.bf16.msra.mxu1 %v7542_v26  ;;  %6008 = vmatprep.mubr.msk.f32.mxu1 %vm819_vm9, %v4395_v14  ;;  %v8392_v26 = vld [vmem:[#allocation57_spill] sm:$0xff] }
0x2190   :  { %6627 = vmatprep.subr.bf16.mxu1 %v7552_v39  ;;  %6599 = vmatprep.subr.bf16.mxu0 %v7554_v42  ;;  %v8393_v42 = vld [vmem:[#allocation40_spill] sm:$0xff] }
0x2191   :  { %6601 = vmatpush3.bf16.msra.mxu0 %v7557_v47 }
0x2192   :  { %6009 = vmatmul.mubr.msk.f32.vlgmr.msra.gmra.mrb[76].mxu1 %vm819_vm9, %v5999_v20  ;;  %6603 = vmatprep.subr.bf16.mxu0 %v7561_v49  ;;  %v8394_v49 = vld [vmem:[#allocation41_spill] sm:$0xff] }
0x2193   :  { %6629 = vmatpush3.bf16.msra.mxu1 %v7565_v54 }
0x2194   :  { %6631 = vmatprep.subr.bf16.mxu1 %v7569_v58 }
0x2195   :  { %6605 = vmatpush3.bf16.msra.mxu0 %v7572_v4 }
0x2196   :  { %6607 = vmatprep.subr.bf16.mxu0 %v7576_v5 }
0x2197   :  { %6633 = vmatpush3.bf16.msra.mxu1 %v7579_v10  ;;  %v8395_v10 = vld [vmem:[#allocation43_spill] sm:$0xff] }
0x2198   :  { %6635 = vmatprep.subr.bf16.mxu1 %v7582_v22 }
0x2199   :  { %6609 = vmatpush3.bf16.msra.mxu0 %v7585_v29 }
0x219a   :  { %6611 = vmatprep.subr.bf16.mxu0 %v7588_v30 }
0x219b   :  { %6637 = vmatpush3.bf16.msra.mxu1 %v7591_v34  ;;  %v8396_v34 = vld [vmem:[#allocation44_spill] sm:$0xff] }
0x219c   :  { %6639 = vmatprep.subr.bf16.mxu1 %v7594_v38 }
0x219d   :  { %6613 = vmatpush3.bf16.msra.mxu0 %v7597_v50  ;;  %v8397_v50 = vld [vmem:[#allocation45_spill] sm:$0xff] }
0x219e   :  { %6615 = vmatprep.subr.bf16.mxu0 %v7600_v51 }
0x219f   :  { %6641 = vmatpush3.bf16.msra.mxu1 %v7603_v59 }
0x21a0   :  { %6643 = vmatprep.subr.bf16.mxu1 %v7606_v63 }
0x21a1   :  { %6617 = vmatpush3.bf16.msra.mxu0 %v7609_v23  ;;  %v8398_v23 = vld [vmem:[#allocation46_spill] sm:$0xff] }
0x21a2   :  { %6619 = vmatprep.subr.bf16.mxu0 %v7612_v24 }
0x21a3   :  { %6645 = vmatpush3.bf16.msra.mxu1 %v8366_v35  ;;  %v8399_v35 = vld [vmem:[#allocation47_spill] sm:$0xff] }
0x21a4   :  { %6647 = vmatprep.subr.bf16.mxu1 %v8367_v40 }
0x21a5   :  { %6621 = vmatpush3.bf16.msra.mxu0 %v8385_v44 }
0x21a6   :  { %6623 = vmatprep.subr.bf16.mxu0 %v8386_v52 }
0x21a7   :  { %6649 = vmatpush3.bf16.msra.mxu1 %v8387_v56 }
0x21a8   :  { %6651 = vmatprep.subr.bf16.mxu1 %v8388_v2 }
0x21a9   :  { %6625 = vmatpush3.bf16.msra.mxu0 %v8389_v6 }
0x21aa   :  { %6658 = vmatprep.subr.bf16.mxu0 %v8307_v7 }
0x21ab   :  { %6653 = vmatpush3.bf16.msra.mxu1 %v8390_v9 }
0x21ac   :  { %6655 = vmatprep.subr.bf16.mxu1 %v8391_v12 }
0x21af   :  { %6657 = vmatpush3.bf16.msra.mxu1 %v8392_v26 }
0x21b0   :  { %6661 = vmatprep.subr.bf16.mxu1 %v8307_v7 }
0x225d   :  { %v4476_v31 = vpop.f32.mrb[72].mxu1  ;;  %v4553_v39 = vpop.f32.mrb[72].mxu0 }
0x225e   :  { %v4564_v47 = vmul.f32 %v4476_v31, %v8393_v42  ;;  %v4566_v54 = vmul.f32 %v4553_v39, %v8394_v49  ;;  %v4478_v58 = vpop.f32.mrb[73].mxu1  ;;  %v4555_v4 = vpop.f32.mrb[73].mxu0 }
0x225f   :  { %v4565_v5 = vmul.f32 %v4478_v58, %v8339_v8  ;;  %v4567_v22 = vmul.f32 %v4555_v4, %v8395_v10 }
0x2261   :  { %v4482_v29 = vpop.f32.mrb[74].mxu1  ;;  %v4559_v30 = vpop.f32.mrb[74].mxu0  ;;  %4711 = vmatprep.mubr.f32.mxu0 %v4565_v5  ;;  %4786 = vmatprep.mubr.f32.mxu1 %v4567_v22 }
0x2262   :  { %v4568_v38 = vmul.f32 %v4482_v29, %v8396_v34  ;;  %v4570_v51 = vmul.f32 %v4559_v30, %v8397_v50  ;;  %v4484_v59 = vpop.f32.mrb[75].mxu1  ;;  %v4561_v63 = vpop.f32.mrb[75].mxu0  ;;  %4712 = vmatmul.mubr.f32.vlgmr.msra.gmra.mrb[76].mxu0 %v4564_v47  ;;  %4787 = vmatmul.mubr.f32.vlgmr.msra.gmra.mrb[78].mxu1 %v4566_v54 }
0x2263   :  { %v4569_v24 = vmul.f32 %v4484_v59, %v8398_v23  ;;  %v4571_v40 = vmul.f32 %v4561_v63, %v8399_v35  ;;  %6663 = vmatpush3.bf16.msra.mxu1 %v8400_v37 }
0x2264   :  { %6664 = vmatprep.subr.bf16.mxu1 %v8307_v7 }
0x2265   :  { %v6010_v8 = vpop.f32.mrb[76].mxu1  ;;  %4716 = vmatprep.mubr.f32.mxu0 %v4569_v24  ;;  %4791 = vmatprep.mubr.f32.mxu1 %v4571_v40 }
0x2266   :  { %v4638_v45 = vpop.f32.mrb[77].mxu1  ;;  %4717 = vmatmul.mubr.f32.gmra.mrb[78].mxu0 %v4568_v38  ;;  %4792 = vmatmul.mubr.f32.gmra.mrb[80].mxu1 %v4570_v51 }
0x2267   :  { %6666 = vmatpush3.bf16.msra.mxu1 %v8401_v13  ;;  %6026 = vmatprep.mubr.msk.f32.mxu1 %vm7154_vm0, %v8308_v0 }
0x2268   :  { %6015 = vmatprep.mubr.msk.f32.mxu0 %vm7154_vm0, %v8308_v0 }
0x226a   :  { %6027 = vmatmul.mubr.msk.f32.vlgmr.msra.gmra.mrb[82].mxu1 %vm819_vm9, %v8115_v32 }
0x2335   :  { %v5695_v18 = vpop.f32.mrb[76].mxu0  ;;  %v5733_v11 = vpop.f32.mrb[78].mxu1 }
0x2336   :  { %v5696_v48 = vpop.f32.mrb[77].mxu0  ;;  %v5734_v15 = vpop.f32.mrb[79].mxu1 }
0x2337   :  { %v5697_v46 = vadd.f32 %v5696_v48, %v5695_v18  ;;  %v5735_v21 = vadd.f32 %v5734_v15, %v5733_v11 }
0x2339   :  { %v4714_v53 = vadd.f32 %v5697_v46, %v4638_v45  ;;  %v5698_v36 = vpop.f32.mrb[78].mxu0  ;;  %v5736_v57 = vpop.f32.mrb[80].mxu1 }
0x233a   :  { %v5699_v60 = vpop.f32.mrb[79].mxu0  ;;  %v5737_v17 = vpop.f32.mrb[81].mxu1 }
0x233b   :  { %v4789_v3 = vadd.f32 %v5735_v21, %v4714_v53  ;;  %v5700_v61 = vadd.f32 %v5699_v60, %v5698_v36  ;;  %v5738_v41 = vadd.f32 %v5737_v17, %v5736_v57 }
0x233d   :  { %v4719_v33 = vadd.f32 %v6010_v8, %v5700_v61  ;;  %v4935_v19 = vpop.f32.mrb[82].mxu1 }
0x233e   :  { %v6028_v25 = vpop.f32.mrb[83].mxu1 }
0x233f   :  { %v4794_v55 = vadd.f32 %v5738_v41, %v4719_v33 }
0x2341   :  { %v6659_v20 = vpack.c.bf16 %v4794_v55, %v4789_v3 }
0x2343   :  { %6660 = vmatpush3.bf16.msra.mxu0 %v6659_v20 }
0x2344   :  { %6667 = vmatprep.subr.bf16.mxu0 %v8307_v7 }
0x2346   :  { %6016 = vmatmul.mubr.msk.f32.vlgmr.msra.gmra.mrb[80].mxu0 %vm456_vm5, %v7675_v1 }
0x2347   :  { %6669 = vmatpush3.bf16.msra.mxu0 %v7677_v62  ;;  %6037 = vmatprep.mubr.msk.f32.mxu0 %vm7154_vm0, %v8308_v0 }
0x2348   :  { %6670 = vmatprep.subr.bf16.mxu0 %v8307_v7 }
0x234b   :  { %6672 = vmatpush3.bf16.msra.mxu0 %v7686_v16 }
0x2419   :  { %v4863_v32 = vpop.f32.mrb[80].mxu0 }
0x241a   :  { %v4864_v14 = vadd.f32 %v8095_v27, %v4863_v32  ;;  %v6017_v44 = vpop.f32.mrb[81].mxu0 }
0x241c   :  { %6038 = vmatmul.mubr.msk.f32.vlgmr.msra.gmra.mrb[82].mxu0 %vm819_vm9, %v4864_v14 }
0x24ef   :  { %v5008_v52 = vpop.f32.mrb[82].mxu0 }
0x24f0   :  { %v5009_v56 = vadd.f32 %v5008_v52, %v4935_v19  ;;  %v6039_v2 = vpop.f32.mrb[83].mxu0 }
0x24f2   :  { %v5012_v1 = vadd.f32 %v8104_v43, %v5009_v56 }
0x24f4   :  { %5020 = vrot.lane.b32.xlu1 %v5012_v1, %s7148_s20  ;;  %v5154_v62 = vmul.f32 -1.442695, %v5012_v1  ;;  %s7159_s20 = smov [#allocation28]  }
0x24f5   :  { %s5049_s26 = sshll.u32 %s7159_s20, 4  ;;  %s5050_s26 = int_to_ptr.vmem [resolvable:$true] %s5049_s26 }
0x24f6   :  { %6731 = vpow2.f32 %v5154_v62  ;;  %s7091_s10 = scalar_lea.vmem %s5050_s26, 128  ;;  %p7096_p3 = scmp.lt.s32.totalorder %s5050_s26, %s5050_s26 }
0x24f7   :  { %p7092_p2 = scmp.ne.s32.totalorder %s5050_s26, %s7091_s10  ;;  %p7097_p4 = scmp.lt.s32.totalorder %s7091_s10, %s7091_s10 }
0x24f9   :  { %p7098_p5 = por %p7097_p4, %p7096_p3 }
0x24fb   :  { %p7099_p6 = pnand %p7098_p5, %p7092_p2 }
0x2500   :  { %v6732_v0 = vpop.eup %6731 }
0x2501   :  { %v5016_v6 = vadd.f32 1.0, %v6732_v0 }
0x2503   :  { %6733 = vrcp.f32 %v5016_v6 }
0x250d   :  { %v6734_v7 = vpop.eup %6733 }
0x250e   :  { %v5030_v31 = vsub.f32 1.0, %v6734_v7  ;;  %v5036_v39 = vmul.f32 %v6734_v7, %v8111_v28 }
0x2566   :  { %v5021_v16 = vpop.permute.xlu1 %5020 }
0x2567   :  { %v5023_v9 = vmul.f32 %v6734_v7, %v5021_v16 }
0x2569   :  { %5025 = vrot.lane.b32.xlu0 %v5023_v9, %s7157_s15 }
0x25db   :  { %v5026_v27 = vpop.permute.xlu0 %5025 }
0x25dc   :  { %v5028_v12 = vadd.f32 %v5026_v27, %v5012_v1 }
0x25de   :  { %6735 = vtanh.f32 %v5028_v12 }
0x25e8   :  { %v6736_v26 = vpop.eup %6735 }
0x25e9   :  { %5032 = vrot.lane.b32.xlu1 %v6736_v26, %s7158_s17 }
0x265b   :  { %v5033_v43 = vpop.permute.xlu1 %5032 }
0x265c   :  { %v5035_v42 = vmul.f32 %v5033_v43, %v5030_v31 }
0x265e   :  { %v5037_v47 = vadd.f32 %v5036_v39, %v5035_v42 }
0x2660   :  { %5039 = vrot.lane.b32.xlu0 %v5037_v47, %s7158_s17 }
0x26d2   :  { %v5040_v49 = vpop.permute.xlu0 %5039 }
0x26d3   :  { %5042 = vst.msk [vmem:[#allocation28] sm:$0xff] %vm819_vm9, %v5040_v49 }
0x26d4   :  { %7102 = shalt.err (!%p7099_p6)
}
0x26d5   :  { %s8402_s24 = sld [smem:[#allocation61_spill]] }
0x26db   :  { %s7103_s11 = scalar_lea.hbm %s8402_s24, 128 }
0x26dc   :  { %p7104_p7 = scmp.ne.s32.totalorder %s8402_s24, %s7103_s11  ;;  %p7107_p8 = scmp.lt.u32.totalorder %s7103_s11, %s8402_s24 }
0x26de   :  { %p7109_p9 = pnand %p7107_p8, %p7104_p7 }
0x26e0   :  { %7112 = shalt.err (!%p7109_p9)
}
0x26e1   :  { %5052 = dma.vmem_to_hbm [thread:$0]  %s5050_s26, 128, %s8402_s24, [#allocation4]  }
0x26e2   :  { %7131 = dma.done.wait [#allocation4], 128  }
0x26e3   :  { %7132 = vsyncadd [#allocation4], 4294967168 }
0x26e4   :  { %5056 = vsyncpa [#allocation3], 1 }
0x26e5   :  { %5057 = vsyncpa [#allocation6], 1 }
0x26e6   :  { %5058 = vsyncpa [#allocation9], 1 }
0x26e7   :  { %5059 = vsyncpa [#allocation12], 1 }
0x26e8   :  { %5060 = vsyncpa [#allocation15], 1 }
0x26e9   :  { %5061 = vsyncpa [#allocation18], 1 }
0x26ea   :  { %5062 = vsyncpa [#allocation21], 1 }
0x26eb   :  { %5063 = vsyncpa [#allocation24], 1 }
0x26ec   :  { %5064 = vsyncpa [#allocation27], 1 }
0x26ed   :  { %5065 = vsyncpa [#allocation4], 1 }

</bundles_post_ra>
